<compile_context>
chip_gen: v6e
topology: v6e:2x2x1
jax: 0.10.0
libtpu: 0.0.40
codegen_flags: <defaults>
</compile_context>

<pallas_src>
import functools

import numpy as np
import jax
import jax.numpy as jnp
from jax.experimental import pallas as pl
from jax.experimental.pallas import tpu as pltpu


# ----------------------------------------------------------------------------
# mode selection (deterministic re-implementation of get_frequency_modes)
# ----------------------------------------------------------------------------
def get_frequency_modes(seq_len, modes=64, mode_select_method='random'):
    modes = min(modes, seq_len // 2)
    if mode_select_method == 'random':
        rng = np.random.RandomState(0)          # deterministic, no global state
        index = list(range(0, seq_len // 2))
        rng.shuffle(index)
        index = index[:modes]
    else:
        index = list(range(0, modes))
    index.sort()
    return index


# ----------------------------------------------------------------------------
# DFT / IDFT basis construction (plain numpy -> jnp constants)
# ----------------------------------------------------------------------------
def dft_basis(seq_len, index):
    """Stacked basis (2M, L): rows [0, M) give Re(rfft bin), rows [M, 2M) Im."""
    t = np.arange(seq_len, dtype=np.float64)[None, :]
    k = np.asarray(index, dtype=np.float64)[:, None]
    ang = 2.0 * np.pi * k * t / seq_len
    return np.concatenate([np.cos(ang), -np.sin(ang)], axis=0)   # (2M, L)


def idft_basis(seq_len, index, scale):
    """Fused basis (L, 2M) = [gc | -gs]: irfft restricted to `index`,
    x[t] = sum_m w_m * (re_m cos - im_m sin)(2*pi*k_m*t/L) * scale,
    w_m = 1 for DC / Nyquist bins, 2 otherwise (hermitian extension)."""
    idx = np.asarray(index)
    t = np.arange(seq_len, dtype=np.float64)[:, None]
    k = idx.astype(np.float64)[None, :]
    ang = 2.0 * np.pi * t * k / seq_len
    w = np.where((idx == 0) | ((seq_len % 2 == 0) & (idx == seq_len // 2)),
                 1.0, 2.0)[None, :]
    gc = w * np.cos(ang) * scale
    gs = w * np.sin(ang) * scale
    return np.concatenate([gc, -gs], axis=1)                     # (L, 2M)


# ----------------------------------------------------------------------------
# Pallas kernel: one batch element per grid point, all heads batched on a
# leading dim (never a lane slice).
# ----------------------------------------------------------------------------
def _fca_kernel(xq_ref, xk_ref, fq_ref, fk_ref, g2_ref, wre_ref, wim_ref,
                out_ref, *, n_heads, m_q, m_kv):
    h = n_heads
    xq = xq_ref[0]                                   # (H, L, E)
    xk = xk_ref[0]                                   # (H, S, E)

    # --- rfft at the selected modes: one fused re/im matmul per operand ----
    fq = fq_ref[...]                                 # (2Mq, L)
    fk = fk_ref[...]                                 # (2Mkv, S)
    fq_b = jnp.broadcast_to(fq[None, :, :], (h,) + fq.shape)
    fk_b = jnp.broadcast_to(fk[None, :, :], (h,) + fk.shape)
    qf = jnp.einsum('hml,hle->hme', fq_b, xq,
                    preferred_element_type=jnp.float32)          # (H, 2Mq, E)
    kf = jnp.einsum('hms,hse->hme', fk_b, xk,
                    preferred_element_type=jnp.float32)          # (H, 2Mkv, E)

    # --- frequency-domain scores: ONE batched matmul, quadrants = re/im ----
    a = jnp.einsum('hme,hne->hmn', qf, kf,
                   preferred_element_type=jnp.float32)           # (H, 2Mq, 2Mkv)
    a_re = a[:, :m_q, :m_kv] - a[:, m_q:, m_kv:]                 # (H, Mq, Mkv)
    a_im = a[:, :m_q, m_kv:] + a[:, m_q:, :m_kv]

    # --- complex tanh: tanh(x+iy) = (sinh 2x + i sin 2y)/(cosh 2x + cos 2y)
    tr = jnp.clip(2.0 * a_re, -20.0, 20.0)           # cosh overflow guard
    ti = 2.0 * a_im
    ep = jnp.exp(tr)
    em = jnp.exp(-tr)                                # second EUP exp is free
    inv_den = pl.reciprocal(0.5 * (ep + em) + jnp.cos(ti) + 1e-30, approx=True)
    t_re = 0.5 * (ep - em) * inv_den
    t_im = jnp.sin(ti) * inv_den

    # --- xqkv: ONE batched matmul against the 2x2 complex block of kf ------
    kr = kf[:, :m_kv, :]                             # (H, Mkv, E)
    ki = kf[:, m_kv:, :]
    k_block = jnp.concatenate(
        [jnp.concatenate([kr, ki], axis=2),
         jnp.concatenate([-ki, kr], axis=2)], axis=1)            # (H, 2Mkv, 2E)
    t_cat = jnp.concatenate([t_re, t_im], axis=2)                # (H, Mq, 2Mkv)
    v_pair = jnp.einsum('hmn,hne->hme', t_cat, k_block,
                        preferred_element_type=jnp.float32)      # (H, Mq, 2E) = [v_re | v_im]

    # --- per-mode weight contraction --------------------------------------
    # TODO(synk): per-mode weights make this a batched matvec (M=1); kept as a
    # VPU multiply + sublane reduce rather than hundreds of tiny MXU matmuls.
    y_re = jnp.sum(v_pair[:, :, :, None] * wre_ref[...], axis=2)  # (H, Mq, Eo)
    y_im = jnp.sum(v_pair[:, :, :, None] * wim_ref[...], axis=2)
    y = jnp.concatenate([y_re, y_im], axis=1)                     # (H, 2Mq, Eo)

    # --- sparse irfft: ONE fused [gc | -gs] matmul, batched over heads -----
    g2 = g2_ref[...]                                              # (L, 2Mq)
    g2_b = jnp.broadcast_to(g2[None, :, :], (h,) + g2.shape)
    out_ref[0] = jnp.einsum('hlm,hme->hle', g2_b, y,
                            preferred_element_type=jnp.float32)   # (H, L, Eo)


# ----------------------------------------------------------------------------
# Wrapper (mirrors FourierCrossAttention.forward; v and mask are unused, as in
# the reference module).  activation='tanh' only.
# ----------------------------------------------------------------------------
def fourier_cross_attention(q, k, v, mask, w_re, w_im, index_q, index_kv,
                            in_channels, out_channels):
    # TODO(synk): activation='softmax' branch not implemented (module uses 'tanh').
    del v, mask                                      # unused (matches PyTorch)
    B, L, H, E = q.shape
    S = k.shape[1]
    Eo = out_channels // 8
    Mq, Mkv = len(index_q), len(index_kv)

    # Head axis on a leading dim (one cheap XLA transpose per operand).
    xq = jnp.transpose(q, (0, 2, 1, 3)).astype(jnp.float32)   # (B, H, L, E)
    xk = jnp.transpose(k, (0, 2, 1, 3)).astype(jnp.float32)   # (B, H, S, E)

    fq2 = jnp.asarray(dft_basis(L, index_q), jnp.float32)     # (2Mq, L)
    fk2 = jnp.asarray(dft_basis(S, index_kv), jnp.float32)    # (2Mkv, S)
    g2 = jnp.asarray(
        idft_basis(L, index_q, 1.0 / (L * in_channels * out_channels)),
        jnp.float32)                                          # (L, 2Mq)

    # (8, E, Eo, Mq) -> (H, Mq, E, Eo), then stack re/im along the contraction
    # axis so each output plane needs a single reduce in-kernel.
    wre_m = jnp.transpose(w_re, (0, 3, 1, 2)).astype(jnp.float32)  # (H, Mq, E, Eo)
    wim_m = jnp.transpose(w_im, (0, 3, 1, 2)).astype(jnp.float32)
    wre_stk = jnp.concatenate([wre_m, -wim_m], axis=2)             # (H, Mq, 2E, Eo)
    wim_stk = jnp.concatenate([wim_m, wre_m], axis=2)              # (H, Mq, 2E, Eo)

    kernel = functools.partial(_fca_kernel, n_heads=H, m_q=Mq, m_kv=Mkv)

    # Advisory cost estimate so XLA schedules surrounding ops sensibly.
    flops = 2 * B * H * (2 * Mq * L * E + 2 * Mkv * S * E
                         + 2 * Mq * E * 2 * Mkv + Mq * 2 * Mkv * 2 * E
                         + 2 * Mq * 2 * E * Eo + L * 2 * Mq * Eo)
    transcendentals = 4 * B * H * Mq * Mkv
    bytes_accessed = 4 * (xq.size + xk.size + fq2.size + fk2.size + g2.size
                          + wre_stk.size + wim_stk.size + B * H * L * Eo)

    # Grid-constant operands are single-buffered (their index_map is constant,
    # a second buffer is pure VMEM waste).
    const1 = pl.Buffered(1)

    # NOTE: at B=2 each TensorCore executes one grid step; with larger batches
    # block several batch elements per step (and fold them into the matmul M
    # axis) to amortize the fixed per-step overhead.
    out = pl.pallas_call(
        kernel,
        out_shape=jax.ShapeDtypeStruct((B, H, L, Eo), jnp.float32),
        grid_spec=pltpu.PrefetchScalarGridSpec(
            num_scalar_prefetch=0,
            grid=(B,),
            in_specs=[
                pl.BlockSpec((1, H, L, E), lambda b: (b, 0, 0, 0)),
                pl.BlockSpec((1, H, S, E), lambda b: (b, 0, 0, 0)),
                pl.BlockSpec((2 * Mq, L), lambda b: (0, 0),
                             pipeline_mode=const1),
                pl.BlockSpec((2 * Mkv, S), lambda b: (0, 0),
                             pipeline_mode=const1),
                pl.BlockSpec((L, 2 * Mq), lambda b: (0, 0),
                             pipeline_mode=const1),
                pl.BlockSpec((H, Mq, 2 * E, Eo), lambda b: (0, 0, 0, 0),
                             pipeline_mode=const1),
                pl.BlockSpec((H, Mq, 2 * E, Eo), lambda b: (0, 0, 0, 0),
                             pipeline_mode=const1),
            ],
            out_specs=pl.BlockSpec((1, H, L, Eo), lambda b: (b, 0, 0, 0)),
        ),
        compiler_params=pltpu.CompilerParams(
            dimension_semantics=("parallel",),
            vmem_limit_bytes=64 * 1024 * 1024),
        cost_estimate=pl.CostEstimate(flops=int(flops),
                                      transcendentals=int(transcendentals),
                                      bytes_accessed=int(bytes_accessed)),
    )(xq, xk, fq2, fk2, g2, wre_stk, wim_stk)

    # Restore the module's (B, H, Eo, L) return layout (single cheap transpose).
    return jnp.transpose(out, (0, 1, 3, 2)), None


# ----------------------------------------------------------------------------
# Pure-numpy reference (mirrors the PyTorch forward, complex arithmetic)
# ----------------------------------------------------------------------------
def reference_numpy(q, k, w, index_q, index_kv, in_ch, out_ch):
    B, L, H, E = q.shape
    xq = np.transpose(q, (0, 2, 3, 1))
    xk = np.transpose(k, (0, 2, 3, 1))
    xq_ft_ = np.fft.rfft(xq, axis=-1)[..., index_q]
    xk_ft_ = np.fft.rfft(xk, axis=-1)[..., index_kv]
    xqk = np.einsum('bhex,bhey->bhxy', xq_ft_, xk_ft_)
    xqk = np.tanh(xqk)
    xqkv = np.einsum('bhxy,bhey->bhex', xqk, xk_ft_)
    xqkvw = np.einsum('bhex,heox->bhox', xqkv, w)
    out_ft = np.zeros((B, H, out_ch // 8, L // 2 + 1), dtype=np.complex128)
    out_ft[..., index_q] = xqkvw
    return np.fft.irfft(out_ft / in_ch / out_ch, n=L, axis=-1)


# ----------------------------------------------------------------------------
if __name__ == "__main__":
    B, L, S, H = 2, 16, 16, 8          # H must be 8 (weights1 leading dim)
    in_channels, out_channels = 64, 64
    modes = 4
    E, Eo = in_channels // 8, out_channels // 8

    index_q = get_frequency_modes(L, modes=modes, mode_select_method='random')
    index_kv = get_frequency_modes(S, modes=modes, mode_select_method='random')

    key = jax.random.PRNGKey(0)
    kq, kk, kv_, kwr, kwi = jax.random.split(key, 5)
    q = 0.1 * jax.random.normal(kq, (B, L, H, E), jnp.float32)
    k = 0.1 * jax.random.normal(kk, (B, S, H, E), jnp.float32)
    v = 0.1 * jax.random.normal(kv_, (B, S, H, E), jnp.float32)

    scale = 1.0 / (in_channels * out_channels)
    w_re = scale * jax.random.uniform(kwr, (8, E, Eo, len(index_q)), jnp.float32)
    w_im = scale * jax.random.uniform(kwi, (8, E, Eo, len(index_q)), jnp.float32)

    out, attn = fourier_cross_attention(q, k, v, None, w_re, w_im,
                                        index_q, index_kv,
                                        in_channels, out_channels)
    out = jax.block_until_ready(out)

    ref = reference_numpy(np.asarray(q), np.asarray(k),
                          np.asarray(w_re) + 1j * np.asarray(w_im),
                          index_q, index_kv, in_channels, out_channels)
    err = np.max(np.abs(np.asarray(out) - ref))
    rel = err / (np.max(np.abs(ref)) + 1e-12)
    # 2e-3 budget: f32 matmuls + one EUP approx reciprocal in the complex tanh.
    assert rel < 2e-3, f"max relative error too large: {rel}"
    print("KERNEL_OK")
</pallas_src>

<mosaic_0001>
module attributes {stable_mosaic.version = 11 : i64} {
  func.func @_fca_kernel(%arg0: i32, %arg1: memref<1x8x16x8xf32, #tpu.memory_space<vmem>>, %arg2: memref<1x8x16x8xf32, #tpu.memory_space<vmem>>, %arg3: memref<8x16xf32, #tpu.memory_space<vmem>>, %arg4: memref<8x16xf32, #tpu.memory_space<vmem>>, %arg5: memref<16x8xf32, #tpu.memory_space<vmem>>, %arg6: memref<8x4x16x8xf32, #tpu.memory_space<vmem>>, %arg7: memref<8x4x16x8xf32, #tpu.memory_space<vmem>>, %arg8: memref<1x8x16x8xf32, #tpu.memory_space<vmem>>) attributes {dimension_semantics = [#tpu.dimension_semantics<parallel>], iteration_bounds = array<i64: 2>, scalar_prefetch = 0 : i64, scratch_operands = 0 : i64, tpu.core_type = #tpu.core_type<tc>, window_params = [{transform_indices = @transform_0, window_bounds = array<i64: 1, 8, 16, 8>}, {transform_indices = @transform_1, window_bounds = array<i64: 1, 8, 16, 8>}, {pipeline_mode = #tpu.pipeline_mode<synchronous>, transform_indices = @transform_2, window_bounds = array<i64: 8, 16>}, {pipeline_mode = #tpu.pipeline_mode<synchronous>, transform_indices = @transform_3, window_bounds = array<i64: 8, 16>}, {pipeline_mode = #tpu.pipeline_mode<synchronous>, transform_indices = @transform_4, window_bounds = array<i64: 16, 8>}, {pipeline_mode = #tpu.pipeline_mode<synchronous>, transform_indices = @transform_5, window_bounds = array<i64: 8, 4, 16, 8>}, {pipeline_mode = #tpu.pipeline_mode<synchronous>, transform_indices = @transform_6, window_bounds = array<i64: 8, 4, 16, 8>}, {transform_indices = @transform_7, window_bounds = array<i64: 1, 8, 16, 8>}]} {
    %c0 = arith.constant 0 : index
    %c0_0 = arith.constant 0 : index
    %c0_1 = arith.constant 0 : index
    %c0_2 = arith.constant 0 : index
    %0 = vector.load %arg1[%c0, %c0_0, %c0_1, %c0_2] : memref<1x8x16x8xf32, #tpu.memory_space<vmem>>, vector<1x8x16x8xf32>
    %1 = vector.shape_cast %0 : vector<1x8x16x8xf32> to vector<8x16x8xf32>
    %c0_3 = arith.constant 0 : index
    %c0_4 = arith.constant 0 : index
    %c0_5 = arith.constant 0 : index
    %c0_6 = arith.constant 0 : index
    %2 = vector.load %arg2[%c0_3, %c0_4, %c0_5, %c0_6] : memref<1x8x16x8xf32, #tpu.memory_space<vmem>>, vector<1x8x16x8xf32>
    %3 = vector.shape_cast %2 : vector<1x8x16x8xf32> to vector<8x16x8xf32>
    %c0_7 = arith.constant 0 : index
    %c0_8 = arith.constant 0 : index
    %4 = vector.load %arg3[%c0_7, %c0_8] : memref<8x16xf32, #tpu.memory_space<vmem>>, vector<8x16xf32>
    %c0_9 = arith.constant 0 : index
    %c0_10 = arith.constant 0 : index
    %5 = vector.load %arg4[%c0_9, %c0_10] : memref<8x16xf32, #tpu.memory_space<vmem>>, vector<8x16xf32>
    %6 = vector.shape_cast %4 : vector<8x16xf32> to vector<1x8x16xf32>
    %7 = vector.shape_cast %6 : vector<1x8x16xf32> to vector<1x8x16xf32>
    %8 = vector.broadcast %7 : vector<1x8x16xf32> to vector<8x8x16xf32>
    %9 = vector.shape_cast %5 : vector<8x16xf32> to vector<1x8x16xf32>
    %10 = vector.shape_cast %9 : vector<1x8x16xf32> to vector<1x8x16xf32>
    %11 = vector.broadcast %10 : vector<1x8x16xf32> to vector<8x8x16xf32>
    "tpu.trace_start"() <{level = 10 : i32, message = "hml,hle->hme"}> : () -> ()
    %cst = arith.constant dense<0.000000e+00> : vector<8x8x8xf32>
    %12 = tpu.matmul %8, %1, %cst {dimension_numbers = #tpu.dot_dimension_numbers<[2], [1], [1], [2], [0, 0, 0, 1, 1, 2], [0], [0]>} : vector<8x8x16xf32>, vector<8x16x8xf32>, vector<8x8x8xf32> -> vector<8x8x8xf32>
    "tpu.trace_stop"() : () -> ()
    "tpu.trace_start"() <{level = 10 : i32, message = "hms,hse->hme"}> : () -> ()
    %cst_11 = arith.constant dense<0.000000e+00> : vector<8x8x8xf32>
    %13 = tpu.matmul %11, %3, %cst_11 {dimension_numbers = #tpu.dot_dimension_numbers<[2], [1], [1], [2], [0, 0, 0, 1, 1, 2], [0], [0]>} : vector<8x8x16xf32>, vector<8x16x8xf32>, vector<8x8x8xf32> -> vector<8x8x8xf32>
    "tpu.trace_stop"() : () -> ()
    "tpu.trace_start"() <{level = 10 : i32, message = "hme,hne->hmn"}> : () -> ()
    %cst_12 = arith.constant dense<0.000000e+00> : vector<8x8x8xf32>
    %14 = tpu.matmul %12, %13, %cst_12 {dimension_numbers = #tpu.dot_dimension_numbers<[2], [2], [1], [1], [0, 0, 0, 1, 1, 1], [0], [0]>} : vector<8x8x8xf32>, vector<8x8x8xf32>, vector<8x8x8xf32> -> vector<8x8x8xf32>
    "tpu.trace_stop"() : () -> ()
    %15 = vector.extract_strided_slice %14 {offsets = [0, 0, 0], sizes = [8, 4, 4], strides = [1, 1, 1]} : vector<8x8x8xf32> to vector<8x4x4xf32>
    %16 = vector.extract_strided_slice %14 {offsets = [0, 4, 4], sizes = [8, 4, 4], strides = [1, 1, 1]} : vector<8x8x8xf32> to vector<8x4x4xf32>
    %17 = arith.subf %15, %16 : vector<8x4x4xf32>
    %18 = vector.extract_strided_slice %14 {offsets = [0, 0, 4], sizes = [8, 4, 4], strides = [1, 1, 1]} : vector<8x8x8xf32> to vector<8x4x4xf32>
    %19 = vector.extract_strided_slice %14 {offsets = [0, 4, 0], sizes = [8, 4, 4], strides = [1, 1, 1]} : vector<8x8x8xf32> to vector<8x4x4xf32>
    %20 = arith.addf %18, %19 : vector<8x4x4xf32>
    %cst_13 = arith.constant 2.000000e+00 : f32
    %21 = vector.broadcast %cst_13 : f32 to vector<8x4x4xf32>
    %22 = arith.mulf %21, %17 : vector<8x4x4xf32>
    %cst_14 = arith.constant -2.000000e+01 : f32
    %cst_15 = arith.constant 2.000000e+01 : f32
    %23 = vector.broadcast %cst_14 : f32 to vector<8x4x4xf32>
    %24 = arith.maximumf %23, %22 : vector<8x4x4xf32>
    %25 = vector.broadcast %cst_15 : f32 to vector<8x4x4xf32>
    %26 = arith.minimumf %25, %24 : vector<8x4x4xf32>
    %cst_16 = arith.constant 2.000000e+00 : f32
    %27 = vector.broadcast %cst_16 : f32 to vector<8x4x4xf32>
    %28 = arith.mulf %27, %20 : vector<8x4x4xf32>
    %29 = math.exp %26 : vector<8x4x4xf32>
    %cst_17 = arith.constant 0.000000e+00 : f32
    %30 = vector.broadcast %cst_17 : f32 to vector<8x4x4xf32>
    %31 = arith.subf %30, %26 : vector<8x4x4xf32>
    %32 = math.exp %31 : vector<8x4x4xf32>
    %33 = arith.addf %29, %32 : vector<8x4x4xf32>
    %cst_18 = arith.constant 5.000000e-01 : f32
    %34 = vector.broadcast %cst_18 : f32 to vector<8x4x4xf32>
    %35 = arith.mulf %34, %33 : vector<8x4x4xf32>
    %36 = math.cos %28 : vector<8x4x4xf32>
    %37 = arith.addf %35, %36 : vector<8x4x4xf32>
    %cst_19 = arith.constant 1.000000e-30 : f32
    %38 = vector.broadcast %cst_19 : f32 to vector<8x4x4xf32>
    %39 = arith.addf %37, %38 : vector<8x4x4xf32>
    %40 = tpu.reciprocal %39 {approx = true} : vector<8x4x4xf32> -> vector<8x4x4xf32>
    %41 = arith.subf %29, %32 : vector<8x4x4xf32>
    %cst_20 = arith.constant 5.000000e-01 : f32
    %42 = vector.broadcast %cst_20 : f32 to vector<8x4x4xf32>
    %43 = arith.mulf %42, %41 : vector<8x4x4xf32>
    %44 = arith.mulf %43, %40 : vector<8x4x4xf32>
    %45 = math.sin %28 : vector<8x4x4xf32>
    %46 = arith.mulf %45, %40 : vector<8x4x4xf32>
    %47 = vector.extract_strided_slice %13 {offsets = [0, 0, 0], sizes = [8, 4, 8], strides = [1, 1, 1]} : vector<8x8x8xf32> to vector<8x4x8xf32>
    %48 = vector.extract_strided_slice %13 {offsets = [0, 4, 0], sizes = [8, 4, 8], strides = [1, 1, 1]} : vector<8x8x8xf32> to vector<8x4x8xf32>
    %49 = tpu.concatenate %47, %48 in 2 : vector<8x4x8xf32>, vector<8x4x8xf32> -> vector<8x4x16xf32>
    %cst_21 = arith.constant 0.000000e+00 : f32
    %50 = vector.broadcast %cst_21 : f32 to vector<8x4x8xf32>
    %51 = arith.subf %50, %48 : vector<8x4x8xf32>
    %52 = tpu.concatenate %51, %47 in 2 : vector<8x4x8xf32>, vector<8x4x8xf32> -> vector<8x4x16xf32>
    %53 = tpu.concatenate %49, %52 in 1 : vector<8x4x16xf32>, vector<8x4x16xf32> -> vector<8x8x16xf32>
    %54 = tpu.concatenate %44, %46 in 2 : vector<8x4x4xf32>, vector<8x4x4xf32> -> vector<8x4x8xf32>
    "tpu.trace_start"() <{level = 10 : i32, message = "hmn,hne->hme"}> : () -> ()
    %cst_22 = arith.constant dense<0.000000e+00> : vector<8x4x16xf32>
    %55 = tpu.matmul %54, %53, %cst_22 {dimension_numbers = #tpu.dot_dimension_numbers<[2], [1], [1], [2], [0, 0, 0, 1, 1, 2], [0], [0]>} : vector<8x4x8xf32>, vector<8x8x16xf32>, vector<8x4x16xf32> -> vector<8x4x16xf32>
    "tpu.trace_stop"() : () -> ()
    %56 = vector.shape_cast %55 : vector<8x4x16xf32> to vector<8x4x16x1xf32>
    %c0_23 = arith.constant 0 : index
    %c0_24 = arith.constant 0 : index
    %c0_25 = arith.constant 0 : index
    %c0_26 = arith.constant 0 : index
    %57 = vector.load %arg6[%c0_23, %c0_24, %c0_25, %c0_26] : memref<8x4x16x8xf32, #tpu.memory_space<vmem>>, vector<8x4x16x8xf32>
    %58 = vector.broadcast %56 : vector<8x4x16x1xf32> to vector<8x4x16x8xf32>
    %59 = arith.mulf %58, %57 : vector<8x4x16x8xf32>
    %cst_27 = arith.constant dense<0.000000e+00> : vector<8x4x8xf32>
    %60 = vector.multi_reduction <add>, %59, %cst_27 [2] : vector<8x4x16x8xf32> to vector<8x4x8xf32>
    %61 = vector.shape_cast %55 : vector<8x4x16xf32> to vector<8x4x16x1xf32>
    %c0_28 = arith.constant 0 : index
    %c0_29 = arith.constant 0 : index
    %c0_30 = arith.constant 0 : index
    %c0_31 = arith.constant 0 : index
    %62 = vector.load %arg7[%c0_28, %c0_29, %c0_30, %c0_31] : memref<8x4x16x8xf32, #tpu.memory_space<vmem>>, vector<8x4x16x8xf32>
    %63 = vector.broadcast %61 : vector<8x4x16x1xf32> to vector<8x4x16x8xf32>
    %64 = arith.mulf %63, %62 : vector<8x4x16x8xf32>
    %cst_32 = arith.constant dense<0.000000e+00> : vector<8x4x8xf32>
    %65 = vector.multi_reduction <add>, %64, %cst_32 [2] : vector<8x4x16x8xf32> to vector<8x4x8xf32>
    %66 = tpu.concatenate %60, %65 in 1 : vector<8x4x8xf32>, vector<8x4x8xf32> -> vector<8x8x8xf32>
    %c0_33 = arith.constant 0 : index
    %c0_34 = arith.constant 0 : index
    %67 = vector.load %arg5[%c0_33, %c0_34] : memref<16x8xf32, #tpu.memory_space<vmem>>, vector<16x8xf32>
    %68 = vector.shape_cast %67 : vector<16x8xf32> to vector<1x16x8xf32>
    %69 = vector.shape_cast %68 : vector<1x16x8xf32> to vector<1x16x8xf32>
    %70 = vector.broadcast %69 : vector<1x16x8xf32> to vector<8x16x8xf32>
    "tpu.trace_start"() <{level = 10 : i32, message = "hlm,hme->hle"}> : () -> ()
    %cst_35 = arith.constant dense<0.000000e+00> : vector<8x16x8xf32>
    %71 = tpu.matmul %70, %66, %cst_35 {dimension_numbers = #tpu.dot_dimension_numbers<[2], [1], [1], [2], [0, 0, 0, 1, 1, 2], [0], [0]>} : vector<8x16x8xf32>, vector<8x8x8xf32>, vector<8x16x8xf32> -> vector<8x16x8xf32>
    "tpu.trace_stop"() : () -> ()
    %c0_36 = arith.constant 0 : index
    %c0_37 = arith.constant 0 : index
    %c0_38 = arith.constant 0 : index
    %c0_39 = arith.constant 0 : index
    %72 = vector.load %arg8[%c0_36, %c0_37, %c0_38, %c0_39] : memref<1x8x16x8xf32, #tpu.memory_space<vmem>>, vector<1x8x16x8xf32>
    %73 = vector.shape_cast %72 : vector<1x8x16x8xf32> to vector<8x16x8xf32>
    %74 = vector.shape_cast %71 : vector<8x16x8xf32> to vector<1x8x16x8xf32>
    tpu.vector_store %arg8[%c0_36, %c0_37, %c0_38, %c0_39], %74 {strides = array<i32>} : memref<1x8x16x8xf32, #tpu.memory_space<vmem>>, vector<1x8x16x8xf32>,
    return
  }
  func.func @transform_0(%arg0: i32) -> (i32, i32, i32, i32) {
    %c0_i32 = arith.constant 0 : i32
    %c0_i32_0 = arith.constant 0 : i32
    %c0_i32_1 = arith.constant 0 : i32
    %c0_i32_2 = arith.constant 0 : i32
    return %arg0, %c0_i32, %c0_i32_0, %c0_i32_1 : i32, i32, i32, i32
  }
  func.func @transform_1(%arg0: i32) -> (i32, i32, i32, i32) {
    %c0_i32 = arith.constant 0 : i32
    %c0_i32_0 = arith.constant 0 : i32
    %c0_i32_1 = arith.constant 0 : i32
    %c0_i32_2 = arith.constant 0 : i32
    return %arg0, %c0_i32, %c0_i32_0, %c0_i32_1 : i32, i32, i32, i32
  }
  func.func @transform_2(%arg0: i32) -> (i32, i32) {
    %c0_i32 = arith.constant 0 : i32
    %c0_i32_0 = arith.constant 0 : i32
    %c0_i32_1 = arith.constant 0 : i32
    return %c0_i32, %c0_i32_0 : i32, i32
  }
  func.func @transform_3(%arg0: i32) -> (i32, i32) {
    %c0_i32 = arith.constant 0 : i32
    %c0_i32_0 = arith.constant 0 : i32
    %c0_i32_1 = arith.constant 0 : i32
    return %c0_i32, %c0_i32_0 : i32, i32
  }
  func.func @transform_4(%arg0: i32) -> (i32, i32) {
    %c0_i32 = arith.constant 0 : i32
    %c0_i32_0 = arith.constant 0 : i32
    %c0_i32_1 = arith.constant 0 : i32
    return %c0_i32, %c0_i32_0 : i32, i32
  }
  func.func @transform_5(%arg0: i32) -> (i32, i32, i32, i32) {
    %c0_i32 = arith.constant 0 : i32
    %c0_i32_0 = arith.constant 0 : i32
    %c0_i32_1 = arith.constant 0 : i32
    %c0_i32_2 = arith.constant 0 : i32
    %c0_i32_3 = arith.constant 0 : i32
    return %c0_i32, %c0_i32_0, %c0_i32_1, %c0_i32_2 : i32, i32, i32, i32
  }
  func.func @transform_6(%arg0: i32) -> (i32, i32, i32, i32) {
    %c0_i32 = arith.constant 0 : i32
    %c0_i32_0 = arith.constant 0 : i32
    %c0_i32_1 = arith.constant 0 : i32
    %c0_i32_2 = arith.constant 0 : i32
    %c0_i32_3 = arith.constant 0 : i32
    return %c0_i32, %c0_i32_0, %c0_i32_1, %c0_i32_2 : i32, i32, i32, i32
  }
  func.func @transform_7(%arg0: i32) -> (i32, i32, i32, i32) {
    %c0_i32 = arith.constant 0 : i32
    %c0_i32_0 = arith.constant 0 : i32
    %c0_i32_1 = arith.constant 0 : i32
    %c0_i32_2 = arith.constant 0 : i32
    return %arg0, %c0_i32, %c0_i32_0, %c0_i32_1 : i32, i32, i32, i32
  }
}

</mosaic_0001>

<bundles_post_ra>
// kernel: tpu_custom_call.1
= control target key start
LH: loop header
LB: loop body
LE: loop exit
PB: predicated region body
PF: predicated region fallthrough
CT: control target
= control target key end

     0   :  { %s7360_s24 = smov 0   ;;  %s9975_s0 = inlined_call_operand.vmem [shape: f32[2,8,16,8], index: 0, kind: input, shape index: {}]   ;;  %s9976_s1 = inlined_call_operand.vmem [shape: f32[2,8,16,8], index: 1, kind: input, shape index: {}]   ;;  %s9977_s2 = inlined_call_operand.vmem [shape: f32[8,16], index: 2, kind: input, shape index: {}]   ;;  %s9978_s3 = inlined_call_operand.vmem [shape: f32[8,16], index: 3, kind: input, shape index: {}]   ;;  %s9979_s4 = inlined_call_operand.vmem [shape: f32[16,8], index: 4, kind: input, shape index: {}]   ;;  %s9980_s5 = inlined_call_operand.vmem [shape: f32[8,4,16,8], index: 5, kind: input, shape index: {}]   ;;  %s9981_s6 = inlined_call_operand.vmem [shape: f32[8,4,16,8], index: 6, kind: input, shape index: {}]   ;;  %s9982_s7 = inlined_call_operand.vmem [shape: f32[2,8,16,8], index: 7, kind: output, shape index: {}]  }
   0x1 LB: > { %s6688_s25 = sadd.s32 4294967295, %s7307_s24   ;;  %p6692_p0 = scmp.ge.s32.totalorder %s7307_s24, 1  ;;  %s7307_s24 = sphi %s7360_s24, %s17_s24  }
   0x2   : > { %p247_p1 = scmp.lt.s32.totalorder %s7307_s24, 3 }
   0x4   : > { %p248_p2 = pnand %p6692_p0, %p247_p1 }
   0x6   : > { %251 = sbr.rel (%p248_p2) target bundleno = 1637 (0x665), region = 48 }
   0xb   : > { %p284_p3 = scmp.lt.s32.totalorder %s6688_s25, 1  ;;  %v9983_v0 = vmov 0.0   ;;  %vm7310_vm0 = vmmov 0   ;;  %v331_v5 = vld [vmem:[%s9977_s2] sm:$0xff]  ;;  %vm333_vm1 = vcmask 130048   ;;  %vm1460_vm2 = vcmask 64512  }
   0xc   : > { %6936 = vmatprep.subr.mxu0 %v9983_v0  ;;  %6943 = vmatprep.subr.mxu1 %v9983_v0  ;;  %v332_v22 = vld [vmem:[%s9978_s3] sm:$0xff]  ;;  %s7311_s14 = smov 4   ;;  %s7312_s15 = smov 124  }
   0xd   : > { %s10187_s25 = smov (!%p284_p3, %s6688_s25), 1  ;;  %6940 = vmatprep.mubr.msk.f32.mxu0 %vm7310_vm0, %v9983_v0  ;;  %6947 = vmatprep.mubr.msk.f32.mxu1 %vm7310_vm0, %v9983_v0  ;;  %s7319_s16 = smov 8  }
   0xe   : > { %s7374_s26 = sshll.u32 %s10187_s25, 7 }
   0xf   : > { %s7380_s29 = scalar_lea.vmem %s9975_s0, %s7374_s26  ;;  %s7431_s11 = scalar_lea.vmem %s9976_s1, %s7374_s26 }
  0x10   : > { %v300_v1 = vld [vmem:[%s7380_s29 + $0x8] sm:$0xff]  ;;  %v302_v2 = vld [vmem:[%s7380_s29 + $0x18] sm:$0xff]  ;;  %v299_v3 = vld [vmem:[%s7380_s29] sm:$0xff]  ;;  %s9938_s10 = scalar_lea.vmem %s9982_s7, %s7374_s26 }
  0x11   : > { %6937 = vmatpush3.msra.mxu0 %v300_v1  ;;  %6944 = vmatpush3.msra.mxu1 %v302_v2  ;;  %v301_v4 = vld [vmem:[%s7380_s29 + $0x10] sm:$0xff]  ;;  %v304_v6 = vld [vmem:[%s7380_s29 + $0x28] sm:$0xff]  ;;  %v306_v7 = vld [vmem:[%s7380_s29 + $0x38] sm:$0xff] }
  0x12   : > { %6938 = vmatprep.subr.mxu0 %v9983_v0  ;;  %6945 = vmatprep.subr.mxu1 %v9983_v0  ;;  %v303_v8 = vld [vmem:[%s7380_s29 + $0x20] sm:$0xff]  ;;  %v305_v9 = vld [vmem:[%s7380_s29 + $0x30] sm:$0xff]  ;;  %v308_v10 = vld [vmem:[%s7380_s29 + $0x48] sm:$0xff] }
  0x13   : > { %6939 = vmatpush3.msra.mxu0 %v299_v3  ;;  %6946 = vmatpush3.msra.mxu1 %v301_v4  ;;  %v310_v11 = vld [vmem:[%s7380_s29 + $0x58] sm:$0xff]  ;;  %v307_v12 = vld [vmem:[%s7380_s29 + $0x40] sm:$0xff]  ;;  %v309_v13 = vld [vmem:[%s7380_s29 + $0x50] sm:$0xff] }
  0x14   : > { %6941 = vmatmul.mubr.msk.f32.vlgmr.msra.gmra.mxu0 %vm333_vm1, %v331_v5  ;;  %6948 = vmatmul.mubr.msk.f32.vlgmr.msra.gmra.mxu1 %vm333_vm1, %v331_v5  ;;  %v312_v14 = vld [vmem:[%s7380_s29 + $0x68] sm:$0xff]  ;;  %v314_v15 = vld [vmem:[%s7380_s29 + $0x78] sm:$0xff]  ;;  %v311_v16 = vld [vmem:[%s7380_s29 + $0x60] sm:$0xff] }
  0x15   : > { %6950 = vmatprep.subr.mxu0 %v9983_v0  ;;  %6957 = vmatprep.subr.mxu1 %v9983_v0  ;;  %v313_v17 = vld [vmem:[%s7380_s29 + $0x70] sm:$0xff]  ;;  %v316_v18 = vld [vmem:[%s7431_s11 + $0x8] sm:$0xff]  ;;  %v318_v19 = vld [vmem:[%s7431_s11 + $0x18] sm:$0xff] }
  0x16   : > { %6951 = vmatpush3.msra.mxu0 %v304_v6  ;;  %6958 = vmatpush3.msra.mxu1 %v306_v7  ;;  %v315_v20 = vld [vmem:[%s7431_s11] sm:$0xff]  ;;  %v317_v21 = vld [vmem:[%s7431_s11 + $0x10] sm:$0xff]  ;;  %v320_v23 = vld [vmem:[%s7431_s11 + $0x28] sm:$0xff] }
  0x17   : > { %6952 = vmatprep.subr.mxu0 %v9983_v0  ;;  %6959 = vmatprep.subr.mxu1 %v9983_v0  ;;  %v322_v24 = vld [vmem:[%s7431_s11 + $0x38] sm:$0xff]  ;;  %v319_v25 = vld [vmem:[%s7431_s11 + $0x20] sm:$0xff]  ;;  %v321_v26 = vld [vmem:[%s7431_s11 + $0x30] sm:$0xff] }
  0x18   : > { %6953 = vmatpush3.msra.mxu0 %v303_v8  ;;  %6954 = vmatprep.mubr.msk.f32.mxu0 %vm7310_vm0, %v9983_v0  ;;  %v324_v27 = vld [vmem:[%s7431_s11 + $0x48] sm:$0xff]  ;;  %v326_v28 = vld [vmem:[%s7431_s11 + $0x58] sm:$0xff]  ;;  %v323_v29 = vld [vmem:[%s7431_s11 + $0x40] sm:$0xff] }
  0x19   : > { %6960 = vmatpush3.msra.mxu1 %v305_v9  ;;  %6961 = vmatprep.mubr.msk.f32.mxu1 %vm7310_vm0, %v9983_v0  ;;  %v325_v30 = vld [vmem:[%s7431_s11 + $0x50] sm:$0xff]  ;;  %v328_v31 = vld [vmem:[%s7431_s11 + $0x68] sm:$0xff]  ;;  %v330_v32 = vld [vmem:[%s7431_s11 + $0x78] sm:$0xff] }
  0x1a   : > { %6955 = vmatmul.mubr.msk.f32.vlgmr.msra.gmra.mxu0 %vm333_vm1, %v331_v5  ;;  %6962 = vmatmul.mubr.msk.f32.vlgmr.msra.gmra.mxu1 %vm333_vm1, %v331_v5  ;;  %v327_v33 = vld [vmem:[%s7431_s11 + $0x60] sm:$0xff]  ;;  %v329_v34 = vld [vmem:[%s7431_s11 + $0x70] sm:$0xff] }
  0x1b   : > { %6964 = vmatprep.subr.mxu0 %v9983_v0  ;;  %6971 = vmatprep.subr.mxu1 %v9983_v0 }
  0x1c   : > { %6965 = vmatpush3.msra.mxu0 %v308_v10  ;;  %6972 = vmatpush3.msra.mxu1 %v310_v11 }
  0x1d   : > { %6966 = vmatprep.subr.mxu0 %v9983_v0  ;;  %6973 = vmatprep.subr.mxu1 %v9983_v0 }
  0x1e   : > { %6967 = vmatpush3.msra.mxu0 %v307_v12  ;;  %6968 = vmatprep.mubr.msk.f32.mxu0 %vm7310_vm0, %v9983_v0 }
  0x1f   : > { %6974 = vmatpush3.msra.mxu1 %v309_v13  ;;  %6975 = vmatprep.mubr.msk.f32.mxu1 %vm7310_vm0, %v9983_v0 }
  0x20   : > { %6969 = vmatmul.mubr.msk.f32.vlgmr.msra.gmra.mxu0 %vm333_vm1, %v331_v5  ;;  %6976 = vmatmul.mubr.msk.f32.vlgmr.msra.gmra.mxu1 %vm333_vm1, %v331_v5 }
  0x21   : > { %6978 = vmatprep.subr.mxu0 %v9983_v0  ;;  %6985 = vmatprep.subr.mxu1 %v9983_v0 }
  0x22   : > { %6979 = vmatpush3.msra.mxu0 %v312_v14  ;;  %6986 = vmatpush3.msra.mxu1 %v314_v15 }
  0x23   : > { %6980 = vmatprep.subr.mxu0 %v9983_v0  ;;  %6987 = vmatprep.subr.mxu1 %v9983_v0 }
  0x24   : > { %6981 = vmatpush3.msra.mxu0 %v311_v16  ;;  %6982 = vmatprep.mubr.msk.f32.mxu0 %vm7310_vm0, %v9983_v0 }
  0x25   : > { %6988 = vmatpush3.msra.mxu1 %v313_v17  ;;  %6989 = vmatprep.mubr.msk.f32.mxu1 %vm7310_vm0, %v9983_v0 }
  0x26   : > { %6983 = vmatmul.mubr.msk.f32.vlgmr.msra.gmra.mxu0 %vm333_vm1, %v331_v5  ;;  %6990 = vmatmul.mubr.msk.f32.vlgmr.msra.gmra.mxu1 %vm333_vm1, %v331_v5 }
  0x27   : > { %6992 = vmatprep.subr.mxu0 %v9983_v0  ;;  %6999 = vmatprep.subr.mxu1 %v9983_v0 }
  0x28   : > { %6993 = vmatpush3.msra.mxu0 %v316_v18  ;;  %7000 = vmatpush3.msra.mxu1 %v318_v19 }
  0x29   : > { %6994 = vmatprep.subr.mxu0 %v9983_v0  ;;  %7001 = vmatprep.subr.mxu1 %v9983_v0 }
  0x2a   : > { %6995 = vmatpush3.msra.mxu0 %v315_v20  ;;  %6996 = vmatprep.mubr.msk.f32.mxu0 %vm7310_vm0, %v9983_v0 }
  0x2b   : > { %7002 = vmatpush3.msra.mxu1 %v317_v21  ;;  %7003 = vmatprep.mubr.msk.f32.mxu1 %vm7310_vm0, %v9983_v0 }
  0x2c   : > { %6997 = vmatmul.mubr.msk.f32.vlgmr.msra.gmra.mxu0 %vm333_vm1, %v332_v22  ;;  %7004 = vmatmul.mubr.msk.f32.vlgmr.msra.gmra.mxu1 %vm333_vm1, %v332_v22 }
  0x2d   : > { %7006 = vmatprep.subr.mxu0 %v9983_v0  ;;  %7013 = vmatprep.subr.mxu1 %v9983_v0 }
  0x2e   : > { %7007 = vmatpush3.msra.mxu0 %v320_v23  ;;  %7014 = vmatpush3.msra.mxu1 %v322_v24 }
  0x2f   : > { %7008 = vmatprep.subr.mxu0 %v9983_v0  ;;  %7015 = vmatprep.subr.mxu1 %v9983_v0 }
  0x30   : > { %7009 = vmatpush3.msra.mxu0 %v319_v25  ;;  %7010 = vmatprep.mubr.msk.f32.mxu0 %vm7310_vm0, %v9983_v0 }
  0x31   : > { %7016 = vmatpush3.msra.mxu1 %v321_v26  ;;  %7017 = vmatprep.mubr.msk.f32.mxu1 %vm7310_vm0, %v9983_v0 }
  0x32   : > { %7011 = vmatmul.mubr.msk.f32.vlgmr.msra.gmra.mxu0 %vm333_vm1, %v332_v22  ;;  %7018 = vmatmul.mubr.msk.f32.vlgmr.msra.gmra.mxu1 %vm333_vm1, %v332_v22 }
  0x33   : > { %7020 = vmatprep.subr.mxu0 %v9983_v0  ;;  %7027 = vmatprep.subr.mxu1 %v9983_v0 }
  0x34   : > { %7021 = vmatpush3.msra.mxu0 %v324_v27  ;;  %7028 = vmatpush3.msra.mxu1 %v326_v28 }
  0x35   : > { %7022 = vmatprep.subr.mxu0 %v9983_v0  ;;  %7029 = vmatprep.subr.mxu1 %v9983_v0 }
  0x36   : > { %7023 = vmatpush3.msra.mxu0 %v323_v29  ;;  %7024 = vmatprep.mubr.msk.f32.mxu0 %vm7310_vm0, %v9983_v0 }
  0x37   : > { %7030 = vmatpush3.msra.mxu1 %v325_v30  ;;  %7031 = vmatprep.mubr.msk.f32.mxu1 %vm7310_vm0, %v9983_v0 }
  0x38   : > { %7025 = vmatmul.mubr.msk.f32.vlgmr.msra.gmra.mxu0 %vm333_vm1, %v332_v22  ;;  %7032 = vmatmul.mubr.msk.f32.vlgmr.msra.gmra.mxu1 %vm333_vm1, %v332_v22 }
  0x39   : > { %7034 = vmatprep.subr.mxu0 %v9983_v0  ;;  %7041 = vmatprep.subr.mxu1 %v9983_v0 }
  0x3a   : > { %7035 = vmatpush3.msra.mxu0 %v328_v31  ;;  %7042 = vmatpush3.msra.mxu1 %v330_v32 }
  0x3b   : > { %7036 = vmatprep.subr.mxu0 %v9983_v0  ;;  %7043 = vmatprep.subr.mxu1 %v9983_v0 }
  0x3c   : > { %7037 = vmatpush3.msra.mxu0 %v327_v33  ;;  %7038 = vmatprep.mubr.msk.f32.mxu0 %vm7310_vm0, %v9983_v0 }
  0x3d   : > { %7044 = vmatpush3.msra.mxu1 %v329_v34  ;;  %7045 = vmatprep.mubr.msk.f32.mxu1 %vm7310_vm0, %v9983_v0 }
  0x3e   : > { %7039 = vmatmul.mubr.msk.f32.vlgmr.msra.gmra.mxu0 %vm333_vm1, %v332_v22  ;;  %7046 = vmatmul.mubr.msk.f32.vlgmr.msra.gmra.mxu1 %vm333_vm1, %v332_v22 }
  0x3f   : > { %7048 = vmatprep.subr.mxu0 %v9983_v0  ;;  %7053 = vmatprep.subr.mxu1 %v9983_v0 }
  0x40   : > { %7050 = vmatprep.mubr.msk.f32.mxu0 %vm7310_vm0, %v9983_v0  ;;  %7055 = vmatprep.mubr.msk.f32.mxu1 %vm7310_vm0, %v9983_v0 }
  0xd4   : > { %v403_v35 = vpop.f32.mrf.mxu0  ;;  %v473_v36 = vpop.f32.mrf.mxu1 }
  0xd6   : > { %v6942_v37 = vpop.f32.mrf.mxu0  ;;  %v6949_v38 = vpop.f32.mrf.mxu1 }
  0xda   : > { %v543_v39 = vpop.f32.mrf.mxu0  ;;  %v613_v40 = vpop.f32.mrf.mxu1 }
  0xdc   : > { %v6956_v41 = vpop.f32.mrf.mxu0  ;;  %v6963_v42 = vpop.f32.mrf.mxu1 }
  0xe0   : > { %v683_v43 = vpop.f32.mrf.mxu0  ;;  %v753_v44 = vpop.f32.mrf.mxu1 }
  0xe2   : > { %v6970_v45 = vpop.f32.mrf.mxu0  ;;  %v6977_v46 = vpop.f32.mrf.mxu1 }
  0xe6   : > { %v823_v47 = vpop.f32.mrf.mxu0  ;;  %v893_v48 = vpop.f32.mrf.mxu1 }
  0xe8   : > { %v6984_v49 = vpop.f32.mrf.mxu0  ;;  %v6991_v50 = vpop.f32.mrf.mxu1 }
  0xec   : > { %v7506_v51 = vpop.f32.mrf.mxu0  ;;  %v7508_v52 = vpop.f32.mrf.mxu1 }
  0xed   : > { %10065 = vst [vmem:[#allocation2_spill] sm:$0xff] %v7506_v51  ;;  %10066 = vst [vmem:[#allocation3_spill] sm:$0xff] %v7508_v52  ;;  %7049 = vmatpush3.xpose.msk.msra.mxu0 %vm1460_vm2, %v7506_v51  ;;  %7054 = vmatpush3.xpose.msk.msra.mxu1 %vm1460_vm2, %v7508_v52 }
  0xee   : > { %v6998_v53 = vpop.f32.mrf.mxu0  ;;  %v7005_v54 = vpop.f32.mrf.mxu1  ;;  %7058 = vmatprep.subr.mxu0 %v9983_v0  ;;  %7063 = vmatprep.subr.mxu1 %v9983_v0 }
  0xf0   : > { %7051 = vmatmul.mubr.msk.f32.vlgmr.msra.gmra.mxu0 %vm1460_vm2, %v403_v35  ;;  %7056 = vmatmul.mubr.msk.f32.vlgmr.msra.gmra.mxu1 %vm1460_vm2, %v473_v36 }
  0xf1   : > { %7060 = vmatprep.mubr.msk.f32.mxu0 %vm7310_vm0, %v9983_v0  ;;  %7065 = vmatprep.mubr.msk.f32.mxu1 %vm7310_vm0, %v9983_v0 }
  0xf2   : > { %v7522_v55 = vpop.f32.mrf.mxu0  ;;  %v7524_v56 = vpop.f32.mrf.mxu1 }
  0xf3   : > { %10067 = vst [vmem:[#allocation4_spill] sm:$0xff] %v7522_v55  ;;  %10068 = vst [vmem:[#allocation5_spill] sm:$0xff] %v7524_v56  ;;  %7059 = vmatpush3.xpose.msk.msra.mxu0 %vm1460_vm2, %v7522_v55  ;;  %7064 = vmatpush3.xpose.msk.msra.mxu1 %vm1460_vm2, %v7524_v56 }
  0xf4   : > { %v7012_v57 = vpop.f32.mrf.mxu0  ;;  %v7019_v58 = vpop.f32.mrf.mxu1  ;;  %7068 = vmatprep.subr.mxu0 %v9983_v0  ;;  %7073 = vmatprep.subr.mxu1 %v9983_v0 }
  0xf6   : > { %7061 = vmatmul.mubr.msk.f32.vlgmr.msra.gmra.mxu0 %vm1460_vm2, %v543_v39  ;;  %7066 = vmatmul.mubr.msk.f32.vlgmr.msra.gmra.mxu1 %vm1460_vm2, %v613_v40 }
  0xf7   : > { %7070 = vmatprep.mubr.msk.f32.mxu0 %vm7310_vm0, %v9983_v0  ;;  %7075 = vmatprep.mubr.msk.f32.mxu1 %vm7310_vm0, %v9983_v0 }
  0xf8   : > { %v7538_v59 = vpop.f32.mrf.mxu0  ;;  %v7540_v60 = vpop.f32.mrf.mxu1 }
  0xf9   : > { %10069 = vst [vmem:[#allocation6_spill] sm:$0xff] %v7538_v59  ;;  %10070 = vst [vmem:[#allocation7_spill] sm:$0xff] %v7540_v60  ;;  %7069 = vmatpush3.xpose.msk.msra.mxu0 %vm1460_vm2, %v7538_v59  ;;  %7074 = vmatpush3.xpose.msk.msra.mxu1 %vm1460_vm2, %v7540_v60 }
  0xfa   : > { %v7026_v61 = vpop.f32.mrf.mxu0  ;;  %v7033_v62 = vpop.f32.mrf.mxu1  ;;  %7078 = vmatprep.subr.mxu0 %v9983_v0  ;;  %7083 = vmatprep.subr.mxu1 %v9983_v0 }
  0xfc   : > { %7071 = vmatmul.mubr.msk.f32.vlgmr.msra.gmra.mxu0 %vm1460_vm2, %v683_v43  ;;  %7076 = vmatmul.mubr.msk.f32.vlgmr.msra.gmra.mxu1 %vm1460_vm2, %v753_v44 }
  0xfd   : > { %7080 = vmatprep.mubr.msk.f32.mxu0 %vm7310_vm0, %v9983_v0  ;;  %7085 = vmatprep.mubr.msk.f32.mxu1 %vm7310_vm0, %v9983_v0 }
  0xfe   : > { %v7554_v63 = vpop.f32.mrf.mxu0  ;;  %v7556_v1 = vpop.f32.mrf.mxu1 }
  0xff   : > { %10071 = vst [vmem:[#allocation8_spill] sm:$0xff] %v7554_v63  ;;  %10072 = vst [vmem:[#allocation9_spill] sm:$0xff] %v7556_v1  ;;  %7079 = vmatpush3.xpose.msk.msra.mxu0 %vm1460_vm2, %v7554_v63  ;;  %7084 = vmatpush3.xpose.msk.msra.mxu1 %vm1460_vm2, %v7556_v1  ;;  %v10088_v1 = vmov 2102212464  }
 0x100   : > { %v7040_v2 = vpop.f32.mrf.mxu0  ;;  %v7047_v3 = vpop.f32.mrf.mxu1  ;;  %7088 = vmatprep.subr.mxu0 %v9983_v0  ;;  %7093 = vmatprep.subr.mxu1 %v9983_v0 }
 0x102   : > { %7081 = vmatmul.mubr.msk.f32.vlgmr.msra.gmra.mxu0 %vm1460_vm2, %v823_v47  ;;  %7086 = vmatmul.mubr.msk.f32.vlgmr.msra.gmra.mxu1 %vm1460_vm2, %v893_v48 }
 0x103   : > { %7090 = vmatprep.mubr.msk.f32.mxu0 %vm7310_vm0, %v9983_v0  ;;  %7095 = vmatprep.mubr.msk.f32.mxu1 %vm7310_vm0, %v9983_v0 }
 0x1b0   : > { %v7570_v4 = vpop.f32.mrf.mxu0  ;;  %v7572_v5 = vpop.f32.mrf.mxu1 }
 0x1b1   : > { %v2077_v6 = vrot.slane %v7570_v4, 4  ;;  %v2078_v9 = vrot.slane %v7572_v5, 4 }
 0x1b2   : > { %v7052_v7 = vpop.f32.mrf.mxu0  ;;  %v7057_v8 = vpop.f32.mrf.mxu1 }
 0x1b3   : > { %2117 = vrot.lane.b32.xlu0 %v2077_v6, %s7311_s14 }
 0x1b6   : > { %v7577_v10 = vpop.f32.mrf.mxu0  ;;  %v7579_v11 = vpop.f32.mrf.mxu1 }
 0x1b7   : > { %2119 = vrot.lane.b32.xlu0 %v2078_v9, %s7311_s14  ;;  %v2079_v12 = vrot.slane %v7577_v10, 4  ;;  %v2080_v15 = vrot.slane %v7579_v11, 4 }
 0x1b8   : > { %v7062_v13 = vpop.f32.mrf.mxu0  ;;  %v7067_v14 = vpop.f32.mrf.mxu1 }
 0x1b9   : > { %2121 = vrot.lane.b32.xlu1 %v2079_v12, %s7311_s14 }
 0x1bc   : > { %v7585_v16 = vpop.f32.mrf.mxu0  ;;  %v7587_v17 = vpop.f32.mrf.mxu1 }
 0x1bd   : > { %10073 = vst [vmem:[#allocation10_spill] sm:$0xff] %v7587_v17  ;;  %v2081_v18 = vrot.slane %v7585_v16, 4  ;;  %2123 = vrot.lane.b32.xlu1 %v2080_v15, %s7311_s14  ;;  %v2082_v21 = vrot.slane %v7587_v17, 4 }
 0x1be   : > { %v7072_v19 = vpop.f32.mrf.mxu0  ;;  %v7077_v20 = vpop.f32.mrf.mxu1 }
 0x1bf   : > { %2125 = vrot.lane.b32.xlu0 %v2081_v18, %s7311_s14 }
 0x1c1   : > { %2127 = vrot.lane.b32.xlu1 %v2082_v21, %s7311_s14 }
 0x1c2   : > { %v7594_v22 = vpop.f32.mrf.mxu0  ;;  %v7596_v23 = vpop.f32.mrf.mxu1 }
 0x1c3   : > { %10074 = vst [vmem:[#allocation11_spill] sm:$0xff] %v7594_v22  ;;  %10075 = vst [vmem:[#allocation12_spill] sm:$0xff] %v7596_v23  ;;  %v2083_v24 = vrot.slane %v7594_v22, 4  ;;  %v2084_v25 = vrot.slane %v7596_v23, 4 }
 0x1c4   : > { %v7082_v26 = vpop.f32.mrf.mxu0  ;;  %v7087_v27 = vpop.f32.mrf.mxu1 }
 0x1c5   : > { %2129 = vrot.lane.b32.xlu0 %v2083_v24, %s7311_s14  ;;  %2131 = vrot.lane.b32.xlu1 %v2084_v25, %s7311_s14 }
 0x1c9   : > { %2085 = vrot.lane.b32.xlu0 %v2077_v6, %s7312_s15  ;;  %2087 = vrot.lane.b32.xlu1 %v2078_v9, %s7312_s15 }
 0x1cd   : > { %2089 = vrot.lane.b32.xlu0 %v2079_v12, %s7312_s15  ;;  %2091 = vrot.lane.b32.xlu1 %v2080_v15, %s7312_s15 }
 0x1d1   : > { %2093 = vrot.lane.b32.xlu0 %v2081_v18, %s7312_s15  ;;  %2095 = vrot.lane.b32.xlu1 %v2082_v21, %s7312_s15 }
 0x1d5   : > { %2097 = vrot.lane.b32.xlu0 %v2083_v24, %s7312_s15  ;;  %2099 = vrot.lane.b32.xlu1 %v2084_v25, %s7312_s15 }
 0x225   : > { %v2118_v28 = vpop.permute.xlu0 %2117 }
 0x226   : > { %v2141_v29 = vadd.f32 %v2118_v28, %v7570_v4 }
 0x228   : > { %v7611_v30 = vmul.f32 2.0, %v2141_v29 }
 0x229   : > { %v2120_v31 = vpop.permute.xlu0 %2119 }
 0x22a   : > { %v2240_v33 = vand.u32 2139095040, %v7611_v30  ;;  %v2142_v35 = vadd.f32 %v2120_v31, %v7572_v5  ;;  %v9986_v6 = vand.u32 2147483647, %v7611_v30 }
 0x22b   : > { %v2122_v32 = vpop.permute.xlu1 %2121 }
 0x22c   : > { %v2143_v37 = vadd.f32 %v2122_v32, %v7577_v10  ;;  %v2241_v38 = vshrl.u32 %v2240_v33, 23  ;;  %v7617_v40 = vmul.f32 2.0, %v2142_v35  ;;  %v2244_v19 = vand.u32 8388607, %v9986_v6 }
 0x22e   : > { %10076 = vst [vmem:[#allocation13_spill] sm:$0xff] %v7617_v40  ;;  %v7622_v44 = vmul.f32 2.0, %v2143_v37  ;;  %v6739_v45 = vadd.s32 4294967169, %v2241_v38  ;;  %v2343_v47 = vand.u32 2139095040, %v7617_v40  ;;  %v9985_v28 = vand.u32 2147483647, %v7617_v40 }
 0x22f   : > { %v2124_v34 = vpop.permute.xlu1 %2123  ;;  %v2245_v35 = vor.u32 8388608, %v2244_v19 }
 0x230   : > { %v2144_v41 = vadd.f32 %v2124_v34, %v7579_v11  ;;  %v2446_v50 = vand.u32 2139095040, %v7622_v44  ;;  %v2247_v54 = vadd.s32 1, %v6739_v45  ;;  %v2344_v57 = vshrl.u32 %v2343_v47, 23 }
 0x231   : > { %v2126_v36 = vpop.permute.xlu0 %2125 }
 0x232   : > { %v2145_v39 = vadd.f32 %v2126_v36, %v7585_v16  ;;  %v7626_v48 = vmul.f32 2.0, %v2144_v41  ;;  %v2447_v2 = vshrl.u32 %v2446_v50, 23  ;;  %vm2248_vm3 = vcmp.gt.s32.totalorder %v2247_v54, 0 }
 0x233   : > { %v2128_v43 = vpop.permute.xlu1 %2127  ;;  %v6743_v7 = vadd.s32 4294967169, %v2344_v57  ;;  %v2249_v12 = vsel %vm2248_vm3, %v2247_v54, 0 }
 0x234   : > { %v7620_v42 = vmul.f32 2.0, %v2145_v39  ;;  %10078 = vst [vmem:[#allocation15_spill] sm:$0xff] %v7626_v48  ;;  %v2146_v49 = vadd.f32 %v2128_v43, %v7587_v17  ;;  %v2549_v58 = vand.u32 2139095040, %v7626_v48  ;;  %v6747_v13 = vadd.s32 4294967169, %v2447_v2 }
 0x235   : > { %v2350_v20 = vadd.s32 1, %v6743_v7  ;;  %v7639_v26 = vand.u32 31, %v2249_v12  ;;  %v9989_v39 = vmov 920167782   ;;  %v7314_v43 = vmov 1326507024  }
 0x236   : > { %10077 = vst [vmem:[#allocation14_spill] sm:$0xff] %v7620_v42  ;;  %v2652_v46 = vand.u32 2139095040, %v7620_v42  ;;  %v7631_v61 = vmul.f32 2.0, %v2146_v49  ;;  %v2550_v8 = vshrl.u32 %v2549_v58, 23  ;;  %v2453_v29 = vadd.s32 1, %v6747_v13 }
 0x237   : > { %v2130_v15 = vpop.permute.xlu0 %2129  ;;  %v2132_v18 = vpop.permute.xlu1 %2131  ;;  %vm2351_vm5 = vcmp.gt.s32.totalorder %v2350_v20, 0  ;;  %v7653_v38 = vsub.s32 32, %v7639_v26  ;;  %v7676_v2 = vshll.u32 %v2245_v35, 8  ;;  %v9987_v35 = vmov 2102212464  }
 0x238   : > { %v2653_v53 = vshrl.u32 %v2652_v46, 23  ;;  %10079 = vst [vmem:[#allocation16_spill] sm:$0xff] %v7631_v61  ;;  %v2755_v9 = vand.u32 2139095040, %v7631_v61  ;;  %v6751_v21 = vadd.s32 4294967169, %v2550_v8  ;;  %v2147_v32 = vadd.f32 %v2130_v15, %v7594_v22 }
 0x239   : > { %v2148_v33 = vadd.f32 %v2132_v18, %v7596_v23  ;;  %v2347_v46 = vand.u32 8388607, %v9985_v28  ;;  %vm2454_vm7 = vcmp.gt.s32.totalorder %v2453_v29, 0  ;;  %v2264_v13 = vshrl.u32 %v9989_v39, %v7653_v38 }
 0x23a   : > { %v6755_v62 = vadd.s32 4294967169, %v2653_v53  ;;  %v2756_v14 = vshrl.u32 %v2755_v9, 23  ;;  %v2556_v36 = vadd.s32 1, %v6751_v21  ;;  %v7650_v37 = vmul.f32 2.0, %v2147_v32 }
 0x23b   : > { %v7668_v50 = vmul.f32 2.0, %v2148_v33  ;;  %v2352_v53 = vsel %vm2351_vm5, %v2350_v20, 0  ;;  %v2348_v8 = vor.u32 8388608, %v2347_v46  ;;  %v2267_v19 = vshrl.u32 %v7314_v43, %v7653_v38  ;;  %v2086_v9 = vpop.permute.xlu0 %2085 }
 0x23c   : > { %v2659_v3 = vadd.s32 1, %v6755_v62  ;;  %v6759_v25 = vadd.s32 4294967169, %v2756_v14  ;;  %10081 = vst [vmem:[#allocation18_spill] sm:$0xff] %v7650_v37  ;;  %v2858_v49 = vand.u32 2139095040, %v7650_v37  ;;  %vm2557_vm8 = vcmp.gt.s32.totalorder %v2556_v36, 0 }
 0x23d   : > { %10082 = vst [vmem:[#allocation19_spill] sm:$0xff] %v7668_v50  ;;  %v2961_v62 = vand.u32 2139095040, %v7668_v50  ;;  %v7684_v14 = vand.u32 31, %v2352_v53  ;;  %v2558_v20 = vsel %vm2557_vm8, %v2556_v36, 0  ;;  %v2263_v46 = vshll.u32 %v9987_v35, %v7639_v26 }
 0x23e   : > { %vm2660_vm4 = vcmp.gt.s32.totalorder %v2659_v3, 0  ;;  %v2762_v31 = vadd.s32 1, %v6759_v25  ;;  %v2859_v58 = vshrl.u32 %v2858_v49, 23  ;;  %v2266_v36 = vshll.u32 %v9989_v39, %v7639_v26 }
 0x23f   : > { %v7637_v24 = vsel %vm2660_vm4, %v2659_v3, 0  ;;  %v2455_v3 = vsel %vm2454_vm7, %v2453_v29, 0  ;;  %v2962_v18 = vshrl.u32 %v2961_v62, 23  ;;  %v7696_v29 = vshrl.u32 %v2249_v12, 5 }
 0x240   : > { %v7642_v27 = vand.u32 31, %v7637_v24  ;;  %vm2763_vm6 = vcmp.gt.s32.totalorder %v2762_v31, 0  ;;  %v6763_v15 = vadd.s32 4294967169, %v2859_v58  ;;  %v7706_v58 = vshll.u32 %v2348_v8, 8 }
 0x241   : > { %v7665_v47 = vsel %vm2763_vm6, %v2762_v31, 0  ;;  %v7698_v31 = vand.u32 31, %v2455_v3  ;;  %v6767_v33 = vadd.s32 4294967169, %v2962_v18  ;;  %v7709_v62 = vsub.s32 32, %v7684_v14 }
 0x242   : > { %v7648_v34 = vsub.s32 32, %v7642_v27  ;;  %v7657_v41 = vshll.u32 %v9989_v39, %v7642_v27  ;;  %v7673_v57 = vand.u32 31, %v7665_v47  ;;  %v2865_v32 = vadd.s32 1, %v6763_v15 }
 0x243   : > { %v7711_v12 = vand.u32 31, %v2558_v20  ;;  %v2968_v15 = vadd.s32 1, %v6767_v33  ;;  %v7713_v18 = vor.u32 %v2264_v13, %v2263_v46  ;;  %v2268_v0 = vor.u32 %v2267_v19, %v2266_v36 }
 0x244   : > { %10080 = vst [vmem:[#allocation17_spill] sm:$0xff] %v7648_v34  ;;  %v7661_v45 = vshrl.u32 %v7314_v43, %v7648_v34  ;;  %10083 = vst [vmem:[#allocation20_spill] sm:$0xff] %v7673_v57  ;;  %v7679_v7 = vsub.s32 32, %v7673_v57  ;;  %v7690_v21 = vshll.u32 %v9989_v39, %v7673_v57  ;;  %vm2866_vm9 = vcmp.gt.s32.totalorder %v2865_v32, 0 }
 0x245   : > { %v7715_v28 = vshrl.u32 %v2352_v53, 5  ;;  %v7717_v6 = vsel %vm2866_vm9, %v2865_v32, 0  ;;  %vm2272_vm10 = vcmp.lt.s32.totalorder %v7696_v29, 4  ;;  %v7721_v8 = vsub.s32 32, %v7698_v31 }
 0x246   : > { %10084 = vst [vmem:[#allocation21_spill] sm:$0xff] %v7679_v7  ;;  %v7694_v25 = vshrl.u32 %v7314_v43, %v7679_v7  ;;  %v7724_v49 = vand.u32 31, %v7717_v6  ;;  %vm2969_vm11 = vcmp.gt.s32.totalorder %v2968_v15, 0  ;;  %v2366_v33 = vshll.u32 %v9987_v35, %v7684_v14 }
 0x247   : > { %v2369_v13 = vshll.u32 %v9989_v39, %v7684_v14  ;;  %v7730_v53 = vshrl.u32 %v2455_v3, 5  ;;  %v7732_v19 = vsel %vm2969_vm11, %v2968_v15, 0  ;;  %v2367_v32 = vshrl.u32 %v9989_v39, %v7709_v62 }
 0x248   : > { %10085 = vst [vmem:[#allocation22_spill] sm:$0xff] %v7724_v49  ;;  %v7737_v46 = vsub.s32 32, %v7711_v12  ;;  %v7740_v36 = vsub.s32 32, %v7724_v49  ;;  %v2109_v54 = vsub.f32 %v7570_v4, %v2086_v9  ;;  %v7746_v35 = vsel %vm2272_vm10, %v7713_v18, 920167782 }
 0x249   : > { %v7750_v3 = vsel %vm2272_vm10, %v2268_v0, 1326507024  ;;  %v2370_v15 = vshrl.u32 %v7314_v43, %v7709_v62  ;;  %vm2375_vm12 = vcmp.lt.s32.totalorder %v7715_v28, 4  ;;  %v7756_v39 = vand.u32 31, %v7732_v19 }
 0x24a   : > { %10086 = vst [vmem:[#allocation23_spill] sm:$0xff] %v7737_v46  ;;  %v2469_v4 = vshll.u32 %v10088_v1, %v7698_v31  ;;  %v10089_v9 = vmov 920167782   ;;  %v7768_v0 = vshrl.u32 %v7314_v43, %v7740_v36  ;;  %v2473_v52 = vshrl.u32 %v7314_v43, %v7721_v8 }
 0x24b   : > { %10087 = vst [vmem:[#allocation24_spill] sm:$0xff] %v7756_v39  ;;  %v2470_v63 = vshrl.u32 %v10089_v9, %v7721_v8  ;;  %v7764_v60 = vshll.u32 %v10089_v9, %v7724_v49  ;;  %v2472_v56 = vshll.u32 %v10089_v9, %v7698_v31  ;;  %vm2478_vm13 = vcmp.lt.s32.totalorder %v7730_v53, 4 }
 0x24c   : > { %v7776_v59 = vsub.s32 32, %v7756_v39  ;;  %v7778_v55 = vor.u32 %v2367_v32, %v2366_v33  ;;  %v2573_v51 = vshrl.u32 %v10089_v9, %v7737_v46  ;;  %v2149_v23 = vmul.f32 2.0, %v2109_v54  ;;  %v2088_v33 = vpop.permute.xlu1 %2087 }
 0x24d   : > { %v2371_v37 = vor.u32 %v2370_v15, %v2369_v13  ;;  %v2576_v61 = vshrl.u32 %v7314_v43, %v7737_v46  ;;  %v7788_v42 = vshll.u32 %v10089_v9, %v7756_v39  ;;  %v7794_v32 = vor.u32 %v2470_v63, %v2469_v4  ;;  %v2090_v15 = vpop.permute.xlu0 %2089 }
 0x24e   : > { %10090 = vst [vmem:[#allocation25_spill] sm:$0xff] %v7776_v59  ;;  %v7792_v40 = vshrl.u32 %v7314_v43, %v7776_v59  ;;  %v7796_v48 = vshrl.u32 %v2558_v20, 5  ;;  %v2572_v54 = vshll.u32 %v10088_v1, %v7711_v12  ;;  %v2676_v13 = vshrl.u32 %v10089_v9, %v7648_v34 }
 0x24f   : > { %v2474_v50 = vor.u32 %v2473_v52, %v2472_v56  ;;  %v2575_v46 = vshll.u32 %v10089_v9, %v7711_v12  ;;  %v2779_v43 = vshrl.u32 %v10089_v9, %v7679_v7  ;;  %v7811_v20 = vshrl.u32 %v7637_v24, 5 }
 0x250   : > { %v7808_v4 = vor.u32 %v2573_v51, %v2572_v54  ;;  %v2675_v22 = vshll.u32 %v10088_v1, %v7642_v27  ;;  %v6731_v34 = vclamps-f32 %v2149_v23, 20.0  ;;  %v2778_v52 = vshll.u32 %v10088_v1, %v7673_v57 }
 0x251   : > { %v2577_v17 = vor.u32 %v2576_v61, %v2575_v46  ;;  %v2110_v56 = vsub.f32 %v7572_v5, %v2088_v33  ;;  %v2111_v7 = vsub.f32 %v7577_v10, %v2090_v15  ;;  %v7822_v51 = vsel %vm2375_vm12, %v7778_v55, 920167782 }
 0x252   : > { %v7826_v24 = vsel %vm2375_vm12, %v2371_v37, 1326507024  ;;  %v7828_v54 = vor.u32 %v2676_v13, %v2675_v22  ;;  %v7831_v23 = vshrl.u32 %v7665_v47, 5  ;;  %v7836_v5 = vsel %vm2478_vm13, %v7794_v32, 920167782  ;;  %v2092_v37 = vpop.permute.xlu1 %2091 }
 0x253   : > { %v7840_v10 = vsel %vm2478_vm13, %v2474_v50, 1326507024  ;;  %vm2581_vm14 = vcmp.lt.s32.totalorder %v7796_v48, 4  ;;  %v7843_v61 = vor.u32 %v2779_v43, %v2778_v52  ;;  %vm2684_vm15 = vcmp.lt.s32.totalorder %v7811_v20, 4 }
 0x254   : > { %10091 = vst [vmem:[#allocation26_spill] sm:$0xff] %v7828_v54  ;;  %v7848_v22 = vsel %vm2581_vm14, %v7808_v4, 920167782  ;;  %v2197_v47 = vsub.f32 0.0, %v6731_v34  ;;  %v10032_v46 = vmov 2475754826   ;;  %v2112_v63 = vsub.f32 %v7579_v11, %v2092_v37 }
 0x255   : > { %10092 = vst [vmem:[#allocation27_spill] sm:$0xff] %v7843_v61  ;;  %v2255_v33 = vshrl.u32 %v10032_v46, %v7653_v38  ;;  %v7855_v50 = vsel %vm2581_vm14, %v2577_v17, 1326507024  ;;  %v2181_v13 = vmul.f32 1.442695, %v6731_v34  ;;  %v2150_v15 = vmul.f32 2.0, %v2110_v56 }
 0x256   : > { %v7857_v43 = vmul.f32 2.0, %v2111_v7  ;;  %v7862_v52 = vsel %vm2684_vm15, %v7828_v54, 920167782  ;;  %vm2787_vm1 = vcmp.lt.s32.totalorder %v7831_v23, 4  ;;  %v10034_v57 = vmov 683565275  }
 0x257   : > { %10093 = vst [vmem:[#allocation28_spill] sm:$0xff] %v7862_v52  ;;  %v2254_v46 = vshll.u32 %v10034_v57, %v7639_v26  ;;  %v10094_v17 = vor.u32 %v7661_v45, %v7657_v41  ;;  %v7878_v7 = vsel %vm2787_vm1, %v7843_v61, 920167782  ;;  %v10096_v56 = vor.u32 %v7694_v25, %v7690_v21 }
 0x258   : > { %10095 = vst [vmem:[#allocation29_spill] sm:$0xff] %v7878_v7  ;;  %v2205_v37 = vmul.f32 1.442695, %v2197_v47  ;;  %v10097_v41 = vmov 2475754826   ;;  %v7892_v54 = vshrl.u32 %v7717_v6, 5  ;;  %7219 = vpow2.f32 %v2181_v13 }
 0x259   : > { %v7873_v34 = vsel %vm2684_vm15, %v10094_v17, 1326507024  ;;  %v7885_v11 = vsel %vm2787_vm1, %v10096_v56, 1326507024  ;;  %v2256_v57 = vor.u32 %v2255_v33, %v2254_v46  ;;  %v2257_v45 = vshll.u32 %v10097_v41, %v7639_v26 }
 0x25a   : > { %v10038_v52 = vmov 2131351028   ;;  %v6732_v7 = vclamps-f32 %v2150_v15, 20.0  ;;  %v7895_v25 = vmul.f32 2.0, %v2112_v63  ;;  %v2261_v46 = vshrl.u32 %v10088_v1, %v7653_v38 }
 0x25b   : > { %v2258_v17 = vshrl.u32 %v10038_v52, %v7653_v38  ;;  %v2260_v47 = vshll.u32 %v10038_v52, %v7639_v26  ;;  %v2881_v33 = vshll.u32 %v10088_v1, %v7724_v49  ;;  %v7904_v61 = vshrl.u32 %v7732_v19, 5 }
 0x25c   : > { %v10099_v6 = vmov 683565275   ;;  %vm2269_vm3 = vcmp.lt.s32.totalorder %v7696_v29, 1  ;;  %7221 = vpow2.f32 %v2205_v37  ;;  %vm2271_vm4 = vcmp.lt.s32.totalorder %v7696_v29, 3 }
 0x25d   : > { %v2259_v56 = vor.u32 %v2258_v17, %v2257_v45  ;;  %10098 = vst [vmem:[#allocation30_spill] sm:$0xff] %v7904_v61  ;;  %v2253_v13 = vshrl.u32 %v10099_v6, %v7653_v38  ;;  %v2262_v63 = vor.u32 %v2261_v46, %v2260_v47  ;;  %v7910_v26 = vmul.f32 1.442695, %v6732_v7 }
 0x25e   : > { %vm2270_vm5 = vcmp.lt.s32.totalorder %v7696_v29, 2  ;;  %v2283_v17 = vsel %vm2271_vm4, %v7713_v18, %v7750_v3  ;;  %v2357_v37 = vshll.u32 %v10099_v6, %v7684_v14  ;;  %v2358_v49 = vshrl.u32 %v10097_v41, %v7709_v62 }
 0x25f   : > { %v2277_v15 = vsel %vm2269_vm3, %v2256_v57, %v2259_v56  ;;  %v2273_v45 = vsel %vm2269_vm3, %v2253_v13, %v2256_v57  ;;  %v2274_v19 = vsel %vm2272_vm10, %v2262_v63, 2102212464  ;;  %v2279_v38 = vsel %vm2271_vm4, %v2262_v63, %v7746_v35 }
 0x260   : > { %v2281_v21 = vsel %vm2269_vm3, %v2259_v56, %v2262_v63  ;;  %v2275_v47 = vsel %vm2271_vm4, %v2259_v56, %v2274_v19  ;;  %v2280_v46 = vsel %vm2270_vm5, %v2277_v15, %v2279_v38  ;;  %v2882_v57 = vshrl.u32 %v10089_v9, %v7740_v36 }
 0x261   : > { %v2284_v52 = vsel %vm2270_vm5, %v2281_v21, %v2283_v17  ;;  %v2276_v13 = vsel %vm2270_vm5, %v2273_v45, %v2275_v47  ;;  %v2198_v3 = vsub.f32 0.0, %v6732_v7  ;;  %v2359_v56 = vor.u32 %v2358_v49, %v2357_v37 }
 0x262   : > { %v7925_v18 = vmul.u32.u64.low %v7676_v2, %v2284_v52  ;;  %v7926_v29 = vmul.u32.u64.high %v7676_v2, %v2284_v52, %v7925_v18  ;;  %v7929_v35 = vmul.u32.u64.low %v7676_v2, %v2280_v46  ;;  %v7930_v63 = vmul.u32.u64.high %v7676_v2, %v2280_v46, %v7929_v35 }
 0x263   : > { %v2360_v21 = vshll.u32 %v10097_v41, %v7684_v14  ;;  %v10100_v15 = vmov 2131351028   ;;  %v2364_v52 = vshrl.u32 %v10088_v1, %v7709_v62  ;;  %v10101_v7 = vclamps-f32 %v7857_v43, 20.0 }
 0x264   : > { %v2361_v17 = vshrl.u32 %v10100_v15, %v7709_v62  ;;  %v2363_v45 = vshll.u32 %v10100_v15, %v7684_v14  ;;  %v2292_v38 = vmul.u32 %v7676_v2, %v2276_v13  ;;  %v2356_v49 = vshrl.u32 %v10099_v6, %v7709_v62 }
 0x265   : > { %v2185_v19 = vmul.f32 1.442695, %v10101_v7  ;;  %vm2372_vm6 = vcmp.lt.s32.totalorder %v7715_v28, 1  ;;  %vm2294_vm7 = vc.u32 %v7926_v29, %v7929_v35  ;;  %vm2374_vm8 = vcmp.lt.s32.totalorder %v7715_v28, 3  ;;  %v7954_v13 = vpop.eup %7219 }
 0x266   : > { %v2362_v37 = vor.u32 %v2361_v17, %v2360_v21  ;;  %v2365_v47 = vor.u32 %v2364_v52, %v2363_v45  ;;  %v2295_v14 = vadd.s32 1, %v7930_v63  ;;  %vm2373_vm9 = vcmp.lt.s32.totalorder %v7715_v28, 2  ;;  %10102 = vst [vmem:[#allocation31_spill] sm:$0xff] %v7954_v13 }
 0x267   : > { %v2376_v46 = vsel %vm2372_vm6, %v2356_v49, %v2359_v56  ;;  %v2386_v2 = vsel %vm2374_vm8, %v7778_v55, %v7826_v24  ;;  %vm2890_vm10 = vcmp.lt.s32.totalorder %v7892_v54, 4  ;;  %v2984_v55 = vshll.u32 %v10088_v1, %v7756_v39 }
 0x268   : > { %v2377_v62 = vsel %vm2375_vm12, %v2365_v47, 2102212464  ;;  %v2380_v18 = vsel %vm2372_vm6, %v2359_v56, %v2362_v37  ;;  %v2382_v7 = vsel %vm2374_vm8, %v2365_v47, %v7822_v51  ;;  %v2384_v21 = vsel %vm2372_vm6, %v2362_v37, %v2365_v47 }
 0x269   : > { %v2296_v17 = vsel %vm2294_vm7, %v2295_v14, %v7930_v63  ;;  %v2378_v45 = vsel %vm2374_vm8, %v2362_v37, %v2377_v62  ;;  %v2383_v52 = vsel %vm2373_vm9, %v2380_v18, %v2382_v7  ;;  %v2387_v49 = vsel %vm2373_vm9, %v2384_v21, %v2386_v2  ;;  %v7971_v51 = vpop.eup %7221 }
 0x26a   : > { %v2297_v24 = vadd.s32 %v2296_v17, %v2292_v38  ;;  %v7968_v56 = vmul.u32.u64.low %v7706_v58, %v2387_v49  ;;  %v7969_v13 = vmul.u32.u64.high %v7706_v58, %v2387_v49, %v7968_v56  ;;  %10103 = vst [vmem:[#allocation32_spill] sm:$0xff] %v7971_v51  ;;  %v7973_v63 = vor.u32 %v2882_v57, %v2881_v33 }
 0x26b   : > { %v7976_v37 = vmul.u32.u64.low %v7706_v58, %v2383_v52  ;;  %v7977_v47 = vmul.u32.u64.high %v7706_v58, %v2383_v52, %v7976_v37  ;;  %v10104_v14 = vand.u32 2147483647, %v7622_v44  ;;  %v2379_v38 = vsel %vm2373_vm9, %v2376_v46, %v2378_v45 }
 0x26c   : > { %v2298_v62 = vadd.s32 536870912, %v2297_v24  ;;  %v2460_v18 = vshll.u32 %v10099_v6, %v7698_v31  ;;  %v2461_v7 = vshrl.u32 %v10097_v41, %v7721_v8  ;;  %v2463_v33 = vshll.u32 %v10097_v41, %v7698_v31 }
 0x26d   : > { %v2450_v2 = vand.u32 8388607, %v10104_v14  ;;  %v2464_v57 = vshrl.u32 %v10100_v15, %v7721_v8  ;;  %v2466_v21 = vshll.u32 %v10100_v15, %v7698_v31  ;;  %v2467_v17 = vshrl.u32 %v10088_v1, %v7721_v8 }
 0x26e   : > { %7223 = vpow2.f32 %v7910_v26  ;;  %v7997_v28 = vshrl.u32 %v2298_v62, 30  ;;  %vm2397_vm11 = vc.u32 %v7969_v13, %v7976_v37  ;;  %v2462_v46 = vor.u32 %v2461_v7, %v2460_v18 }
 0x26f   : > { %v2207_v45 = vmul.f32 1.442695, %v2198_v3  ;;  %v2398_v52 = vadd.s32 1, %v7977_v47  ;;  %v2465_v49 = vor.u32 %v2464_v57, %v2463_v33  ;;  %v2468_v56 = vor.u32 %v2467_v17, %v2466_v21 }
 0x270   : > { %v2985_v14 = vshrl.u32 %v10089_v9, %v7776_v59  ;;  %7225 = vpow2.f32 %v2185_v19  ;;  %v2300_v31 = vshll.u32 %v7997_v28, 30  ;;  %v2395_v51 = vmul.u32 %v7706_v58, %v2379_v38 }
 0x271   : > { %v2399_v26 = vsel %vm2397_vm11, %v2398_v52, %v7977_v47  ;;  %v2451_v62 = vor.u32 8388608, %v2450_v2  ;;  %vm2475_vm12 = vcmp.lt.s32.totalorder %v7730_v53, 1  ;;  %vm2477_vm3 = vcmp.lt.s32.totalorder %v7730_v53, 3 }
 0x272   : > { %v8009_v3 = vsub.s32 %v2297_v24, %v2300_v31  ;;  %v2400_v18 = vadd.s32 %v2399_v26, %v2395_v51  ;;  %v2483_v7 = vsel %vm2475_vm12, %v2462_v46, %v2465_v49  ;;  %v2485_v9 = vsel %vm2477_vm3, %v2468_v56, %v7836_v5  ;;  %v8024_v24 = vpop.permute.xlu0 %2093 }
 0x273   : > { %v8019_v58 = vsel %vm2890_vm10, %v7973_v63, 920167782  ;;  %vm2993_vm4 = vcmp.lt.s32.totalorder %v7904_v61, 4  ;;  %v10105_v19 = vclamps-f32 %v7857_v43, 20.0  ;;  %v2459_v51 = vshrl.u32 %v10099_v6, %v7721_v8 }
 0x274   : > { %v2487_v2 = vsel %vm2475_vm12, %v2465_v49, %v2468_v56  ;;  %v2303_v5 = vsub.s32 0, %v8009_v3  ;;  %v2401_v38 = vadd.s32 536870912, %v2400_v18  ;;  %vm2476_vm5 = vcmp.lt.s32.totalorder %v7730_v53, 2 }
 0x275   : > { %v2199_v47 = vsub.f32 0.0, %v10105_v19  ;;  %v2489_v33 = vsel %vm2477_vm3, %v7794_v32, %v7840_v10  ;;  %v2480_v43 = vsel %vm2478_vm13, %v2468_v56, 2102212464  ;;  %v2486_v57 = vsel %vm2476_vm5, %v2483_v7, %v2485_v9  ;;  %v8054_v56 = vpop.permute.xlu1 %2095 }
 0x276   : > { %v2490_v8 = vsel %vm2476_vm5, %v2487_v2, %v2489_v33  ;;  %v2491_v21 = vshll.u32 %v2451_v62, 8  ;;  %v10106_v17 = vor.u32 %v7768_v0, %v7764_v60  ;;  %v8049_v31 = vor.u32 %v2985_v14, %v2984_v55  ;;  %v8073_v2 = vpop.permute.xlu0 %2097 }
 0x277   : > { %v6734_v32 = vclamps-f32 %v7895_v25, 20.0  ;;  %vm2239_vm13 = vcmp.lt.s32.totalorder %v7611_v30, 0  ;;  %v6740_v10 = vmin.u32 %v2303_v5, %v8009_v3  ;;  %v8056_v26 = vshrl.u32 %v2401_v38, 30  ;;  %10108 = vst [vmem:[#allocation34_spill] sm:$0xff] %v8073_v2 }
 0x278   : > { %v8047_v52 = vsel %vm2890_vm10, %v10106_v17, 1326507024  ;;  %10107 = vst [vmem:[#allocation33_spill] sm:$0xff] %v8049_v31  ;;  %v2479_v62 = vsel %vm2475_vm12, %v2459_v51, %v2462_v46  ;;  %v8060_v60 = vmul.u32.u64.low %v2491_v21, %v2490_v8  ;;  %v8061_v0 = vmul.u32.u64.high %v2491_v21, %v2490_v8, %v8060_v60 }
 0x279   : > { %v2305_v7 = vclz %v6740_v10  ;;  %v2481_v55 = vsel %vm2477_vm3, %v2465_v49, %v2480_v43  ;;  %v8065_v14 = vmul.u32.u64.low %v2491_v21, %v2486_v57  ;;  %v8066_v25 = vmul.u32.u64.high %v2491_v21, %v2486_v57, %v8065_v14  ;;  %v10109_v49 = vld [vmem:[#allocation10_spill] sm:$0xff] }
 0x27a   : > { %7227 = vpow2.f32 %v2207_v45  ;;  %v8069_v9 = vmul.f32 1.442695, %v2199_v47  ;;  %v2403_v46 = vshll.u32 %v8056_v26, 30  ;;  %v8076_v51 = vmul.f32 1.442695, %v6734_v32 }
 0x27b   : > { %v8078_v5 = vsub.f32 0.0, %v6734_v32  ;;  %v6741_v33 = vadd.s32 4294967294, %v2305_v7  ;;  %v8082_v43 = vpop.eup %7223  ;;  %v10111_v45 = vand.u32 2147483647, %v7611_v30  ;;  %v2323_v57 = vsub.s32 4, %v7997_v28 }
 0x27c   : > { %10110 = vst [vmem:[#allocation10_spill] sm:$0xff] %v8082_v43  ;;  %v8091_v8 = vsub.s32 %v2400_v18, %v2403_v46  ;;  %v2482_v17 = vsel %vm2476_vm5, %v2479_v62, %v2481_v55  ;;  %vm2500_vm7 = vc.u32 %v8061_v0, %v8065_v14  ;;  %v8100_v32 = vsel %vm2993_vm4, %v8049_v31, 920167782  ;;  %v10117_v55 = vld [vmem:[#allocation15_spill] sm:$0xff] }
 0x27d   : > { %vm8086_vm6 = vcmp.le.f32.partialorder %v10111_v45, 0.7853982  ;;  %10114 = vst [vmem:[#allocation35_spill] sm:$0xff] %v8100_v32  ;;  %vm6742_vm8 = vcmp.lt.s32.totalorder %v6741_v33, 0  ;;  %v2501_v7 = vadd.s32 1, %v8066_v25  ;;  %v8105_v45 = vpop.eup %7225  ;;  %v2293_v53 = vadd.s32 %v7929_v35, %v7926_v29 }
 0x27e   : > { %10116 = vst [vmem:[#allocation36_spill] sm:$0xff] %v8105_v45  ;;  %v2308_v18 = vsel %vm6742_vm8, 0, %v6741_v33  ;;  %v2406_v62 = vsub.s32 0, %v8091_v8  ;;  %v2498_v43 = vmul.u32 %v2491_v21, %v2482_v17  ;;  %v10118_v60 = vor.u32 %v7792_v40, %v7788_v42  ;;  %v10120_v40 = vld [vmem:[#allocation23_spill] sm:$0xff] }
 0x27f   : > { %v2309_v38 = vsub.s32 32, %v2308_v18  ;;  %v2313_v19 = vsub.s32 4294967266, %v2308_v18  ;;  %v2502_v31 = vsel %vm2500_vm7, %v2501_v7, %v8066_v25  ;;  %v2324_v29 = vsel %vm2239_vm13, %v2323_v57, %v7997_v28 }
 0x280   : > { %v8117_v32 = vsel %vm2993_vm4, %v10118_v60, 1326507024  ;;  %v2396_v35 = vadd.s32 %v7976_v37, %v7969_v13  ;;  %v6744_v33 = vmin.u32 %v2406_v62, %v8091_v8  ;;  %v2310_v21 = vshll.u32 %v8009_v3, %v2308_v18 }
 0x281   : > { %10119 = vst [vmem:[#allocation15_spill] sm:$0xff] %v8117_v32  ;;  %v2311_v17 = vshrl.u32 %v2293_v53, %v2309_v38  ;;  %v2314_v25 = vadd.s32 127, %v2313_v19  ;;  %v2503_v7 = vadd.s32 %v2502_v31, %v2498_v43  ;;  %v2564_v42 = vshrl.u32 %v10097_v41, %v10120_v40 }
 0x282   : > { %v2408_v46 = vclz %v6744_v33  ;;  %v2567_v60 = vshrl.u32 %v10100_v15, %v10120_v40  ;;  %v2570_v28 = vshrl.u32 %v10088_v1, %v10120_v40  ;;  %v10121_v37 = vand.u32 2147483647, %v10117_v55 }
 0x283   : > { %v2312_v57 = vor.u32 %v2311_v17, %v2310_v21  ;;  %v2315_v45 = vshll.u32 %v2314_v25, 23  ;;  %v2504_v13 = vadd.s32 536870912, %v2503_v7  ;;  %v2563_v31 = vshll.u32 %v10099_v6, %v7711_v12 }
 0x284   : > { %v2553_v62 = vand.u32 8388607, %v10121_v37  ;;  %v6745_v3 = vadd.s32 4294967294, %v2408_v46  ;;  %v2566_v19 = vshll.u32 %v10097_v41, %v7711_v12  ;;  %v2569_v38 = vshll.u32 %v10100_v15, %v7711_v12 }
 0x285   : > { %v2316_v43 = vor.u32 4788187, %v2315_v45  ;;  %v8142_v53 = vsel %vm8086_vm6, 0, %v2324_v29  ;;  %v2426_v18 = vsub.s32 4, %v8056_v26  ;;  %v8145_v33 = vshrl.u32 %v2504_v13, 30  ;;  %v10122_v45 = vld [vmem:[#allocation13_spill] sm:$0xff] }
 0x286   : > { %vm6746_vm9 = vcmp.lt.s32.totalorder %v6745_v3, 0  ;;  %v2565_v46 = vor.u32 %v2564_v42, %v2563_v31  ;;  %v2568_v21 = vor.u32 %v2567_v60, %v2566_v19  ;;  %v2571_v17 = vor.u32 %v2570_v28, %v2569_v38 }
 0x287   : > { %v8147_v25 = vpop.eup %7227  ;;  %v2317_v37 = vand.u32 2147483647, %v2316_v43  ;;  %v2319_v32 = vcvt.s32.f32 %v2312_v57  ;;  %v2411_v61 = vsel %vm6746_vm9, 0, %v6745_v3  ;;  %v2506_v12 = vshll.u32 %v8145_v33, 30 }
 0x288   : > { %vm2342_vm11 = vcmp.lt.s32.totalorder %v10122_v45, 0  ;;  %v2412_v39 = vsub.s32 32, %v2411_v61  ;;  %v2416_v29 = vsub.s32 4294967266, %v2411_v61  ;;  %v2554_v59 = vor.u32 8388608, %v2553_v62 }
 0x289   : > { %v2562_v13 = vshrl.u32 %v10099_v6, %v10120_v40  ;;  %v2320_v2 = vmul.f32 %v2319_v32, %v2317_v37  ;;  %v8153_v10 = vsub.s32 %v2503_v7, %v2506_v12  ;;  %vm2578_vm12 = vcmp.lt.s32.totalorder %v7796_v48, 1 }
 0x28a   : > { %vm2580_vm3 = vcmp.lt.s32.totalorder %v7796_v48, 3  ;;  %v2413_v42 = vshll.u32 %v8091_v8, %v2411_v61  ;;  %v2414_v60 = vshrl.u32 %v2396_v35, %v2412_v39  ;;  %v2417_v28 = vadd.s32 127, %v2416_v29 }
 0x28b   : > { %v2583_v57 = vsel %vm2581_vm14, %v2571_v17, 2102212464  ;;  %v2321_v3 = vxor.u32 2147483648, %v2320_v2  ;;  %v10123_v62 = vand.u32 2147483647, %v10122_v45  ;;  %v2509_v32 = vsub.s32 0, %v8153_v10 }
 0x28c   : > { %v2586_v7 = vsel %vm2578_vm12, %v2565_v46, %v2568_v21  ;;  %v2588_v39 = vsel %vm2580_vm3, %v2571_v17, %v7848_v22  ;;  %v2415_v61 = vor.u32 %v2414_v60, %v2413_v42  ;;  %v2418_v8 = vshll.u32 %v2417_v28, 23 }
 0x28d   : > { %vm8162_vm5 = vcmp.le.f32.partialorder %v10123_v62, 0.7853982  ;;  %v2590_v35 = vsel %vm2578_vm12, %v2568_v21, %v2571_v17  ;;  %v2592_v40 = vsel %vm2580_vm3, %v7808_v4, %v7855_v50  ;;  %v2322_v19 = vsel %vm2239_vm13, %v2321_v3, %v2320_v2 }
 0x28e   : > { %v6748_v38 = vmin.u32 %v2509_v32, %v8153_v10  ;;  %vm2579_vm14 = vcmp.lt.s32.totalorder %v7796_v48, 2  ;;  %v2582_v22 = vsel %vm2578_vm12, %v2562_v13, %v2565_v46  ;;  %v2325_v43 = vsel %vm8086_vm6, %v7611_v30, %v2322_v19 }
 0x28f   : > { %v2419_v17 = vor.u32 4788187, %v2418_v8  ;;  %v2584_v37 = vsel %vm2580_vm3, %v2568_v21, %v2583_v57  ;;  %v2589_v4 = vsel %vm2579_vm14, %v2586_v7, %v2588_v39  ;;  %7229 = vcosq.f32 %v2325_v43  ;;  %v10127_v39 = vld [vmem:[#allocation14_spill] sm:$0xff] }
 0x290   : > { %v2511_v50 = vclz %v6748_v38  ;;  %v2593_v2 = vsel %vm2579_vm14, %v2590_v35, %v2592_v40  ;;  %v2594_v12 = vshll.u32 %v2554_v59, 8  ;;  %7231 = vsinq.f32 %v2325_v43 }
 0x291   : > { %v8194_v46 = vand.u32 3, %v8142_v53  ;;  %v2420_v29 = vand.u32 2147483647, %v2419_v17  ;;  %v2422_v47 = vcvt.s32.f32 %v2415_v61  ;;  %v2427_v13 = vsel %vm2342_vm11, %v2426_v18, %v8056_v26 }
 0x292   : > { %v6749_v21 = vadd.s32 4294967294, %v2511_v50  ;;  %v8199_v42 = vmul.u32.u64.low %v2594_v12, %v2593_v2  ;;  %v8200_v60 = vmul.u32.u64.high %v2594_v12, %v2593_v2, %v8199_v42  ;;  %v2585_v57 = vsel %vm2579_vm14, %v2582_v22, %v2584_v37 }
 0x293   : > { %v2423_v28 = vmul.f32 %v2422_v47, %v2420_v29  ;;  %v8204_v3 = vmul.u32.u64.low %v2594_v12, %v2589_v4  ;;  %v8205_v59 = vmul.u32.u64.high %v2594_v12, %v2589_v4, %v8204_v3  ;;  %7233 = vpow2.f32 %v8069_v9 }
 0x294   : > { %v10126_v62 = vsub.f32 %v7585_v16, %v8024_v24  ;;  %v2499_v26 = vadd.s32 %v8065_v14, %v8061_v0  ;;  %vm6750_vm13 = vcmp.lt.s32.totalorder %v6749_v21, 0  ;;  %v8218_v48 = vsel %vm8162_vm5, 0, %v2427_v13  ;;  %v10128_v14 = vld [vmem:[#allocation17_spill] sm:$0xff] }
 0x295   : > { %v2424_v18 = vxor.u32 2147483648, %v2423_v28  ;;  %v2514_v7 = vsel %vm6750_vm13, 0, %v6749_v21  ;;  %v2649_v61 = vand.u32 2147483647, %v10127_v39  ;;  %v2601_v9 = vmul.u32 %v2594_v12, %v2585_v57 }
 0x296   : > { %v8212_v32 = vmul.f32 2.0, %v10126_v62  ;;  %v2515_v8 = vsub.s32 32, %v2514_v7  ;;  %v2519_v35 = vsub.s32 4294967266, %v2514_v7  ;;  %v2666_v16 = vshll.u32 %v10099_v6, %v7642_v27 }
 0x297   : > { %vm2335_vm6 = vcmp.eq.s32.totalorder %v8194_v46, 2  ;;  %v2425_v24 = vsel %vm2342_vm11, %v2424_v18, %v2423_v28  ;;  %vm2445_vm7 = vcmp.lt.s32.totalorder %v7622_v44, 0  ;;  %vm2603_vm8 = vc.u32 %v8200_v60, %v8204_v3 }
 0x298   : > { %v2604_v0 = vadd.s32 1, %v8205_v59  ;;  %v2667_v40 = vshrl.u32 %v10097_v41, %v10128_v14  ;;  %vm2332_vm9 = vcmp.eq.s32.totalorder %v8194_v46, 0  ;;  %v2428_v19 = vsel %vm8162_vm5, %v10122_v45, %v2425_v24 }
 0x299   : > { %v2516_v38 = vshll.u32 %v8153_v10, %v2514_v7  ;;  %v2517_v22 = vshrl.u32 %v2499_v26, %v2515_v8  ;;  %v2520_v43 = vadd.s32 127, %v2519_v35  ;;  %vm2331_vm11 = vcmp.lt.s32.totalorder %v8194_v46, 2 }
 0x29a   : > { %7235 = vcosq.f32 %v2428_v19  ;;  %v2605_v17 = vsel %vm2603_vm8, %v2604_v0, %v8205_v59  ;;  %v2669_v37 = vshll.u32 %v10097_v41, %v7642_v27  ;;  %v2670_v4 = vshrl.u32 %v10100_v15, %v10128_v14 }
 0x29b   : > { %vm2329_vm12 = vweird.f32 %v7611_v30  ;;  %7237 = vsinq.f32 %v2428_v19  ;;  %v2518_v31 = vor.u32 %v2517_v22, %v2516_v38  ;;  %v2521_v50 = vshll.u32 %v2520_v43, 23 }
 0x29c   : > { %v2606_v2 = vadd.s32 %v2605_v17, %v2601_v9  ;;  %v10129_v10 = vand.u32 2147483647, %v7622_v44  ;;  %v2656_v29 = vand.u32 8388607, %v2649_v61  ;;  %v2671_v47 = vor.u32 %v2670_v4, %v2669_v37  ;;  %v8257_v62 = vpop.eup %7229  ;;  %v10132_v9 = vld [vmem:[#allocation26_spill] sm:$0xff] }
 0x29d   : > { %v2672_v13 = vshll.u32 %v10100_v15, %v7642_v27  ;;  %v2673_v21 = vshrl.u32 %v10088_v1, %v10128_v14  ;;  %v2522_v42 = vor.u32 4788187, %v2521_v50  ;;  %v2529_v28 = vsub.s32 4, %v8145_v33  ;;  %v8261_v7 = vpop.eup %7231 }
 0x29e   : > { %vm8246_vm3 = vcmp.le.f32.partialorder %v10129_v10, 0.7853982  ;;  %v2607_v57 = vadd.s32 536870912, %v2606_v2  ;;  %v2668_v59 = vor.u32 %v2667_v40, %v2666_v16  ;;  %v2525_v26 = vcvt.s32.f32 %v2518_v31  ;;  %v10133_v31 = vld [vmem:[#allocation28_spill] sm:$0xff] }
 0x29f   : > { %v2674_v18 = vor.u32 %v2673_v21, %v2672_v13  ;;  %vm2681_vm5 = vcmp.lt.s32.totalorder %v7811_v20, 1  ;;  %vm2683_vm14 = vcmp.lt.s32.totalorder %v7811_v20, 3  ;;  %v10058_v27 = vxor.u32 2147483648, %v8257_v62 }
 0x2a0   : > { %v2523_v8 = vand.u32 2147483647, %v2522_v42  ;;  %v8264_v35 = vshrl.u32 %v2607_v57, 30  ;;  %v2695_v16 = vsel %vm2683_vm14, %v10132_v9, %v7873_v34  ;;  %v10059_v24 = vxor.u32 2147483648, %v8261_v7  ;;  %v8283_v17 = vpop.eup %7233 }
 0x2a1   : > { %v2433_v0 = vand.u32 3, %v8218_v48  ;;  %v2657_v40 = vor.u32 8388608, %v2656_v29  ;;  %v2693_v19 = vsel %vm2681_vm5, %v2671_v47, %v2674_v18  ;;  %v2337_v38 = vsel %vm2335_vm6, %v10058_v27, %v8261_v7 }
 0x2a2   : > { %v2526_v22 = vmul.f32 %v2525_v26, %v2523_v8  ;;  %v2530_v43 = vsel %vm2445_vm7, %v2529_v28, %v8145_v33  ;;  %v2609_v34 = vshll.u32 %v8264_v35, 30  ;;  %v2334_v37 = vsel %vm2332_vm9, %v8257_v62, %v10059_v24 }
 0x2a3   : > { %vm2682_vm13 = vcmp.lt.s32.totalorder %v7811_v20, 2  ;;  %v2689_v4 = vsel %vm2681_vm5, %v2668_v59, %v2671_v47  ;;  %v2691_v50 = vsel %vm2683_vm14, %v2674_v18, %v10133_v31  ;;  %v2338_v33 = vsel %vm2331_vm11, %v2334_v37, %v2337_v38 }
 0x2a4   : > { %v2527_v10 = vxor.u32 2147483648, %v2526_v22  ;;  %v8298_v29 = vsub.s32 %v2606_v2, %v2609_v34  ;;  %v2696_v13 = vsel %vm2682_vm13, %v2693_v19, %v2695_v16  ;;  %v2339_v21 = vsel %vm2329_vm12, nan, %v2338_v33 }
 0x2a5   : > { %vm10064_vm6 = vweird.f32 %v10122_v45  ;;  %vm2434_vm8 = vcmp.lt.s32.totalorder %v2433_v0, 2  ;;  %v2686_v42 = vsel %vm2684_vm15, %v2674_v18, 2102212464  ;;  %v2697_v28 = vshll.u32 %v2657_v40, 8  ;;  %3069 = vrot.lane.b32.xlu0 %v2339_v21, %s7312_s15 }
 0x2a6   : > { %v2528_v46 = vsel %vm2445_vm7, %v2527_v10, %v2526_v22  ;;  %v8312_v2 = vsel %vm8246_vm3, 0, %v2530_v43  ;;  %v2612_v57 = vsub.s32 0, %v8298_v29  ;;  %v2665_v26 = vshrl.u32 %v10099_v6, %v10128_v14 }
 0x2a7   : > { %v2531_v8 = vsel %vm8246_vm3, %v7622_v44, %v2528_v46  ;;  %v2692_v18 = vsel %vm2682_vm13, %v2689_v4, %v2691_v50  ;;  %v8322_v9 = vmul.u32.u64.low %v2697_v28, %v2696_v13  ;;  %v8323_v16 = vmul.u32.u64.high %v2697_v28, %v2696_v13, %v8322_v9  ;;  %v8325_v40 = vpop.eup %7235  ;;  %v10134_v50 = vld [vmem:[#allocation16_spill] sm:$0xff] }
 0x2a8   : > { %7239 = vcosq.f32 %v2531_v8  ;;  %v6752_v19 = vmin.u32 %v2612_v57, %v8298_v29  ;;  %v2685_v38 = vsel %vm2681_vm5, %v2665_v26, %v2668_v59  ;;  %v2687_v14 = vsel %vm2683_vm14, %v2671_v47, %v2686_v42  ;;  %v8332_v22 = vpop.eup %7237 }
 0x2a9   : > { %vm2435_vm15 = vcmp.eq.s32.totalorder %v2433_v0, 0  ;;  %vm2438_vm7 = vcmp.eq.s32.totalorder %v2433_v0, 2  ;;  %v10054_v12 = vxor.u32 2147483648, %v8325_v40  ;;  %7241 = vsinq.f32 %v2531_v8 }
 0x2aa   : > { %v10057_v43 = vxor.u32 2147483648, %v8332_v22  ;;  %v2614_v34 = vclz %v6752_v19  ;;  %v8336_v37 = vmul.u32.u64.low %v2697_v28, %v2692_v18  ;;  %v8337_v4 = vmul.u32.u64.high %v2697_v28, %v2692_v18, %v8336_v37  ;;  %v10136_v19 = vld [vmem:[#allocation20_spill] sm:$0xff] }
 0x2ab   : > { %v2440_v59 = vsel %vm2438_vm7, %v10054_v12, %v8332_v22  ;;  %v8343_v31 = vand.u32 3, %v8312_v2  ;;  %v2688_v47 = vsel %vm2682_vm13, %v2685_v38, %v2687_v14  ;;  %v2752_v33 = vand.u32 2147483647, %v10134_v50 }
 0x2ac   : > { %v2437_v10 = vsel %vm2435_vm15, %v8325_v40, %v10057_v43  ;;  %v6753_v13 = vadd.s32 4294967294, %v2614_v34  ;;  %v8352_v21 = vadd.s32 %v8336_v37, %v8323_v16  ;;  %vm2706_vm9 = vc.u32 %v8323_v16, %v8336_v37 }
 0x2ad   : > { %7243 = vpow2.f32 %v8076_v51  ;;  %v8357_v42 = vmul.f32 1.442695, %v8078_v5  ;;  %v2441_v20 = vsel %vm2434_vm8, %v2437_v10, %v2440_v59  ;;  %v2602_v46 = vadd.s32 %v8204_v3, %v8200_v60  ;;  %v10135_v5 = vld [vmem:[#allocation21_spill] sm:$0xff] }
 0x2ae   : > { %v2442_v57 = vsel %vm10064_vm6, nan, %v2441_v20  ;;  %vm6754_vm11 = vcmp.lt.s32.totalorder %v6753_v13, 0  ;;  %v2704_v26 = vmul.u32 %v2697_v28, %v2688_v47  ;;  %v2707_v8 = vadd.s32 1, %v8337_v4 }
 0x2af   : > { %3071 = vrot.lane.b32.xlu1 %v2442_v57, %s7312_s15  ;;  %v2617_v18 = vsel %vm6754_vm11, 0, %v6753_v13  ;;  %v2759_v51 = vand.u32 8388607, %v2752_v33  ;;  %v2770_v0 = vshrl.u32 %v10097_v41, %v10135_v5  ;;  %v2773_v9 = vshrl.u32 %v10100_v15, %v10135_v5 }
 0x2b0   : > { %vm2538_vm3 = vcmp.eq.s32.totalorder %v8343_v31, 0  ;;  %v2618_v60 = vsub.s32 32, %v2617_v18  ;;  %v2622_v3 = vsub.s32 4294967266, %v2617_v18  ;;  %v2708_v28 = vsel %vm2706_vm9, %v2707_v8, %v8337_v4 }
 0x2b1   : > { %v2772_v38 = vshll.u32 %v10097_v41, %v10136_v19  ;;  %vm2537_vm5 = vcmp.lt.s32.totalorder %v8343_v31, 2  ;;  %v2709_v14 = vadd.s32 %v2708_v28, %v2704_v26  ;;  %v2769_v34 = vshll.u32 %v10099_v6, %v10136_v19  ;;  %v10137_v28 = vld [vmem:[#allocation27_spill] sm:$0xff] }
 0x2b2   : > { %v2775_v59 = vshll.u32 %v10100_v15, %v10136_v19  ;;  %v2776_v47 = vshrl.u32 %v10088_v1, %v10135_v5  ;;  %vm10063_vm14 = vweird.f32 %v7622_v44  ;;  %v2619_v16 = vshll.u32 %v8298_v29, %v2617_v18 }
 0x2b3   : > { %v2620_v37 = vshrl.u32 %v2602_v46, %v2618_v60  ;;  %v2623_v4 = vadd.s32 127, %v2622_v3  ;;  %v2774_v10 = vor.u32 %v2773_v9, %v2772_v38  ;;  %v2710_v13 = vadd.s32 536870912, %v2709_v14 }
 0x2b4   : > { %v2771_v20 = vor.u32 %v2770_v0, %v2769_v34  ;;  %v2777_v57 = vor.u32 %v2776_v47, %v2775_v59  ;;  %vm2786_vm13 = vcmp.lt.s32.totalorder %v7831_v23, 3  ;;  %vm2541_vm8 = vcmp.eq.s32.totalorder %v8343_v31, 2 }
 0x2b5   : > { %vm2548_vm15 = vcmp.lt.s32.totalorder %v10117_v55, 0  ;;  %v2621_v26 = vor.u32 %v2620_v37, %v2619_v16  ;;  %v2624_v8 = vshll.u32 %v2623_v4, 23  ;;  %v2798_v19 = vsel %vm2786_vm13, %v10137_v28, %v7885_v11  ;;  %v8394_v29 = vpop.eup %7239  ;;  %v10138_v37 = vld [vmem:[#allocation29_spill] sm:$0xff] }
 0x2b6   : > { %v8396_v46 = vshrl.u32 %v2710_v13, 30  ;;  %v2760_v18 = vor.u32 8388608, %v2759_v51  ;;  %v2768_v0 = vshrl.u32 %v10099_v6, %v10135_v5  ;;  %vm2784_vm7 = vcmp.lt.s32.totalorder %v7831_v23, 1  ;;  %v8401_v9 = vpop.eup %7241 }
 0x2b7   : > { %v10055_v60 = vxor.u32 2147483648, %v8394_v29  ;;  %v2625_v3 = vor.u32 4788187, %v2624_v8  ;;  %vm2785_vm9 = vcmp.lt.s32.totalorder %v7831_v23, 2  ;;  %v2796_v11 = vsel %vm2784_vm7, %v2774_v10, %v2777_v57 }
 0x2b8   : > { %v10056_v38 = vxor.u32 2147483648, %v8401_v9  ;;  %v2712_v34 = vshll.u32 %v8396_v46, 30  ;;  %v2789_v51 = vsel %vm2787_vm1, %v2777_v57, 2102212464  ;;  %v2792_v5 = vsel %vm2784_vm7, %v2771_v20, %v2774_v10 }
 0x2b9   : > { %v2543_v59 = vsel %vm2541_vm8, %v10055_v60, %v8401_v9  ;;  %v2626_v47 = vand.u32 2147483647, %v2625_v3  ;;  %v2628_v16 = vcvt.s32.f32 %v2621_v26  ;;  %v2794_v4 = vsel %vm2786_vm13, %v2777_v57, %v10138_v37 }
 0x2ba   : > { %v2540_v13 = vsel %vm2538_vm3, %v8394_v29, %v10056_v38  ;;  %v2632_v8 = vsub.s32 4, %v8264_v35  ;;  %v8427_v28 = vsub.s32 %v2709_v14, %v2712_v34  ;;  %v2799_v12 = vsel %vm2785_vm9, %v2796_v11, %v2798_v19  ;;  %v8431_v60 = vpop.eup %7243 }
 0x2bb   : > { %v2544_v26 = vsel %vm2537_vm5, %v2540_v13, %v2543_v59  ;;  %v2629_v3 = vmul.f32 %v2628_v16, %v2626_v47  ;;  %v2788_v57 = vsel %vm2784_vm7, %v2768_v0, %v2771_v20  ;;  %v2800_v37 = vshll.u32 %v2760_v18, 8  ;;  %v10139_v59 = vld [vmem:[#allocation18_spill] sm:$0xff] }
 0x2bc   : > { %v2545_v38 = vsel %vm10063_vm14, nan, %v2544_v26  ;;  %v2715_v43 = vsub.s32 0, %v8427_v28  ;;  %v2790_v14 = vsel %vm2786_vm13, %v2774_v10, %v2789_v51  ;;  %v2795_v19 = vsel %vm2785_vm9, %v2792_v5, %v2794_v4  ;;  %v10142_v26 = vld [vmem:[#allocation22_spill] sm:$0xff] }
 0x2bd   : > { %3073 = vrot.lane.b32.xlu0 %v2545_v38, %s7312_s15  ;;  %v2630_v31 = vxor.u32 2147483648, %v2629_v3  ;;  %v8445_v11 = vmul.u32.u64.low %v2800_v37, %v2799_v12  ;;  %v8446_v34 = vmul.u32.u64.high %v2800_v37, %v2799_v12, %v8445_v11  ;;  %v2855_v20 = vand.u32 2147483647, %v10139_v59 }
 0x2be   : > { %v6735_v18 = vclamps-f32 %v8212_v32, 20.0  ;;  %v10140_v0 = vsub.f32 %v10109_v49, %v8054_v56  ;;  %v2633_v10 = vsel %vm2548_vm15, %v2632_v8, %v8264_v35  ;;  %v6756_v51 = vmin.u32 %v2715_v43, %v8427_v28 }
 0x2bf   : > { %v10141_v38 = vand.u32 2147483647, %v10117_v55  ;;  %v2631_v12 = vsel %vm2548_vm15, %v2630_v31, %v2629_v3  ;;  %v8463_v5 = vmul.u32.u64.low %v2800_v37, %v2795_v19  ;;  %v8464_v16 = vmul.u32.u64.high %v2800_v37, %v2795_v19, %v8463_v5 }
 0x2c0   : > { %v8453_v47 = vmul.f32 2.0, %v10140_v0  ;;  %v2717_v56 = vclz %v6756_v51  ;;  %v2791_v49 = vsel %vm2785_vm9, %v2788_v57, %v2790_v14  ;;  %v2862_v35 = vand.u32 8388607, %v2855_v20 }
 0x2c1   : > { %vm2547_vm1 = vcmp.le.f32.partialorder %v10141_v38, 0.7853982  ;;  %v8474_v43 = vadd.s32 %v8463_v5, %v8446_v34  ;;  %vm2809_vm11 = vc.u32 %v8446_v34, %v8463_v5  ;;  %v2872_v3 = vshll.u32 %v10099_v6, %v10142_v26 }
 0x2c2   : > { %v2634_v4 = vsel %vm2547_vm1, %v10117_v55, %v2631_v12  ;;  %v8471_v13 = vsel %vm2547_vm1, 0, %v2633_v10  ;;  %v6757_v8 = vadd.s32 4294967294, %v2717_v56  ;;  %v2873_v23 = vshrl.u32 %v10097_v41, %v7740_v36 }
 0x2c3   : > { %7245 = vcosq.f32 %v2634_v4  ;;  %v2807_v57 = vmul.u32 %v2800_v37, %v2791_v49  ;;  %v2810_v14 = vadd.s32 1, %v8464_v16  ;;  %v2875_v19 = vshll.u32 %v10097_v41, %v10142_v26 }
 0x2c4   : > { %7247 = vsinq.f32 %v2634_v4  ;;  %v2876_v31 = vshrl.u32 %v10100_v15, %v7740_v36  ;;  %vm6758_vm3 = vcmp.lt.s32.totalorder %v6757_v8, 0  ;;  %v2863_v11 = vor.u32 8388608, %v2862_v35 }
 0x2c5   : > { %v2874_v34 = vor.u32 %v2873_v23, %v2872_v3  ;;  %v2879_v0 = vshrl.u32 %v10088_v1, %v7740_v36  ;;  %v2720_v10 = vsel %vm6758_vm3, 0, %v6757_v8  ;;  %v2811_v51 = vsel %vm2809_vm11, %v2810_v14, %v8464_v16 }
 0x2c6   : > { %v2877_v38 = vor.u32 %v2876_v31, %v2875_v19  ;;  %v2878_v37 = vshll.u32 %v10100_v15, %v10142_v26  ;;  %v2721_v12 = vsub.s32 32, %v2720_v10  ;;  %v2725_v5 = vsub.s32 4294967266, %v2720_v10 }
 0x2c7   : > { %v2812_v4 = vadd.s32 %v2811_v51, %v2807_v57  ;;  %vm2887_vm5 = vcmp.lt.s32.totalorder %v7892_v54, 1  ;;  %v2722_v56 = vshll.u32 %v8427_v28, %v2720_v10  ;;  %vm2889_vm13 = vcmp.lt.s32.totalorder %v7892_v54, 3 }
 0x2c8   : > { %v2880_v49 = vor.u32 %v2879_v0, %v2878_v37  ;;  %v2895_v35 = vsel %vm2887_vm5, %v2874_v34, %v2877_v38  ;;  %v2723_v8 = vshrl.u32 %v8352_v21, %v2721_v12  ;;  %v2726_v16 = vadd.s32 127, %v2725_v5 }
 0x2c9   : > { %v2813_v3 = vadd.s32 536870912, %v2812_v4  ;;  %v2901_v26 = vsel %vm2889_vm13, %v7973_v63, %v8047_v52  ;;  %v2871_v23 = vshrl.u32 %v10099_v6, %v7740_v36  ;;  %vm2888_vm8 = vcmp.lt.s32.totalorder %v7892_v54, 2 }
 0x2ca   : > { %v2892_v28 = vsel %vm2890_vm10, %v2880_v49, 2102212464  ;;  %v2897_v57 = vsel %vm2889_vm13, %v2880_v49, %v8019_v58  ;;  %v2899_v21 = vsel %vm2887_vm5, %v2877_v38, %v2880_v49  ;;  %v2724_v14 = vor.u32 %v2723_v8, %v2722_v56 }
 0x2cb   : > { %v2727_v19 = vshll.u32 %v2726_v16, 23  ;;  %v8510_v31 = vshrl.u32 %v2813_v3, 30  ;;  %vm2638_vm15 = vweird.f32 %v10117_v55  ;;  %v2639_v36 = vand.u32 3, %v8471_v13 }
 0x2cc   : > { %v2898_v63 = vsel %vm2888_vm8, %v2895_v35, %v2897_v57  ;;  %v2902_v52 = vsel %vm2888_vm8, %v2899_v21, %v2901_v26  ;;  %v2903_v58 = vshll.u32 %v2863_v11, 8  ;;  %v2891_v51 = vsel %vm2887_vm5, %v2871_v23, %v2874_v34 }
 0x2cd   : > { %v2728_v0 = vor.u32 4788187, %v2727_v19  ;;  %v2815_v10 = vshll.u32 %v8510_v31, 30  ;;  %v2893_v37 = vsel %vm2889_vm13, %v2877_v38, %v2892_v28  ;;  %vm8534_vm10 = vcmp.le.f32.partialorder %v2649_v61, 0.7853982 }
 0x2ce   : > { %v8524_v12 = vmul.u32.u64.low %v2903_v58, %v2902_v52  ;;  %v8525_v5 = vmul.u32.u64.high %v2903_v58, %v2902_v52, %v8524_v12  ;;  %v8527_v56 = vmul.u32.u64.low %v2903_v58, %v2898_v63  ;;  %v8528_v49 = vmul.u32.u64.high %v2903_v58, %v2898_v63, %v8527_v56 }
 0x2cf   : > { %v2729_v8 = vand.u32 2147483647, %v2728_v0  ;;  %v2731_v16 = vcvt.s32.f32 %v2724_v14  ;;  %v8538_v34 = vsub.s32 %v2812_v4, %v2815_v10  ;;  %vm2640_vm7 = vcmp.lt.s32.totalorder %v2639_v36, 2  ;;  %v2100_v14 = vpop.permute.xlu1 %2099 }
 0x2d0   : > { %v8530_v35 = vpop.eup %7245  ;;  %vm2641_vm9 = vcmp.eq.s32.totalorder %v2639_v36, 0  ;;  %v2894_v26 = vsel %vm2888_vm8, %v2891_v51, %v2893_v37  ;;  %vm2644_vm1 = vcmp.eq.s32.totalorder %v2639_v36, 2  ;;  %v8551_v57 = vadd.s32 %v8527_v56, %v8525_v5 }
 0x2d1   : > { %v8540_v3 = vpop.eup %7247  ;;  %v10060_v38 = vxor.u32 2147483648, %v8530_v35  ;;  %v2732_v61 = vmul.f32 %v2731_v16, %v2729_v8  ;;  %v2818_v28 = vsub.s32 0, %v8538_v34  ;;  %vm2912_vm11 = vc.u32 %v8525_v5, %v8527_v56  ;;  %v10145_v8 = vld [vmem:[#allocation11_spill] sm:$0xff] }
 0x2d2   : > { %v10062_v23 = vxor.u32 2147483648, %v8540_v3  ;;  %v2913_v21 = vadd.s32 1, %v8528_v49  ;;  %v2910_v52 = vmul.u32 %v2903_v58, %v2894_v26  ;;  %vm2651_vm3 = vcmp.lt.s32.totalorder %v10127_v39, 0  ;;  %v10146_v58 = vld [vmem:[#allocation34_spill] sm:$0xff]  ;;  %v10148_v26 = vld [vmem:[#allocation12_spill] sm:$0xff] }
 0x2d3   : > { %v2646_v4 = vsel %vm2644_vm1, %v10060_v38, %v8540_v3  ;;  %v2733_v19 = vxor.u32 2147483648, %v2732_v61  ;;  %v6760_v63 = vmin.u32 %v2818_v28, %v8538_v34  ;;  %v2735_v10 = vsub.s32 4, %v8396_v46 }
 0x2d4   : > { %v2643_v54 = vsel %vm2641_vm9, %v8530_v35, %v10062_v23  ;;  %v2914_v51 = vsel %vm2912_vm11, %v2913_v21, %v8528_v49  ;;  %7249 = vpow2.f32 %v8357_v42  ;;  %v10147_v36 = vsub.f32 %v10145_v8, %v10146_v58 }
 0x2d5   : > { %v2647_v0 = vsel %vm2640_vm7, %v2643_v54, %v2646_v4  ;;  %v2734_v12 = vsel %vm2651_vm3, %v2733_v19, %v2732_v61  ;;  %v2820_v5 = vclz %v6760_v63  ;;  %v2915_v56 = vadd.s32 %v2914_v51, %v2910_v52  ;;  %v10149_v54 = vld [vmem:[#allocation19_spill] sm:$0xff]  ;;  %v10150_v63 = vld [vmem:[#allocation25_spill] sm:$0xff] }
 0x2d6   : > { %v2648_v37 = vsel %vm2638_vm15, nan, %v2647_v0  ;;  %v8571_v16 = vmul.f32 2.0, %v10147_v36  ;;  %v2116_v28 = vsub.f32 %v10148_v26, %v2100_v14  ;;  %v2737_v49 = vsel %vm8534_vm10, %v10127_v39, %v2734_v12  ;;  %v10151_v12 = vld [vmem:[#allocation24_spill] sm:$0xff] }
 0x2d7   : > { %3075 = vrot.lane.b32.xlu1 %v2648_v37, %s7312_s15  ;;  %v6736_v4 = vclamps-f32 %v8453_v47, 20.0  ;;  %7251 = vcosq.f32 %v2737_v49  ;;  %v6761_v61 = vadd.s32 4294967294, %v2820_v5  ;;  %v2916_v21 = vadd.s32 536870912, %v2915_v56 }
 0x2d8   : > { %v2736_v42 = vsel %vm2651_vm3, %v2735_v10, %v8396_v46  ;;  %7253 = vsinq.f32 %v2737_v49  ;;  %v10061_v19 = vand.u32 2147483647, %v10149_v54  ;;  %v2979_v14 = vshrl.u32 %v10100_v15, %v10150_v63 }
 0x2d9   : > { %v2201_v52 = vsub.f32 0.0, %v6735_v18  ;;  %vm6762_vm5 = vcmp.lt.s32.totalorder %v6761_v61, 0  ;;  %v8587_v0 = vshrl.u32 %v2916_v21, 30  ;;  %v2976_v51 = vshrl.u32 %v10097_v41, %v10150_v63 }
 0x2da   : > { %v2823_v37 = vsel %vm6762_vm5, 0, %v6761_v61  ;;  %v2978_v5 = vshll.u32 %v10097_v41, %v10151_v12  ;;  %v2981_v46 = vshll.u32 %v10100_v15, %v10151_v12  ;;  %v2982_v10 = vshrl.u32 %v10088_v1, %v10150_v63 }
 0x2db   : > { %v8599_v8 = vsel %vm8534_vm10, 0, %v2736_v42  ;;  %v2824_v58 = vsub.s32 32, %v2823_v37  ;;  %v2828_v36 = vsub.s32 4294967266, %v2823_v37  ;;  %v2918_v26 = vshll.u32 %v8587_v0, 30 }
 0x2dc   : > { %v2965_v49 = vand.u32 8388607, %v10061_v19  ;;  %v2975_v41 = vshll.u32 %v10099_v6, %v10151_v12  ;;  %v2980_v61 = vor.u32 %v2979_v14, %v2978_v5  ;;  %v2983_v21 = vor.u32 %v2982_v10, %v2981_v46  ;;  %v10152_v5 = vld [vmem:[#allocation30_spill] sm:$0xff]  ;;  %v10156_v46 = vld [vmem:[#allocation15_spill] sm:$0xff]  ;;  %v10157_v10 = vld [vmem:[#allocation33_spill] sm:$0xff] }
 0x2dd   : > { %v2825_v15 = vshll.u32 %v8538_v34, %v2823_v37  ;;  %v2826_v1 = vshrl.u32 %v8474_v43, %v2824_v58  ;;  %v2829_v27 = vadd.s32 127, %v2828_v36  ;;  %v8608_v11 = vsub.s32 %v2915_v56, %v2918_v26  ;;  %v10155_v37 = vld [vmem:[#allocation35_spill] sm:$0xff] }
 0x2de   : > { %v8610_v42 = vmul.f32 1.442695, %v2201_v52  ;;  %v8614_v24 = vsub.f32 0.0, %v6736_v4  ;;  %v8616_v38 = vmul.f32 2.0, %v2116_v28  ;;  %v2977_v19 = vor.u32 %v2976_v51, %v2975_v41 }
 0x2df   : > { %v2827_v23 = vor.u32 %v2826_v1, %v2825_v15  ;;  %v2830_v12 = vshll.u32 %v2829_v27, 23  ;;  %v2921_v14 = vsub.s32 0, %v8608_v11  ;;  %vm2990_vm13 = vcmp.lt.s32.totalorder %v10152_v5, 1 }
 0x2e0   : > { %v2742_v43 = vand.u32 3, %v8599_v8  ;;  %vm2754_vm8 = vcmp.lt.s32.totalorder %v10134_v50, 0  ;;  %v2966_v34 = vor.u32 8388608, %v2965_v49  ;;  %v2974_v56 = vshrl.u32 %v10099_v6, %v10150_v63 }
 0x2e1   : > { %v3002_v52 = vsel %vm2990_vm13, %v2980_v61, %v2983_v21  ;;  %vm2741_vm10 = vweird.f32 %v10127_v39  ;;  %vm8629_vm7 = vcmp.le.f32.partialorder %v2752_v33, 0.7853982  ;;  %v2831_v28 = vor.u32 4788187, %v2830_v12  ;;  %v8647_v36 = vpop.eup %7249 }
 0x2e2   : > { %v6764_v51 = vmin.u32 %v2921_v14, %v8608_v11  ;;  %vm2991_vm9 = vcmp.lt.s32.totalorder %v10152_v5, 2  ;;  %vm2992_vm1 = vcmp.lt.s32.totalorder %v10152_v5, 3  ;;  %v2995_v6 = vsel %vm2993_vm4, %v2983_v21, 2102212464 }
 0x2e3   : > { %v2998_v63 = vsel %vm2990_vm13, %v2977_v19, %v2980_v61  ;;  %v3000_v33 = vsel %vm2992_vm1, %v2983_v21, %v10155_v37  ;;  %v3004_v58 = vsel %vm2992_vm1, %v10157_v10, %v10156_v46  ;;  %v2832_v26 = vand.u32 2147483647, %v2831_v28 }
 0x2e4   : > { %v2834_v49 = vcvt.s32.f32 %v2827_v23  ;;  %v2923_v41 = vclz %v6764_v51  ;;  %v3005_v15 = vsel %vm2991_vm9, %v3002_v52, %v3004_v58  ;;  %v8651_v1 = vpop.eup %7251  ;;  %vm2743_vm4 = vcmp.lt.s32.totalorder %v2742_v43, 2 }
 0x2e5   : > { %vm2747_vm11 = vcmp.eq.s32.totalorder %v2742_v43, 2  ;;  %v2994_v21 = vsel %vm2990_vm13, %v2974_v56, %v2977_v19  ;;  %v3006_v12 = vshll.u32 %v2966_v34, 8  ;;  %v8655_v14 = vpop.eup %7253  ;;  %v2748_v37 = vxor.u32 2147483648, %v8651_v1 }
 0x2e6   : > { %v2835_v46 = vmul.f32 %v2834_v49, %v2832_v26  ;;  %v6765_v10 = vadd.s32 4294967294, %v2923_v41  ;;  %v3001_v23 = vsel %vm2991_vm9, %v2998_v63, %v3000_v33  ;;  %v2745_v28 = vxor.u32 2147483648, %v8655_v14 }
 0x2e7   : > { %v2996_v52 = vsel %vm2992_vm1, %v2980_v61, %v2995_v6  ;;  %v8663_v51 = vmul.u32.u64.low %v3006_v12, %v3005_v15  ;;  %v8664_v58 = vmul.u32.u64.high %v3006_v12, %v3005_v15, %v8663_v51  ;;  %vm2744_vm3 = vcmp.eq.s32.totalorder %v2742_v43, 0 }
 0x2e8   : > { %v2749_v19 = vsel %vm2747_vm11, %v2748_v37, %v8655_v14  ;;  %v2836_v34 = vxor.u32 2147483648, %v2835_v46  ;;  %vm6766_vm5 = vcmp.lt.s32.totalorder %v6765_v10, 0  ;;  %v2746_v56 = vsel %vm2744_vm3, %v8651_v1, %v2745_v28 }
 0x2e9   : > { %v2926_v63 = vsel %vm6766_vm5, 0, %v6765_v10  ;;  %v8672_v33 = vmul.u32.u64.low %v3006_v12, %v3001_v23  ;;  %v8673_v26 = vmul.u32.u64.high %v3006_v12, %v3001_v23, %v8672_v33  ;;  %v2750_v61 = vsel %vm2743_vm4, %v2746_v56, %v2749_v19 }
 0x2ea   : > { %v2837_v6 = vsel %vm2754_vm8, %v2836_v34, %v2835_v46  ;;  %v2927_v49 = vsub.s32 32, %v2926_v63  ;;  %v2997_v41 = vsel %vm2991_vm9, %v2994_v21, %v2996_v52  ;;  %v2751_v15 = vsel %vm2741_vm10, nan, %v2750_v61 }
 0x2eb   : > { %v2840_v51 = vsel %vm8629_vm7, %v10134_v50, %v2837_v6  ;;  %v2931_v10 = vsub.s32 4294967266, %v2926_v63  ;;  %v8686_v23 = vadd.s32 %v8672_v33, %v8664_v58  ;;  %3077 = vrot.lane.b32.xlu0 %v2751_v15, %s7312_s15  ;;  %v2928_v43 = vshll.u32 %v8608_v11, %v2926_v63  ;;  %v10161_v15 = vld [vmem:[#allocation36_spill] sm:$0xff] }
 0x2ec   : > { %7255 = vcosq.f32 %v2840_v51  ;;  %v2929_v46 = vshrl.u32 %v8551_v57, %v2927_v49  ;;  %vm3015_vm13 = vc.u32 %v8664_v58, %v8672_v33  ;;  %v2838_v5 = vsub.s32 4, %v8510_v31  ;;  %v10159_v49 = vld [vmem:[#allocation31_spill] sm:$0xff] }
 0x2ed   : > { %7257 = vsinq.f32 %v2840_v51  ;;  %v2932_v21 = vadd.s32 127, %v2931_v10  ;;  %v3016_v52 = vadd.s32 1, %v8673_v26  ;;  %v2215_v19 = vmul.f32 1.442695, %v8614_v24 }
 0x2ee   : > { %v6737_v34 = vclamps-f32 %v8571_v16, 20.0  ;;  %v2930_v56 = vor.u32 %v2929_v46, %v2928_v43  ;;  %v3013_v61 = vmul.u32 %v3006_v12, %v2997_v41  ;;  %v2189_v6 = vmul.f32 1.442695, %v6735_v18  ;;  %v10158_v12 = vld [vmem:[#allocation32_spill] sm:$0xff] }
 0x2ef   : > { %v2933_v11 = vshll.u32 %v2932_v21, 23  ;;  %v3017_v57 = vsel %vm3015_vm13, %v3016_v52, %v8673_v26  ;;  %v2191_v58 = vmul.f32 1.442695, %v6736_v4  ;;  %v6738_v63 = vclamps-f32 %v8616_v38, 20.0  ;;  %v10160_v26 = vld [vmem:[#allocation10_spill] sm:$0xff] }
 0x2f0   : > { %v3018_v33 = vadd.s32 %v3017_v57, %v3013_v61  ;;  %7259 = vpow2.f32 %v8610_v42  ;;  %v2839_v24 = vsel %vm2754_vm8, %v2838_v5, %v8510_v31  ;;  %v3117_v32 = vsub.f32 %v10159_v49, %v10158_v12 }
 0x2f1   : > { %v2934_v16 = vor.u32 4788187, %v2933_v11  ;;  %7261 = vpow2.f32 %v2215_v19  ;;  %v2203_v18 = vsub.f32 0.0, %v6737_v34  ;;  %v3118_v47 = vsub.f32 %v10160_v26, %v8147_v25 }
 0x2f2   : > { %v3019_v41 = vadd.s32 536870912, %v3018_v33  ;;  %7263 = vpow2.f32 %v2189_v6  ;;  %v2937_v38 = vcvt.s32.f32 %v2930_v56  ;;  %v3119_v42 = vsub.f32 %v10161_v15, %v8283_v17 }
 0x2f3   : > { %v2935_v4 = vand.u32 2147483647, %v2934_v16  ;;  %7265 = vpow2.f32 %v2191_v58  ;;  %v2841_v31 = vsel %vm8629_vm7, 0, %v2839_v24  ;;  %v2204_v10 = vsub.f32 0.0, %v6738_v63 }
 0x2f4   : > { %v8714_v51 = vshrl.u32 %v3019_v41, 30  ;;  %v2941_v46 = vsub.s32 4, %v8587_v0  ;;  %v3120_v5 = vsub.f32 %v8431_v60, %v8647_v36  ;;  %v2217_v21 = vmul.f32 1.442695, %v2203_v18 }
 0x2f5   : > { %v2938_v43 = vmul.f32 %v2937_v38, %v2935_v4  ;;  %v2845_v19 = vand.u32 3, %v2841_v31  ;;  %vm2857_vm8 = vcmp.lt.s32.totalorder %v10139_v59, 0  ;;  %v2193_v61 = vmul.f32 1.442695, %v6737_v34 }
 0x2f6   : > { %v3021_v52 = vshll.u32 %v8714_v51, 30  ;;  %v2195_v6 = vmul.f32 1.442695, %v6738_v63  ;;  %v2219_v57 = vmul.f32 1.442695, %v2204_v10  ;;  %v2942_v24 = vsel %vm2857_vm8, %v2941_v46, %v8587_v0 }
 0x2f7   : > { %v2939_v56 = vxor.u32 2147483648, %v2938_v43  ;;  %vm2856_vm7 = vcmp.le.f32.partialorder %v2855_v20, 0.7853982  ;;  %7267 = vpow2.f32 %v2217_v21  ;;  %vm2847_vm9 = vcmp.eq.s32.totalorder %v2845_v19, 0 }
 0x2f8   : > { %v8721_v27 = vsub.s32 %v3018_v33, %v3021_v52  ;;  %vm2850_vm1 = vcmp.eq.s32.totalorder %v2845_v19, 2  ;;  %v8737_v33 = vsel %vm2856_vm7, 0, %v2942_v24  ;;  %vm2846_vm4 = vcmp.lt.s32.totalorder %v2845_v19, 2 }
 0x2f9   : > { %v8723_v11 = vpop.eup %7255  ;;  %v2940_v58 = vsel %vm2857_vm8, %v2939_v56, %v2938_v43  ;;  %vm2844_vm11 = vweird.f32 %v10134_v50  ;;  %v2948_v52 = vand.u32 3, %v8737_v33  ;;  %v3650_v24 = vadd.s32 3, %v8599_v8 }
 0x2fa   : > { %v8728_v16 = vpop.eup %7257  ;;  %v2851_v18 = vxor.u32 2147483648, %v8723_v11  ;;  %v2943_v41 = vsel %vm2856_vm7, %v10139_v59, %v2940_v58  ;;  %v3024_v34 = vsub.s32 0, %v8721_v27  ;;  %vm2947_vm7 = vweird.f32 %v10139_v59 }
 0x2fb   : > { %v2848_v63 = vxor.u32 2147483648, %v8728_v16  ;;  %7269 = vcosq.f32 %v2943_v41  ;;  %vm2950_vm5 = vcmp.eq.s32.totalorder %v2948_v52, 0  ;;  %vm2949_vm13 = vcmp.lt.s32.totalorder %v2948_v52, 2 }
 0x2fc   : > { %v2852_v20 = vsel %vm2850_vm1, %v2851_v18, %v8728_v16  ;;  %7271 = vsinq.f32 %v2943_v41  ;;  %v6768_v0 = vmin.u32 %v3024_v34, %v8721_v27  ;;  %vm2953_vm8 = vcmp.eq.s32.totalorder %v2948_v52, 2  ;;  %v10164_v52 = vld [vmem:[#allocation2_spill] sm:$0xff] }
 0x2fd   : > { %7273 = vpow2.f32 %v2219_v57  ;;  %v2849_v4 = vsel %vm2847_vm9, %v8723_v11, %v2848_v63  ;;  %v8743_v38 = vpop.eup %7259  ;;  %v10179_v30 = vxor.u32 2147483648, %v8332_v22 }
 0x2fe   : > { %7275 = vpow2.f32 %v2193_v61  ;;  %v2853_v10 = vsel %vm2846_vm4, %v2849_v4, %v2852_v20  ;;  %v3026_v43 = vclz %v6768_v0  ;;  %v8746_v46 = vpop.eup %7261  ;;  %v3546_v61 = vadd.s32 3, %v8471_v13 }
 0x2ff   : > { %7277 = vpow2.f32 %v2195_v6  ;;  %v2854_v21 = vsel %vm2844_vm11, nan, %v2853_v10  ;;  %v8751_v19 = vpop.eup %7263  ;;  %v3651_v20 = vand.u32 3, %v3650_v24  ;;  %v3754_v0 = vadd.s32 3, %v2841_v31 }
 0x300   : > { %3079 = vrot.lane.b32.xlu1 %v2854_v21, %s7312_s15  ;;  %v6769_v56 = vadd.s32 4294967294, %v3026_v43  ;;  %v8754_v57 = vpop.eup %7265  ;;  %v3547_v34 = vand.u32 3, %v3546_v61  ;;  %v10162_v21 = vxor.u32 2147483648, %v8540_v3  ;;  %v10163_v31 = vxor.u32 2147483648, %v8530_v35 }
 0x301   : > { %vm3652_vm14 = vcmp.lt.s32.totalorder %v3651_v20, 2  ;;  %vm3656_vm6 = vcmp.eq.s32.totalorder %v3651_v20, 2 }
 0x302   : > { %vm6770_vm3 = vcmp.lt.s32.totalorder %v6769_v56, 0  ;;  %vm3548_vm9 = vcmp.lt.s32.totalorder %v3547_v34, 2  ;;  %vm3549_vm1 = vcmp.eq.s32.totalorder %v3547_v34, 0  ;;  %vm3552_vm4 = vcmp.eq.s32.totalorder %v3547_v34, 2 }
 0x303   : > { %v3029_v41 = vsel %vm6770_vm3, 0, %v6769_v56  ;;  %v3551_v56 = vsel %vm3549_vm1, %v8530_v35, %v10162_v21  ;;  %v3554_v61 = vsel %vm3552_vm4, %v10163_v31, %v8540_v3  ;;  %vm3653_vm3 = vcmp.eq.s32.totalorder %v3651_v20, 0 }
 0x304   : > { %v3030_v4 = vsub.s32 32, %v3029_v41  ;;  %v3031_v10 = vshll.u32 %v8721_v27, %v3029_v41  ;;  %v3034_v13 = vsub.s32 4294967266, %v3029_v41  ;;  %v8771_v24 = vpop.eup %7267  ;;  %v3555_v27 = vsel %vm3548_vm9, %v3551_v56, %v3554_v61 }
 0x305   : > { %v3755_v41 = vand.u32 3, %v3754_v0  ;;  %v3658_v3 = vsel %vm3656_vm6, %v2748_v37, %v8655_v14 }
 0x306   : > { %v3032_v8 = vshrl.u32 %v8686_v23, %v3030_v4  ;;  %v3035_v43 = vadd.s32 127, %v3034_v13  ;;  %v8775_v23 = vsel %vm2638_vm15, nan, %v3555_v27  ;;  %v3655_v4 = vsel %vm3653_vm3, %v8651_v1, %v2745_v28 }
 0x307   : > { %vm3756_vm9 = vcmp.lt.s32.totalorder %v3755_v41, 2  ;;  %vm3757_vm1 = vcmp.eq.s32.totalorder %v3755_v41, 0  ;;  %v3659_v55 = vsel %vm3652_vm14, %v3655_v4, %v3658_v3  ;;  %vm3760_vm6 = vcmp.eq.s32.totalorder %v3755_v41, 2 }
 0x308   : > { %v7270_v6 = vpop.eup %7269  ;;  %v3033_v34 = vor.u32 %v3032_v8, %v3031_v10  ;;  %v3036_v58 = vshll.u32 %v3035_v43, 23  ;;  %v8791_v28 = vsel %vm2741_vm10, nan, %v3659_v55  ;;  %v3759_v1 = vsel %vm3757_vm1, %v8723_v11, %v2848_v63 }
 0x309   : > { %v7272_v13 = vpop.eup %7271  ;;  %v2954_v35 = vxor.u32 2147483648, %v7270_v6  ;;  %v3762_v20 = vsel %vm3760_vm6, %v2851_v18, %v8728_v16  ;;  %v3858_v27 = vadd.s32 3, %v8737_v33  ;;  %vm2960_vm14 = vcmp.lt.s32.totalorder %v10149_v54, 0 }
 0x30a   : > { %v8783_v0 = vpop.eup %7273  ;;  %v2951_v10 = vxor.u32 2147483648, %v7272_v13  ;;  %v3037_v8 = vor.u32 4788187, %v3036_v58  ;;  %v3040_v43 = vcvt.s32.f32 %v3033_v34  ;;  %v3763_v61 = vsel %vm3756_vm9, %v3759_v1, %v3762_v20  ;;  %v10169_v20 = vld [vmem:[#allocation6_spill] sm:$0xff] }
 0x30b   : > { %v8786_v21 = vpop.eup %7275  ;;  %v2955_v56 = vsel %vm2953_vm8, %v2954_v35, %v7272_v13  ;;  %v8813_v11 = vsel %vm2844_vm11, nan, %v3763_v61  ;;  %v3859_v16 = vand.u32 3, %v3858_v27  ;;  %v4013_v41 = vrot.slane %v10164_v52, 4 }
 0x30c   : > { %v8796_v14 = vpop.eup %7277  ;;  %v2952_v37 = vsel %vm2950_vm5, %v7270_v6, %v2951_v10  ;;  %v3038_v58 = vand.u32 2147483647, %v3037_v8  ;;  %v3123_v31 = vsub.f32 %v8786_v21, %v8771_v24  ;;  %v10165_v33 = vand.u32 2147483647, %v10149_v54 }
 0x30d   : > { %v2956_v39 = vsel %vm2949_vm13, %v2952_v37, %v2955_v56  ;;  %v3124_v63 = vsub.f32 %v8796_v14, %v8783_v0  ;;  %v3044_v8 = vsub.s32 4, %v8714_v51  ;;  %vm3861_vm10 = vcmp.eq.s32.totalorder %v3859_v16, 0 }
 0x30e   : > { %v2957_v34 = vsel %vm2947_vm7, nan, %v2956_v39  ;;  %v3041_v4 = vmul.f32 %v3040_v43, %v3038_v58  ;;  %vm8820_vm15 = vcmp.le.f32.partialorder %v10165_v33, 0.7853982  ;;  %vm3864_vm5 = vcmp.eq.s32.totalorder %v3859_v16, 2 }
 0x30f   : > { %3081 = vrot.lane.b32.xlu0 %v2957_v34, %s7312_s15  ;;  %vm3860_vm11 = vcmp.lt.s32.totalorder %v3859_v16, 2  ;;  %v3863_v43 = vsel %vm3861_vm10, %v7270_v6, %v2951_v10  ;;  %v3866_v55 = vsel %vm3864_vm5, %v2954_v35, %v7272_v13  ;;  %v3045_v58 = vsel %vm2960_vm14, %v3044_v8, %v8714_v51  ;;  %v10168_v6 = vld [vmem:[#allocation4_spill] sm:$0xff] }
 0x310   : > { %v3042_v18 = vxor.u32 2147483648, %v3041_v4  ;;  %v3867_v1 = vsel %vm3860_vm11, %v3863_v43, %v3866_v55  ;;  %v4015_v13 = vrot.slane %v10168_v6, 4  ;;  %v2221_v35 = vadd.f32 %v10158_v12, %v10159_v49 }
 0x311   : > { %v8833_v37 = vsel %vm2947_vm7, nan, %v3867_v1  ;;  %v3047_v10 = vsel %vm8820_vm15, 0, %v3045_v58  ;;  %v4017_v39 = vrot.slane %v10169_v20, 4  ;;  %vm3050_vm1 = vweird.f32 %v10149_v54 }
 0x312   : > { %v3043_v50 = vsel %vm2960_vm14, %v3042_v18, %v3041_v4  ;;  %v2229_v59 = vmul.f32 0.5, %v2221_v35  ;;  %v3962_v27 = vadd.s32 3, %v3047_v10  ;;  %v2222_v4 = vadd.f32 %v8147_v25, %v10160_v26 }
 0x313   : > { %v3046_v56 = vsel %vm8820_vm15, %v10149_v54, %v3043_v50  ;;  %4021 = vrot.lane.b32.xlu0 %v4013_v41, %s7319_s16  ;;  %v3051_v16 = vand.u32 3, %v3047_v10  ;;  %v3125_v54 = vmul.f32 0.5, %v3117_v32  ;;  %v3126_v12 = vmul.f32 0.5, %v3118_v47 }
 0x314   : > { %7279 = vcosq.f32 %v3046_v56  ;;  %v3963_v18 = vand.u32 3, %v3962_v27  ;;  %v2230_v3 = vmul.f32 0.5, %v2222_v4  ;;  %v10170_v27 = vld [vmem:[#allocation3_spill] sm:$0xff]  ;;  %vm4069_vm6 = vcmask 1043456  }
 0x315   : > { %7281 = vsinq.f32 %v3046_v56  ;;  %vm3052_vm13 = vcmp.lt.s32.totalorder %v3051_v16, 2  ;;  %vm3056_vm8 = vcmp.eq.s32.totalorder %v3051_v16, 2  ;;  %vm3053_vm4 = vcmp.eq.s32.totalorder %v3051_v16, 0  ;;  %v10171_v16 = vld [vmem:[#allocation5_spill] sm:$0xff] }
 0x316   : > { %vm3968_vm7 = vcmp.eq.s32.totalorder %v3963_v18, 2  ;;  %vm3965_vm3 = vcmp.eq.s32.totalorder %v3963_v18, 0  ;;  %vm3964_vm9 = vcmp.lt.s32.totalorder %v3963_v18, 2  ;;  %v4016_v18 = vrot.slane %v10171_v16, 4 }
 0x317   : > { %4025 = vrot.lane.b32.xlu0 %v4015_v13, %s7319_s16  ;;  %v3070_v61 = vpop.permute.xlu0 %3069  ;;  %vm4078_vm5 = vcmask 31744  }
 0x318   : > { %v3093_v34 = vadd.f32 %v3070_v61, %v2229_v59 }
 0x31a   : > { %v3101_v51 = vadd.f32 1e-30, %v3093_v34  ;;  %v4014_v34 = vrot.slane %v10170_v27, 4 }
 0x31b   : > { %4029 = vrot.lane.b32.xlu0 %v4017_v39, %s7319_s16 }
 0x31c   : > { %7283 = vrcp.f32 %v3101_v51  ;;  %v2223_v51 = vadd.f32 %v8283_v17, %v10161_v15  ;;  %v3128_v17 = vmul.f32 0.5, %v3120_v5 }
 0x321   : > { %v7280_v41 = vpop.eup %7279  ;;  %v3072_v55 = vpop.permute.xlu1 %3071 }
 0x322   : > { %v7282_v33 = vpop.eup %7281  ;;  %v3057_v8 = vxor.u32 2147483648, %v7280_v41  ;;  %v3094_v58 = vadd.f32 %v3072_v55, %v2230_v3  ;;  %v10172_v3 = vld [vmem:[#allocation7_spill] sm:$0xff] }
 0x323   : > { %v3054_v50 = vxor.u32 2147483648, %v7282_v33 }
 0x324   : > { %v3058_v43 = vsel %vm3056_vm8, %v3057_v8, %v7282_v33  ;;  %v3970_v56 = vsel %vm3968_vm7, %v3057_v8, %v7282_v33  ;;  %v3102_v59 = vadd.f32 1e-30, %v3094_v58  ;;  %v2231_v33 = vmul.f32 0.5, %v2223_v51 }
 0x325   : > { %v3055_v1 = vsel %vm3053_vm4, %v7280_v41, %v3054_v50  ;;  %v3967_v13 = vsel %vm3965_vm3, %v7280_v41, %v3054_v50  ;;  %v4018_v50 = vrot.slane %v10172_v3, 4  ;;  %v2224_v58 = vadd.f32 %v8647_v36, %v8431_v60 }
 0x326   : > { %v3059_v35 = vsel %vm3052_vm13, %v3055_v1, %v3058_v43  ;;  %v3971_v10 = vsel %vm3964_vm9, %v3967_v13, %v3970_v56  ;;  %7285 = vrcp.f32 %v3102_v59  ;;  %v3127_v56 = vmul.f32 0.5, %v3119_v42 }
 0x327   : > { %v3060_v39 = vsel %vm3050_vm1, nan, %v3059_v35  ;;  %v8849_v61 = vsel %vm3050_vm1, nan, %v3971_v10  ;;  %v2232_v25 = vmul.f32 0.5, %v2224_v58  ;;  %v2225_v10 = vadd.f32 %v8751_v19, %v8743_v38 }
 0x328   : > { %3083 = vrot.lane.b32.xlu1 %v3060_v39, %s7312_s15  ;;  %vm10181_vm8 = vweird.f32 %v10122_v45  ;;  %vm10185_vm9 = vweird.f32 %v7622_v44  ;;  %v4058_v44 = vsub.f32 0.0, %v10172_v3  ;;  %vm5889_vm1 = vcmask 1042434  }
 0x329   : > { %v7284_v4 = vpop.eup %7283  ;;  %v2233_v39 = vmul.f32 0.5, %v2225_v10 }
 0x32a   : > { %3981 = vrot.lane.b32.xlu0 %v7284_v4, %s7311_s14  ;;  %v8861_v41 = vmul.f32 %v7284_v4, %v3125_v54  ;;  %v2226_v54 = vadd.f32 %v8754_v57, %v8746_v46  ;;  %v10173_v4 = vsub.f32 %v8751_v19, %v8743_v38  ;;  %v10174_v38 = vsub.f32 %v8754_v57, %v8746_v46 }
 0x32b   : > { %v10175_v46 = vmov 0.0   ;;  %v3234_v57 = vadd.s32 3, %v8142_v53 }
 0x32c   : > { %4023 = vrot.lane.b32.xlu1 %v4014_v34, %s7319_s16  ;;  %v2234_v60 = vmul.f32 0.5, %v2226_v54  ;;  %v3130_v19 = vmul.f32 0.5, %v10174_v38 }
 0x32f   : > { %v3074_v8 = vpop.permute.xlu0 %3073 }
 0x330   : > { %4027 = vrot.lane.b32.xlu1 %v4016_v18, %s7319_s16  ;;  %v3095_v43 = vadd.f32 %v3074_v8, %v2231_v33  ;;  %v3129_v18 = vmul.f32 0.5, %v10173_v4 }
 0x332   : > { %v3103_v55 = vadd.f32 1e-30, %v3095_v43  ;;  %v2227_v43 = vadd.f32 %v8786_v21, %v8771_v24  ;;  %v10177_v24 = vxor.u32 2147483648, %v8261_v7 }
 0x333   : > { %v7286_v49 = vpop.eup %7285 }
 0x334   : > { %4031 = vrot.lane.b32.xlu1 %v4018_v50, %s7319_s16  ;;  %7287 = vrcp.f32 %v3103_v55  ;;  %v8869_v32 = vmul.f32 %v7286_v49, %v3126_v12  ;;  %v2235_v55 = vmul.f32 0.5, %v2227_v43 }
 0x338   : > { %3983 = vrot.lane.b32.xlu1 %v7286_v49, %s7311_s14 }
 0x341   : > { %v7288_v1 = vpop.eup %7287 }
 0x342   : > { %3985 = vrot.lane.b32.xlu0 %v7288_v1, %s7311_s14  ;;  %v8878_v13 = vmul.f32 %v7288_v1, %v3127_v56  ;;  %v4053_v1 = vsub.f32 0.0, %v10164_v52 }
 0x349   : > { %v3076_v26 = vpop.permute.xlu1 %3075 }
 0x34a   : > { %v3096_v47 = vadd.f32 %v3076_v26, %v2232_v25 }
 0x34c   : > { %v3104_v35 = vadd.f32 1e-30, %v3096_v47 }
 0x34e   : > { %7289 = vrcp.f32 %v3104_v35 }
 0x35b   : > { %v7290_v15 = vpop.eup %7289 }
 0x35c   : > { %3987 = vrot.lane.b32.xlu1 %v7290_v15, %s7311_s14  ;;  %v8886_v42 = vmul.f32 %v7290_v15, %v3128_v17  ;;  %v3131_v17 = vmul.f32 0.5, %v3123_v31  ;;  %v10178_v31 = vxor.u32 2147483648, %v8257_v62 }
 0x35d   : > { %v3078_v59 = vpop.permute.xlu0 %3077 }
 0x35e   : > { %v3097_v34 = vadd.f32 %v3078_v59, %v2233_v39  ;;  %v3235_v59 = vand.u32 3, %v3234_v57 }
 0x360   : > { %v3105_v51 = vadd.f32 1e-30, %v3097_v34  ;;  %vm3237_vm14 = vcmp.eq.s32.totalorder %v3235_v59, 0  ;;  %vm3240_vm15 = vcmp.eq.s32.totalorder %v3235_v59, 2  ;;  %vm3236_vm10 = vcmp.lt.s32.totalorder %v3235_v59, 2 }
 0x361   : > { %v3239_v21 = vsel %vm3237_vm14, %v8257_v62, %v10177_v24  ;;  %vm5954_vm14 = vcmask 1045509  }
 0x362   : > { %7291 = vrcp.f32 %v3105_v51  ;;  %v10176_v51 = vld [vmem:[#allocation8_spill] sm:$0xff] }
 0x363   : > { %v4019_v54 = vrot.slane %v10176_v51, 4 }
 0x36f   : > { %v7292_v33 = vpop.eup %7291 }
 0x370   : > { %3989 = vrot.lane.b32.xlu0 %v7292_v33, %s7311_s14  ;;  %v8894_v36 = vmul.f32 %v7292_v33, %v3129_v18  ;;  %v3242_v18 = vsel %vm3240_vm15, %v10178_v31, %v8261_v7  ;;  %vm5891_vm15 = vcmask 1043459  }
 0x371   : > { %v3243_v43 = vsel %vm3236_vm10, %v3239_v21, %v3242_v18  ;;  %v10182_v21 = vld [vmem:[#allocation9_spill] sm:$0xff]  ;;  %v4057_v18 = vsub.f32 0.0, %v10169_v20  ;;  %vm5956_vm10 = vcmask 1046534  }
 0x372   : > { %v3080_v5 = vpop.permute.xlu1 %3079 }
 0x373   : > { %v3098_v8 = vadd.f32 %v3080_v5, %v2234_v60  ;;  %v3338_v60 = vadd.s32 3, %v8218_v48  ;;  %v3244_v48 = vsel %vm2329_vm12, nan, %v3243_v43 }
 0x375   : > { %v3106_v50 = vadd.f32 1e-30, %v3098_v8  ;;  %v4054_v8 = vsub.f32 0.0, %v10170_v27  ;;  %v3339_v7 = vand.u32 3, %v3338_v60 }
 0x377   : > { %7293 = vrcp.f32 %v3106_v50  ;;  %vm3341_vm11 = vcmp.eq.s32.totalorder %v3339_v7, 0  ;;  %vm3344_vm13 = vcmp.eq.s32.totalorder %v3339_v7, 2  ;;  %vm3340_vm12 = vcmp.lt.s32.totalorder %v3339_v7, 2 }
 0x381   : > { %v3082_v12 = vpop.permute.xlu0 %3081 }
 0x382   : > { %v3099_v49 = vadd.f32 %v3082_v12, %v2235_v55  ;;  %v4055_v55 = vsub.f32 0.0, %v10168_v6 }
 0x384   : > { %v7294_v56 = vpop.eup %7293  ;;  %v3107_v58 = vadd.f32 1e-30, %v3099_v49 }
 0x385   : > { %v4022_v25 = vpop.permute.xlu0 %4021  ;;  %3991 = vrot.lane.b32.xlu1 %v7294_v56, %s7311_s14  ;;  %v8903_v26 = vmul.f32 %v7294_v56, %v3130_v19 }
 0x386   : > { %7295 = vrcp.f32 %v3107_v58  ;;  %v4045_v47 = vsel %vm1460_vm2, %v10164_v52, %v4022_v25  ;;  %v4061_v35 = vsel %vm1460_vm2, %v4053_v1, %v4022_v25  ;;  %v2228_v52 = vadd.f32 %v8796_v14, %v8783_v0 }
 0x387   : > { %v4070_v10 = vsel %vm4069_vm6, %v4045_v47, %v4061_v35  ;;  %v3343_v47 = vsel %vm3341_vm11, %v8325_v40, %v10179_v30  ;;  %v10180_v35 = vxor.u32 2147483648, %v8325_v40  ;;  %v10183_v0 = vxor.u32 2147483648, %v8401_v9 }
 0x388   : > { %7089 = vmatpush3.msra.mxu0 %v4070_v10  ;;  %v2236_v4 = vmul.f32 0.5, %v2228_v52 }
 0x389   : > { %7098 = vmatprep.subr.mxu0 %v10175_v46  ;;  %v4026_v34 = vpop.permute.xlu0 %4025 }
 0x38a   : > { %v4047_v56 = vsel %vm1460_vm2, %v10168_v6, %v4026_v34  ;;  %v4063_v1 = vsel %vm1460_vm2, %v4055_v55, %v4026_v34  ;;  %v3346_v6 = vsel %vm3344_vm13, %v10180_v35, %v8332_v22 }
 0x38b   : > { %v4072_v10 = vsel %vm4069_vm6, %v4047_v56, %v4063_v1 }
 0x38d   : > { %v8928_v5 = vpop.permute.xlu0 %4029 }
 0x393   : > { %v7296_v15 = vpop.eup %7295 }
 0x394   : > { %3993 = vrot.lane.b32.xlu0 %v7296_v15, %s7311_s14  ;;  %v8915_v39 = vmul.f32 %v7296_v15, %v3131_v17  ;;  %v3347_v17 = vsel %vm3340_vm12, %v3343_v47, %v3346_v6  ;;  %v4056_v15 = vsub.f32 0.0, %v10171_v16  ;;  %v4671_v47 = vlaneseq }
 0x395   : > { %v3348_v40 = vsel %vm10181_vm8, nan, %v3347_v17 }
 0x396   : > { %v4672_v35 = vshrl.u32 %v4671_v47, 7 }
 0x398   : > { %4033 = vrot.lane.b32.xlu0 %v4019_v54, %s7319_s16  ;;  %v9037_v6 = vsub.s32 0, %v4672_v35 }
 0x39a   : > { %v3084_v53 = vpop.permute.xlu1 %3083 }
 0x39b   : > { %v3100_v33 = vadd.f32 %v3084_v53, %v2236_v4 }
 0x39c   : > { %v3982_v19 = vpop.permute.xlu0 %3981 }
 0x39d   : > { %v3108_v50 = vadd.f32 1e-30, %v3100_v33  ;;  %v4005_v58 = vmul.f32 %v3982_v19, %v3244_v48 }
 0x39e   : > { %v4024_v12 = vpop.permute.xlu1 %4023 }
 0x39f   : > { %7297 = vrcp.f32 %v3108_v50  ;;  %v4046_v49 = vsel %vm1460_vm2, %v10170_v27, %v4024_v12  ;;  %v4062_v62 = vsel %vm1460_vm2, %v4054_v8, %v4024_v12  ;;  %v4079_v27 = vsel %vm4078_vm5, %v8861_v41, %v4005_v58 }
 0x3a0   : > { %v4071_v38 = vsel %vm4069_vm6, %v4046_v49, %v4062_v62  ;;  %7091 = vmatmul.mubr.msk.f32.vlgmr.msra.gmra.mxu0 %vm1460_vm2, %v4079_v27  ;;  %v3442_v41 = vadd.s32 3, %v8312_v2  ;;  %v3132_v2 = vmul.f32 0.5, %v3124_v63  ;;  %v10184_v63 = vxor.u32 2147483648, %v8394_v29 }
 0x3a1   : > { %7094 = vmatpush3.msra.mxu1 %v4071_v38  ;;  %7099 = vmatpush3.msra.mxu0 %v4072_v10  ;;  %v4049_v8 = vsel %vm1460_vm2, %v10169_v20, %v8928_v5 }
 0x3a2   : > { %v4028_v25 = vpop.permute.xlu1 %4027  ;;  %7103 = vmatprep.subr.mxu1 %v10175_v46  ;;  %7100 = vmatprep.mubr.msk.f32.mxu0 %vm7310_vm0, %v10175_v46  ;;  %v3443_v52 = vand.u32 3, %v3442_v41 }
 0x3a3   : > { %7108 = vmatprep.subr.mxu0 %v10175_v46  ;;  %v4048_v59 = vsel %vm1460_vm2, %v10171_v16, %v4028_v25  ;;  %v4064_v34 = vsel %vm1460_vm2, %v4056_v15, %v4028_v25  ;;  %v4020_v16 = vrot.slane %v10182_v21, 4 }
 0x3a4   : > { %v4073_v24 = vsel %vm4069_vm6, %v4048_v59, %v4064_v34  ;;  %vm3445_vm7 = vcmp.eq.s32.totalorder %v3443_v52, 0  ;;  %vm3448_vm4 = vcmp.eq.s32.totalorder %v3443_v52, 2  ;;  %vm3444_vm3 = vcmp.lt.s32.totalorder %v3443_v52, 2 }
 0x3a5   : > { %v3447_v14 = vsel %vm3445_vm7, %v8394_v29, %v10183_v0  ;;  %v4065_v29 = vsel %vm1460_vm2, %v4057_v18, %v8928_v5  ;;  %v9045_v59 = vsub.s32 2, %v4672_v35 }
 0x3a6   : > { %v4032_v57 = vpop.permute.xlu1 %4031  ;;  %v4074_v43 = vsel %vm4069_vm6, %v4049_v8, %v4065_v29 }
 0x3a7   : > { %v4050_v5 = vsel %vm1460_vm2, %v10172_v3, %v4032_v57  ;;  %v4066_v55 = vsel %vm1460_vm2, %v4058_v44, %v4032_v57  ;;  %v9040_v57 = vsub.s32 1, %v4672_v35 }
 0x3a8   : > { %v4075_v49 = vsel %vm4069_vm6, %v4050_v5, %v4066_v55 }
 0x3aa   : > { %v3984_v22 = vpop.permute.xlu1 %3983 }
 0x3ab   : > { %v4006_v54 = vmul.f32 %v3984_v22, %v3348_v40 }
 0x3ac   : > { %v7298_v4 = vpop.eup %7297 }
 0x3ad   : > { %3995 = vrot.lane.b32.xlu1 %v7298_v4, %s7311_s14  ;;  %v4080_v53 = vsel %vm4078_vm5, %v8869_v32, %v4006_v54  ;;  %v3140_v45 = vmul.f32 %v7298_v4, %v3132_v2  ;;  %v3450_v32 = vsel %vm3448_vm4, %v10184_v63, %v8401_v9  ;;  %v9049_v4 = vsub.s32 3, %v4672_v35 }
 0x3ae   : > { %7096 = vmatmul.mubr.msk.f32.vlgmr.msra.gmra.mxu1 %vm1460_vm2, %v4080_v53  ;;  %v3451_v31 = vsel %vm3444_vm3, %v3447_v14, %v3450_v32 }
 0x3af   : > { %7104 = vmatpush3.msra.mxu1 %v4073_v24  ;;  %7105 = vmatprep.mubr.msk.f32.mxu1 %vm7310_vm0, %v10175_v46  ;;  %v3452_v33 = vsel %vm10185_vm9, nan, %v3451_v31 }
 0x3b0   : > { %7113 = vmatprep.subr.mxu1 %v10175_v46 }
 0x3b1   : > { %4035 = vrot.lane.b32.xlu1 %v4020_v16, %s7319_s16 }
 0x3b4   : > { %v3986_v60 = vpop.permute.xlu0 %3985 }
 0x3b5   : > { %v4007_v9 = vmul.f32 %v3986_v60, %v3452_v33 }
 0x3b7   : > { %v4081_v50 = vsel %vm4078_vm5, %v8878_v13, %v4007_v9 }
 0x3b8   : > { %7101 = vmatmul.mubr.msk.f32.vlgmr.msra.gmra.mxu0 %vm1460_vm2, %v4081_v50 }
 0x3b9   : > { %7109 = vmatpush3.msra.mxu0 %v4074_v43  ;;  %7110 = vmatprep.mubr.msk.f32.mxu0 %vm7310_vm0, %v10175_v46 }
 0x3ba   : > { %7118 = vmatprep.subr.mxu0 %v10175_v46 }
 0x3ce   : > { %v3988_v20 = vpop.permute.xlu1 %3987 }
 0x3cf   : > { %v4008_v13 = vmul.f32 %v3988_v20, %v8775_v23 }
 0x3d1   : > { %v4082_v12 = vsel %vm4078_vm5, %v8886_v42, %v4008_v13 }
 0x3d2   : > { %7106 = vmatmul.mubr.msk.f32.vlgmr.msra.gmra.mxu1 %vm1460_vm2, %v4082_v12 }
 0x3d3   : > { %7114 = vmatpush3.msra.mxu1 %v4075_v49  ;;  %7115 = vmatprep.mubr.msk.f32.mxu1 %vm7310_vm0, %v10175_v46 }
 0x3d4   : > { %7123 = vmatprep.subr.mxu1 %v10175_v46 }
 0x3e2   : > { %v3990_v62 = vpop.permute.xlu0 %3989 }
 0x3e3   : > { %v4009_v3 = vmul.f32 %v3990_v62, %v8791_v28  ;;  %v9073_v62 = vld [vmem:[%s9979_s4] sm:$0xff] }
 0x3e5   : > { %v4083_v7 = vsel %vm4078_vm5, %v8894_v36, %v4009_v3  ;;  %v4059_v36 = vsub.f32 0.0, %v10176_v51 }
 0x3e6   : > { %7111 = vmatmul.mubr.msk.f32.vlgmr.msra.gmra.mxu0 %vm1460_vm2, %v4083_v7 }
 0x3e7   : > { %7120 = vmatprep.mubr.msk.f32.mxu0 %vm7310_vm0, %v10175_v46 }
 0x3f7   : > { %v3992_v23 = vpop.permute.xlu1 %3991 }
 0x3f8   : > { %v4010_v42 = vmul.f32 %v3992_v23, %v8813_v11 }
 0x3fa   : > { %v4084_v38 = vsel %vm4078_vm5, %v8903_v26, %v4010_v42  ;;  %v5024_v42 = vld [vmem:[%s9980_s5 + $0x8] sm:$0xff] }
 0x3fb   : > { %7116 = vmatmul.mubr.msk.f32.vlgmr.msra.gmra.mxu1 %vm1460_vm2, %v4084_v38  ;;  %v5440_v38 = vld [vmem:[%s9981_s6 + $0x8] sm:$0xff] }
 0x3fc   : > { %7125 = vmatprep.mubr.msk.f32.mxu1 %vm7310_vm0, %v10175_v46  ;;  %vm5887_vm0 = vcmask 1041409  }
 0x406   : > { %v3994_v28 = vpop.permute.xlu0 %3993 }
 0x407   : > { %v4011_v48 = vmul.f32 %v3994_v28, %v8833_v37  ;;  %v4060_v37 = vsub.f32 0.0, %v10182_v21  ;;  %v5023_v28 = vld [vmem:[%s9980_s5] sm:$0xff] }
 0x409   : > { %v4085_v19 = vsel %vm4078_vm5, %v8915_v39, %v4011_v48 }
 0x40a   : > { %v4034_v56 = vpop.permute.xlu0 %4033 }
 0x40b   : > { %v4051_v11 = vsel %vm1460_vm2, %v10176_v51, %v4034_v56  ;;  %v4067_v1 = vsel %vm1460_vm2, %v4059_v36, %v4034_v56  ;;  %v5439_v36 = vld [vmem:[%s9981_s6] sm:$0xff] }
 0x40c   : > { %v4076_v26 = vsel %vm4069_vm6, %v4051_v11, %v4067_v1 }
 0x40d   : > { %7119 = vmatpush3.msra.mxu0 %v4076_v26 }
 0x40e   : > { %7121 = vmatmul.mubr.msk.f32.vlgmr.msra.gmra.mxu0 %vm1460_vm2, %v4085_v19 }
 0x40f   : > { %7130 = vmatprep.mubr.msk.f32.mxu0 %vm1460_vm2, %v9073_v62 }
 0x41f   : > { %v3996_v46 = vpop.permute.xlu1 %3995 }
 0x420   : > { %v4012_v58 = vmul.f32 %v3996_v46, %v8849_v61 }
 0x422   : > { %v4086_v25 = vsel %vm4078_vm5, %v3140_v45, %v4012_v58  ;;  %v5026_v58 = vld [vmem:[%s9980_s5 + $0x18] sm:$0xff]  ;;  %vm5958_vm5 = vcmask 1047559  }
 0x423   : > { %v4036_v27 = vpop.permute.xlu1 %4035 }
 0x424   : > { %v4052_v39 = vsel %vm1460_vm2, %v10182_v21, %v4036_v27  ;;  %v4068_v51 = vsel %vm1460_vm2, %v4060_v37, %v4036_v27  ;;  %v5442_v37 = vld [vmem:[%s9981_s6 + $0x18] sm:$0xff] }
 0x425   : > { %v4077_v30 = vsel %vm4069_vm6, %v4052_v39, %v4068_v51 }
 0x426   : > { %7124 = vmatpush3.msra.mxu1 %v4077_v30  ;;  %v5441_v30 = vld [vmem:[%s9981_s6 + $0x10] sm:$0xff] }
 0x427   : > { %7126 = vmatmul.mubr.msk.f32.vlgmr.msra.gmra.mxu1 %vm1460_vm2, %v4086_v25  ;;  %v5025_v25 = vld [vmem:[%s9980_s5 + $0x10] sm:$0xff] }
 0x428   : > { %7135 = vmatprep.mubr.msk.f32.mxu1 %vm1460_vm2, %v9073_v62 }
 0x460   : > { %v4156_v61 = vpop.f32.mrf.mxu0 }
 0x461   : > { %v4674_v10 = vrot.slane %v4156_v61, %v9037_v6  ;;  %v4685_v17 = vrot.slane %v4156_v61, %v9040_v57  ;;  %v4696_v34 = vrot.slane %v4156_v61, %v9045_v59  ;;  %v4707_v45 = vrot.slane %v4156_v61, %v9049_v4 }
 0x462   : > { %v7092_v41 = vpop.f32.mrf.mxu0 }
 0x463   : > { %4680 = vbcast.lane.b32.xlu1 %v4674_v10, 264  ;;  %4676 = vbcast.lane.b32.xlu0 %v4674_v10, 256 }
 0x467   : > { %4691 = vbcast.lane.b32.xlu1 %v4685_v17, 264  ;;  %4687 = vbcast.lane.b32.xlu0 %v4685_v17, 256 }
 0x46e   : > { %v4229_v15 = vpop.f32.mrf.mxu1 }
 0x46f   : > { %v4718_v40 = vrot.slane %v4229_v15, %v9037_v6  ;;  %v4729_v52 = vrot.slane %v4229_v15, %v9040_v57  ;;  %v4740_v2 = vrot.slane %v4229_v15, %v9045_v59  ;;  %v4751_v24 = vrot.slane %v4229_v15, %v9049_v4 }
 0x470   : > { %v7097_v22 = vpop.f32.mrf.mxu1 }
 0x471   : > { %4724 = vbcast.lane.b32.xlu1 %v4718_v40, 264  ;;  %4720 = vbcast.lane.b32.xlu0 %v4718_v40, 256 }
 0x475   : > { %4735 = vbcast.lane.b32.xlu1 %v4729_v52, 264  ;;  %4731 = vbcast.lane.b32.xlu0 %v4729_v52, 256 }
 0x478   : > { %v4302_v54 = vpop.f32.mrf.mxu0 }
 0x479   : > { %4702 = vbcast.lane.b32.xlu1 %v4696_v34, 264  ;;  %4698 = vbcast.lane.b32.xlu0 %v4696_v34, 256  ;;  %v4762_v21 = vrot.slane %v4302_v54, %v9037_v6  ;;  %v4773_v16 = vrot.slane %v4302_v54, %v9040_v57  ;;  %v4784_v31 = vrot.slane %v4302_v54, %v9045_v59 }
 0x47a   : > { %v7102_v53 = vpop.f32.mrf.mxu0  ;;  %v4795_v33 = vrot.slane %v4302_v54, %v9049_v4 }
 0x47d   : > { %4746 = vbcast.lane.b32.xlu1 %v4740_v2, 264  ;;  %4742 = vbcast.lane.b32.xlu0 %v4740_v2, 256 }
 0x481   : > { %4713 = vbcast.lane.b32.xlu1 %v4707_v45, 264  ;;  %4709 = vbcast.lane.b32.xlu0 %v4707_v45, 256 }
 0x485   : > { %4757 = vbcast.lane.b32.xlu1 %v4751_v24, 264  ;;  %4753 = vbcast.lane.b32.xlu0 %v4751_v24, 256  ;;  %v5032_v24 = vld [vmem:[%s9980_s5 + $0x48] sm:$0xff] }
 0x489   : > { %4768 = vbcast.lane.b32.xlu1 %v4762_v21, 264  ;;  %4764 = vbcast.lane.b32.xlu0 %v4762_v21, 256  ;;  %v5448_v21 = vld [vmem:[%s9981_s6 + $0x48] sm:$0xff] }
 0x48d   : > { %4779 = vbcast.lane.b32.xlu1 %v4773_v16, 264  ;;  %4775 = vbcast.lane.b32.xlu0 %v4773_v16, 256 }
 0x492   : > { %v4375_v0 = vpop.f32.mrf.mxu1 }
 0x493   : > { %v4806_v14 = vrot.slane %v4375_v0, %v9037_v6  ;;  %v4817_v32 = vrot.slane %v4375_v0, %v9040_v57  ;;  %v4828_v18 = vrot.slane %v4375_v0, %v9045_v59  ;;  %v4839_v8 = vrot.slane %v4375_v0, %v9049_v4 }
 0x494   : > { %v7107_v63 = vpop.f32.mrf.mxu1 }
 0x495   : > { %4812 = vbcast.lane.b32.xlu1 %v4806_v14, 264  ;;  %4808 = vbcast.lane.b32.xlu0 %v4806_v14, 256  ;;  %v5031_v63 = vld [vmem:[%s9980_s5 + $0x40] sm:$0xff] }
 0x499   : > { %4823 = vbcast.lane.b32.xlu1 %v4817_v32, 264  ;;  %4819 = vbcast.lane.b32.xlu0 %v4817_v32, 256  ;;  %v5447_v32 = vld [vmem:[%s9981_s6 + $0x40] sm:$0xff] }
 0x49d   : > { %4790 = vbcast.lane.b32.xlu1 %v4784_v31, 264  ;;  %4786 = vbcast.lane.b32.xlu0 %v4784_v31, 256 }
 0x4a1   : > { %4834 = vbcast.lane.b32.xlu1 %v4828_v18, 264  ;;  %4830 = vbcast.lane.b32.xlu0 %v4828_v18, 256 }
 0x4a5   : > { %4801 = vbcast.lane.b32.xlu1 %v4795_v33, 264  ;;  %4797 = vbcast.lane.b32.xlu0 %v4795_v33, 256 }
 0x4a6   : > { %v4448_v60 = vpop.f32.mrf.mxu0 }
 0x4a7   : > { %v4850_v9 = vrot.slane %v4448_v60, %v9037_v6  ;;  %v4861_v50 = vrot.slane %v4448_v60, %v9040_v57  ;;  %v4872_v55 = vrot.slane %v4448_v60, %v9045_v59  ;;  %v4883_v12 = vrot.slane %v4448_v60, %v9049_v4 }
 0x4a8   : > { %v7112_v29 = vpop.f32.mrf.mxu0 }
 0x4a9   : > { %4845 = vbcast.lane.b32.xlu1 %v4839_v8, 264  ;;  %4841 = vbcast.lane.b32.xlu0 %v4839_v8, 256 }
 0x4ad   : > { %4856 = vbcast.lane.b32.xlu1 %v4850_v9, 264  ;;  %4852 = vbcast.lane.b32.xlu0 %v4850_v9, 256 }
 0x4b1   : > { %4867 = vbcast.lane.b32.xlu1 %v4861_v50, 264  ;;  %4863 = vbcast.lane.b32.xlu0 %v4861_v50, 256 }
 0x4bb   : > { %v4521_v43 = vpop.f32.mrf.mxu1 }
 0x4bc   : > { %v4894_v44 = vrot.slane %v4521_v43, %v9037_v6  ;;  %v4905_v5 = vrot.slane %v4521_v43, %v9040_v57  ;;  %v4916_v13 = vrot.slane %v4521_v43, %v9045_v59  ;;  %v4927_v7 = vrot.slane %v4521_v43, %v9049_v4 }
 0x4bd   : > { %v7117_v20 = vpop.f32.mrf.mxu1 }
 0x4be   : > { %4900 = vbcast.lane.b32.xlu1 %v4894_v44, 264  ;;  %4896 = vbcast.lane.b32.xlu0 %v4894_v44, 256 }
 0x4c2   : > { %4911 = vbcast.lane.b32.xlu1 %v4905_v5, 264  ;;  %4907 = vbcast.lane.b32.xlu0 %v4905_v5, 256 }
 0x4c6   : > { %4878 = vbcast.lane.b32.xlu1 %v4872_v55, 264  ;;  %4874 = vbcast.lane.b32.xlu0 %v4872_v55, 256 }
 0x4ca   : > { %4922 = vbcast.lane.b32.xlu1 %v4916_v13, 264  ;;  %4918 = vbcast.lane.b32.xlu0 %v4916_v13, 256 }
 0x4ce   : > { %v9068_v49 = vpop.f32.mrf.mxu0  ;;  %4889 = vbcast.lane.b32.xlu1 %v4883_v12, 264  ;;  %4885 = vbcast.lane.b32.xlu0 %v4883_v12, 256 }
 0x4cf   : > { %v4938_v23 = vrot.slane %v9068_v49, %v9037_v6  ;;  %v4949_v48 = vrot.slane %v9068_v49, %v9040_v57 }
 0x4d0   : > { %v7122_v3 = vpop.f32.mrf.mxu0 }
 0x4d2   : > { %4933 = vbcast.lane.b32.xlu1 %v4927_v7, 264  ;;  %4929 = vbcast.lane.b32.xlu0 %v4927_v7, 256 }
 0x4d5   : > { %v4681_v19 = vpop.permute.xlu1 %4680  ;;  %v4677_v56 = vpop.permute.xlu0 %4676 }
 0x4d6   : > { %4944 = vbcast.lane.b32.xlu1 %v4938_v23, 264  ;;  %4940 = vbcast.lane.b32.xlu0 %v4938_v23, 256  ;;  %v5088_v11 = vmul.f32 %v5024_v42, %v4681_v19  ;;  %v5504_v1 = vmul.f32 %v5440_v38, %v4681_v19  ;;  %v5087_v26 = vmul.f32 %v5023_v28, %v4677_v56  ;;  %v5034_v42 = vld [vmem:[%s9980_s5 + $0x58] sm:$0xff]  ;;  %v5033_v19 = vld [vmem:[%s9980_s5 + $0x50] sm:$0xff] }
 0x4d7   : > { %v5503_v46 = vmul.f32 %v5439_v36, %v4677_v56  ;;  %v5450_v36 = vld [vmem:[%s9981_s6 + $0x58] sm:$0xff]  ;;  %v5449_v56 = vld [vmem:[%s9981_s6 + $0x50] sm:$0xff] }
 0x4d8   : > { %v5152_v27 = vsel %vm1460_vm2, %v5088_v11, 0.0  ;;  %v5568_v39 = vsel %vm1460_vm2, %v5504_v1, 0.0  ;;  %v5151_v51 = vsel %vm1460_vm2, %v5087_v26, 0.0 }
 0x4d9   : > { %v5153_v47 = vadd.f32 %v5152_v27, %v5151_v51  ;;  %v5567_v35 = vsel %vm1460_vm2, %v5503_v46, 0.0  ;;  %v4692_v61 = vpop.permute.xlu1 %4691  ;;  %v4688_v10 = vpop.permute.xlu0 %4687 }
 0x4da   : > { %4955 = vbcast.lane.b32.xlu1 %v4949_v48, 264  ;;  %4951 = vbcast.lane.b32.xlu0 %v4949_v48, 256  ;;  %v5569_v41 = vadd.f32 %v5568_v39, %v5567_v35  ;;  %v5090_v17 = vmul.f32 %v5026_v58, %v4692_v61  ;;  %v5506_v15 = vmul.f32 %v5442_v37, %v4692_v61 }
 0x4db   : > { %v5089_v40 = vmul.f32 %v5025_v25, %v4688_v10  ;;  %v5154_v22 = vrot.slane %v5153_v47, 4  ;;  %v5505_v52 = vmul.f32 %v5441_v30, %v4688_v10  ;;  %v4960_v61 = vrot.slane %v9068_v49, %v9045_v59 }
 0x4dc   : > { %v5570_v34 = vrot.slane %v5569_v41, 4  ;;  %v5161_v54 = vsel %vm1460_vm2, %v5090_v17, 0.0  ;;  %v5577_v2 = vsel %vm1460_vm2, %v5506_v15, 0.0  ;;  %v5444_v15 = vld [vmem:[%s9981_s6 + $0x28] sm:$0xff] }
 0x4dd   : > { %v5160_v53 = vsel %vm1460_vm2, %v5089_v40, 0.0  ;;  %v5576_v45 = vsel %vm1460_vm2, %v5505_v52, 0.0  ;;  %v5155_v16 = vadd.f32 %v5154_v22, %v5153_v47  ;;  %v5028_v47 = vld [vmem:[%s9980_s5 + $0x28] sm:$0xff]  ;;  %v5443_v40 = vld [vmem:[%s9981_s6 + $0x20] sm:$0xff] }
 0x4de   : > { %v5571_v0 = vadd.f32 %v5570_v34, %v5569_v41  ;;  %v5162_v14 = vadd.f32 %v5161_v54, %v5160_v53  ;;  %v5578_v31 = vadd.f32 %v5577_v2, %v5576_v45 }
 0x4df   : > { %v5156_v50 = vrot.slane %v5155_v16, 2 }
 0x4e0   : > { %v5572_v43 = vrot.slane %v5571_v0, 2  ;;  %v5163_v44 = vrot.slane %v5162_v14, 4  ;;  %v5579_v55 = vrot.slane %v5578_v31, 4 }
 0x4e2   : > { %v5164_v11 = vadd.f32 %v5163_v44, %v5162_v14  ;;  %v5573_v26 = vadd.f32 %v5572_v43, %v5571_v0  ;;  %v5580_v46 = vadd.f32 %v5579_v55, %v5578_v31  ;;  %v4971_v31 = vrot.slane %v9068_v49, %v9049_v4  ;;  %v5036_v43 = vld [vmem:[%s9980_s5 + $0x68] sm:$0xff] }
 0x4e3   : > { %v4725_v18 = vpop.permute.xlu1 %4724  ;;  %v4721_v33 = vpop.permute.xlu0 %4720 }
 0x4e4   : > { %v5096_v60 = vmul.f32 %v5032_v24, %v4725_v18  ;;  %v5512_v8 = vmul.f32 %v5448_v21, %v4725_v18  ;;  %v5095_v29 = vmul.f32 %v5031_v63, %v4721_v33  ;;  %v5511_v9 = vmul.f32 %v5447_v32, %v4721_v33 }
 0x4e5   : > { %v5165_v22 = vrot.slane %v5164_v11, 2  ;;  %v5581_v53 = vrot.slane %v5580_v46, 2 }
 0x4e6   : > { %v5188_v20 = vsel %vm1460_vm2, %v5096_v60, 0.0  ;;  %v5604_v13 = vsel %vm1460_vm2, %v5512_v8, 0.0  ;;  %v5187_v12 = vsel %vm1460_vm2, %v5095_v29, 0.0  ;;  %v5603_v3 = vsel %vm1460_vm2, %v5511_v9, 0.0 }
 0x4e7   : > { %v9129_v5 = vpop.f32.mrf.mxu1  ;;  %v4736_v7 = vpop.permute.xlu1 %4735  ;;  %v5189_v48 = vadd.f32 %v5188_v20, %v5187_v12  ;;  %v5605_v1 = vadd.f32 %v5604_v13, %v5603_v3  ;;  %v5166_v8 = vadd.f32 %v5165_v22, %v5164_v11  ;;  %v5582_v44 = vadd.f32 %v5581_v53, %v5580_v46  ;;  %v5452_v13 = vld [vmem:[%s9981_s6 + $0x68] sm:$0xff]  ;;  %v5030_v11 = vld [vmem:[%s9980_s5 + $0x38] sm:$0xff]  ;;  %v5445_v22 = vld [vmem:[%s9981_s6 + $0x30] sm:$0xff] }
 0x4e8   : > { %v4982_v23 = vrot.slane %v9129_v5, %v9037_v6  ;;  %v4732_v38 = vpop.permute.xlu0 %4731  ;;  %v5157_v6 = vadd.f32 %v5156_v50, %v5155_v16  ;;  %v5098_v37 = vmul.f32 %v5034_v42, %v4736_v7  ;;  %v4993_v27 = vrot.slane %v9129_v5, %v9040_v57  ;;  %v5027_v57 = vld [vmem:[%s9980_s5 + $0x20] sm:$0xff] }
 0x4e9   : > { %v7127_v28 = vpop.f32.mrf.mxu1  ;;  %v5190_v58 = vrot.slane %v5189_v48, 4  ;;  %v5514_v39 = vmul.f32 %v5450_v36, %v4736_v7  ;;  %v5097_v51 = vmul.f32 %v5033_v19, %v4732_v38  ;;  %v5513_v30 = vmul.f32 %v5449_v56, %v4732_v38  ;;  %v5035_v38 = vld [vmem:[%s9980_s5 + $0x60] sm:$0xff] }
 0x4ea   : > { %4988 = vbcast.lane.b32.xlu1 %v4982_v23, 264  ;;  %4984 = vbcast.lane.b32.xlu0 %v4982_v23, 256  ;;  %v5606_v41 = vrot.slane %v5605_v1, 4  ;;  %v5197_v17 = vsel %vm1460_vm2, %v5098_v37, 0.0  ;;  %v5158_v2 = vrot.slane %v5157_v6, 1  ;;  %v5574_v16 = vrot.slane %v5573_v26, 1 }
 0x4eb   : > { %v4703_v25 = vpop.permute.xlu1 %4702  ;;  %v5191_v10 = vadd.f32 %v5190_v58, %v5189_v48  ;;  %v5613_v52 = vsel %vm1460_vm2, %v5514_v39, 0.0  ;;  %v5196_v34 = vsel %vm1460_vm2, %v5097_v51, 0.0  ;;  %v5612_v54 = vsel %vm1460_vm2, %v5513_v30, 0.0  ;;  %v5446_v58 = vld [vmem:[%s9981_s6 + $0x38] sm:$0xff] }
 0x4ec   : > { %v4699_v35 = vpop.permute.xlu0 %4698  ;;  %v5198_v45 = vadd.f32 %v5197_v17, %v5196_v34  ;;  %v5614_v24 = vadd.f32 %v5613_v52, %v5612_v54  ;;  %v5092_v0 = vmul.f32 %v5028_v47, %v4703_v25  ;;  %v5508_v14 = vmul.f32 %v5444_v15, %v4703_v25 }
 0x4ed   : > { %v5091_v63 = vmul.f32 %v5027_v57, %v4699_v35  ;;  %v5192_v18 = vrot.slane %v5191_v10, 2  ;;  %v5607_v33 = vadd.f32 %v5606_v41, %v5605_v1  ;;  %v5507_v60 = vmul.f32 %v5443_v40, %v4699_v35  ;;  %v5029_v40 = vld [vmem:[%s9980_s5 + $0x30] sm:$0xff] }
 0x4ee   : > { %4999 = vbcast.lane.b32.xlu1 %v4993_v27, 264  ;;  %4995 = vbcast.lane.b32.xlu0 %v4993_v27, 256  ;;  %v5199_v29 = vrot.slane %v5198_v45, 4  ;;  %v5170_v9 = vsel %vm1460_vm2, %v5092_v0, 0.0  ;;  %v5615_v20 = vrot.slane %v5614_v24, 4  ;;  %v5586_v55 = vsel %vm1460_vm2, %v5508_v14, 0.0 }
 0x4ef   : > { %v4747_v21 = vpop.permute.xlu1 %4746  ;;  %v5169_v50 = vsel %vm1460_vm2, %v5091_v63, 0.0  ;;  %v9179_v3 = vadd.f32 %v5158_v2, %v5157_v6  ;;  %v9181_v7 = vadd.f32 %v5574_v16, %v5573_v26  ;;  %v5004_v23 = vrot.slane %v9129_v5, %v9045_v59  ;;  %v5451_v6 = vld [vmem:[%s9981_s6 + $0x60] sm:$0xff]  ;;  %v5454_v63 = vld [vmem:[%s9981_s6 + $0x78] sm:$0xff] }
 0x4f0   : > { %v4743_v32 = vpop.permute.xlu0 %4742  ;;  %v5171_v49 = vadd.f32 %v5170_v9, %v5169_v50  ;;  %v5585_v42 = vsel %vm1460_vm2, %v5507_v60, 0.0  ;;  %v5193_v48 = vadd.f32 %v5192_v18, %v5191_v10  ;;  %v5608_v36 = vrot.slane %v5607_v33, 2 }
 0x4f1   : > { %v5100_v56 = vmul.f32 %v5036_v43, %v4747_v21  ;;  %v5167_v59 = vrot.slane %v5166_v8, 1  ;;  %v5200_v1 = vadd.f32 %v5199_v29, %v5198_v45  ;;  %v5587_v26 = vadd.f32 %v5586_v55, %v5585_v42  ;;  %v5037_v43 = vld [vmem:[%s9980_s5 + $0x70] sm:$0xff] }
 0x4f2   : > { %4966 = vbcast.lane.b32.xlu1 %v4960_v61, 264  ;;  %4962 = vbcast.lane.b32.xlu0 %v4960_v61, 256  ;;  %v5172_v19 = vrot.slane %v5171_v49, 4  ;;  %v5516_v46 = vmul.f32 %v5452_v13, %v4747_v21  ;;  %v5583_v37 = vrot.slane %v5582_v44, 1  ;;  %v5616_v25 = vadd.f32 %v5615_v20, %v5614_v24  ;;  %v5038_v24 = vld [vmem:[%s9980_s5 + $0x78] sm:$0xff] }
 0x4f3   : > { %v4714_v12 = vpop.permute.xlu1 %4713  ;;  %v5099_v39 = vmul.f32 %v5035_v38, %v4743_v32  ;;  %v5015_v30 = vrot.slane %v9129_v5, %v9049_v4  ;;  %v5588_v47 = vrot.slane %v5587_v26, 4  ;;  %v5515_v35 = vmul.f32 %v5451_v6, %v4743_v32 }
 0x4f4   : > { %v4710_v28 = vpop.permute.xlu0 %4709  ;;  %v5173_v27 = vadd.f32 %v5172_v19, %v5171_v49  ;;  %v5094_v61 = vmul.f32 %v5030_v11, %v4714_v12  ;;  %v5609_v41 = vadd.f32 %v5608_v36, %v5607_v33  ;;  %v5206_v17 = vsel %vm1460_vm2, %v5100_v56, 0.0  ;;  %v5456_v36 = vld [vmem:[%s9981_s6 + $0x88] sm:$0xff] }
 0x4f5   : > { %v5205_v15 = vsel %vm1460_vm2, %v5099_v39, 0.0  ;;  %v5510_v57 = vmul.f32 %v5446_v58, %v4714_v12  ;;  %v5194_v4 = vrot.slane %v5193_v48, 1  ;;  %v5201_v5 = vrot.slane %v5200_v1, 2 }
 0x4f6   : > { %5010 = vbcast.lane.b32.xlu1 %v5004_v23, 264  ;;  %5006 = vbcast.lane.b32.xlu0 %v5004_v23, 256  ;;  %v5622_v52 = vsel %vm1460_vm2, %v5516_v46, 0.0  ;;  %v5621_v34 = vsel %vm1460_vm2, %v5515_v35, 0.0  ;;  %v9210_v54 = vadd.f32 %v5167_v59, %v5166_v8  ;;  %v9212_v2 = vadd.f32 %v5583_v37, %v5582_v44  ;;  %v5453_v44 = vld [vmem:[%s9981_s6 + $0x70] sm:$0xff]  ;;  %v5040_v23 = vld [vmem:[%s9980_s5 + $0x88] sm:$0xff] }
 0x4f7   : > { %v4758_v51 = vpop.permute.xlu1 %4757  ;;  %v5617_v53 = vrot.slane %v5616_v25, 2  ;;  %v5174_v45 = vrot.slane %v5173_v27, 2  ;;  %v5589_v21 = vadd.f32 %v5588_v47, %v5587_v26  ;;  %v5207_v16 = vadd.f32 %v5206_v17, %v5205_v15  ;;  %v5458_v17 = vld [vmem:[%s9981_s6 + $0x98] sm:$0xff] }
 0x4f8   : > { %v4754_v10 = vpop.permute.xlu0 %4753  ;;  %v5179_v0 = vsel %vm1460_vm2, %v5094_v61, 0.0  ;;  %v5093_v14 = vmul.f32 %v5029_v40, %v4710_v28  ;;  %v5623_v18 = vadd.f32 %v5622_v52, %v5621_v34  ;;  %v5595_v33 = vsel %vm1460_vm2, %v5510_v57, 0.0 }
 0x4f9   : > { %v5509_v60 = vmul.f32 %v5445_v22, %v4710_v28  ;;  %v9222_v8 = vadd.f32 %v5194_v4, %v5193_v48  ;;  %v9224_v29 = vadd.f32 %v5201_v5, %v5200_v1  ;;  %v5102_v50 = vmul.f32 %v5038_v24, %v4758_v51 }
 0x4fa   : > { %4977 = vbcast.lane.b32.xlu1 %v4971_v31, 264  ;;  %4973 = vbcast.lane.b32.xlu0 %v4971_v31, 256  ;;  %v5610_v31 = vrot.slane %v5609_v41, 1  ;;  %v5178_v9 = vsel %vm1460_vm2, %v5093_v14, 0.0  ;;  %v9233_v55 = vadd.f32 %v5617_v53, %v5616_v25  ;;  %v5518_v12 = vmul.f32 %v5454_v63, %v4758_v51  ;;  %v5039_v51 = vld [vmem:[%s9980_s5 + $0x80] sm:$0xff] }
 0x4fb   : > { %v4769_v32 = vpop.permute.xlu1 %4768  ;;  %v5180_v49 = vadd.f32 %v5179_v0, %v5178_v9  ;;  %v5594_v13 = vsel %vm1460_vm2, %v5509_v60, 0.0  ;;  %v9239_v42 = vadd.f32 %v5174_v45, %v5173_v27  ;;  %v5590_v38 = vrot.slane %v5589_v21, 2  ;;  %v5041_v0 = vld [vmem:[%s9980_s5 + $0x90] sm:$0xff] }
 0x4fc   : > { %v4765_v20 = vpop.permute.xlu0 %4764  ;;  %v5208_v28 = vrot.slane %v5207_v16, 4  ;;  %v5596_v48 = vadd.f32 %v5595_v33, %v5594_v13  ;;  %v5624_v19 = vrot.slane %v5623_v18, 4  ;;  %v5101_v6 = vmul.f32 %v5037_v43, %v4754_v10 }
 0x4fd   : > { %v5181_v56 = vrot.slane %v5180_v49, 4  ;;  %v5517_v11 = vmul.f32 %v5453_v44, %v4754_v10  ;;  %v9244_v59 = vadd.f32 %v5610_v31, %v5609_v41  ;;  %v5215_v26 = vsel %vm1460_vm2, %v5102_v50, 0.0  ;;  %v5455_v10 = vld [vmem:[%s9981_s6 + $0x80] sm:$0xff]  ;;  %v5042_v41 = vld [vmem:[%s9980_s5 + $0x98] sm:$0xff]  ;;  %v5048_v44 = vld [vmem:[%s9980_s5 + $0xc8] sm:$0xff] }
 0x4fe   : > { %5021 = vbcast.lane.b32.xlu1 %v5015_v30, 264  ;;  %5017 = vbcast.lane.b32.xlu0 %v5015_v30, 256  ;;  %v5597_v1 = vrot.slane %v5596_v48, 4  ;;  %v5104_v46 = vmul.f32 %v5040_v23, %v4769_v32  ;;  %v5631_v37 = vsel %vm1460_vm2, %v5518_v12, 0.0  ;;  %v5214_v25 = vsel %vm1460_vm2, %v5101_v6, 0.0  ;;  %v5464_v23 = vld [vmem:[%s9981_s6 + $0xc8] sm:$0xff] }
 0x4ff   : > { %v4780_v58 = vpop.permute.xlu1 %4779  ;;  %v5630_v27 = vsel %vm1460_vm2, %v5517_v11, 0.0  ;;  %v5520_v39 = vmul.f32 %v5456_v36, %v4769_v32  ;;  %v5203_v30 = vrot.slane %v9224_v29, 1  ;;  %v9254_v47 = vadd.f32 %v5590_v38, %v5589_v21 }
 0x500   : > { %v5209_v35 = vadd.f32 %v5208_v28, %v5207_v16  ;;  %v5182_v61 = vadd.f32 %v5181_v56, %v5180_v49  ;;  %v4776_v15 = vpop.permute.xlu0 %4775  ;;  %v5619_v57 = vrot.slane %v9233_v55, 1  ;;  %v5176_v40 = vrot.slane %v9239_v42, 1  ;;  %v5047_v56 = vld [vmem:[%s9980_s5 + $0xc0] sm:$0xff] }
 0x501   : > { %v5625_v22 = vadd.f32 %v5624_v19, %v5623_v18  ;;  %v5598_v4 = vadd.f32 %v5597_v1, %v5596_v48  ;;  %v5216_v5 = vadd.f32 %v5215_v26, %v5214_v25  ;;  %v5632_v52 = vadd.f32 %v5631_v37, %v5630_v27  ;;  %v5457_v18 = vld [vmem:[%s9981_s6 + $0x90] sm:$0xff] }
 0x502   : > { %v5224_v34 = vsel %vm1460_vm2, %v5104_v46, 0.0  ;;  %v5103_v53 = vmul.f32 %v5039_v51, %v4765_v20  ;;  %v5640_v45 = vsel %vm1460_vm2, %v5520_v39, 0.0  ;;  %v5519_v24 = vmul.f32 %v5455_v10, %v4765_v20  ;;  %v5463_v46 = vld [vmem:[%s9981_s6 + $0xc0] sm:$0xff] }
 0x503   : > { %v5106_v21 = vmul.f32 %v5042_v41, %v4780_v58  ;;  %v5522_v16 = vmul.f32 %v5458_v17, %v4780_v58  ;;  %v5592_v14 = vrot.slane %v9254_v47, 1  ;;  %v5210_v63 = vrot.slane %v5209_v35, 2 }
 0x504   : > { %v5183_v32 = vrot.slane %v5182_v61, 2  ;;  %v5223_v31 = vsel %vm1460_vm2, %v5103_v53, 0.0  ;;  %v5626_v60 = vrot.slane %v5625_v22, 2  ;;  %v5599_v9 = vrot.slane %v5598_v4, 2 }
 0x505   : > { %v5225_v50 = vadd.f32 %v5224_v34, %v5223_v31  ;;  %v5639_v43 = vsel %vm1460_vm2, %v5519_v24, 0.0  ;;  %v5217_v20 = vrot.slane %v5216_v5, 4  ;;  %v5233_v13 = vsel %vm1460_vm2, %v5106_v21, 0.0 }
 0x506   : > { %v5641_v49 = vadd.f32 %v5640_v45, %v5639_v43  ;;  %v5105_v12 = vmul.f32 %v5041_v0, %v4776_v15  ;;  %v5633_v28 = vrot.slane %v5632_v52, 4  ;;  %v5649_v36 = vsel %vm1460_vm2, %v5522_v16, 0.0 }
 0x507   : > { %v4813_v33 = vpop.permute.xlu1 %4812  ;;  %v4809_v38 = vpop.permute.xlu0 %4808  ;;  %v5226_v48 = vrot.slane %v5225_v50, 4  ;;  %v5521_v19 = vmul.f32 %v5457_v18, %v4776_v15  ;;  %v5184_v6 = vadd.f32 %v5183_v32, %v5182_v61  ;;  %v9294_v39 = vadd.f32 %v5210_v63, %v5209_v35 }
 0x508   : > { %v5642_v11 = vrot.slane %v5641_v49, 4  ;;  %v5232_v1 = vsel %vm1460_vm2, %v5105_v12, 0.0  ;;  %v5112_v26 = vmul.f32 %v5048_v44, %v4813_v33  ;;  %v5528_v27 = vmul.f32 %v5464_v23, %v4813_v33 }
 0x509   : > { %v5227_v58 = vadd.f32 %v5226_v48, %v5225_v50  ;;  %v5234_v37 = vadd.f32 %v5233_v13, %v5232_v1  ;;  %v5648_v25 = vsel %vm1460_vm2, %v5521_v19, 0.0  ;;  %v5111_v10 = vmul.f32 %v5047_v56, %v4809_v38 }
 0x50a   : > { %v5643_v51 = vadd.f32 %v5642_v11, %v5641_v49  ;;  %v5650_v61 = vadd.f32 %v5649_v36, %v5648_v25  ;;  %v9296_v17 = vadd.f32 %v5626_v60, %v5625_v22  ;;  %v5218_v15 = vadd.f32 %v5217_v20, %v5216_v5  ;;  %v5466_v36 = vld [vmem:[%s9981_s6 + $0xd8] sm:$0xff]  ;;  %v5465_v11 = vld [vmem:[%s9981_s6 + $0xd0] sm:$0xff] }
 0x50b   : > { %v4824_v41 = vpop.permute.xlu1 %4823  ;;  %v5634_v34 = vadd.f32 %v5633_v28, %v5632_v52  ;;  %v5527_v53 = vmul.f32 %v5463_v46, %v4809_v38  ;;  %v5600_v45 = vadd.f32 %v5599_v9, %v5598_v4  ;;  %v5260_v24 = vsel %vm1460_vm2, %v5112_v26, 0.0  ;;  %v4820_v0 = vpop.permute.xlu0 %4819 }
 0x50c   : > { %v5259_v21 = vsel %vm1460_vm2, %v5111_v10, 0.0  ;;  %v5185_v16 = vrot.slane %v5184_v6, 1  ;;  %v5228_v32 = vrot.slane %v5227_v58, 2  ;;  %v5235_v35 = vrot.slane %v5234_v37, 4 }
 0x50d   : > { %v5676_v63 = vsel %vm1460_vm2, %v5528_v27, 0.0  ;;  %v5675_v31 = vsel %vm1460_vm2, %v5527_v53, 0.0  ;;  %v9305_v22 = vadd.f32 %v5203_v30, %v9224_v29  ;;  %v9310_v4 = vadd.f32 %v5619_v57, %v9233_v55 }
 0x50e   : > { %v5644_v5 = vrot.slane %v5643_v51, 2  ;;  %v5651_v52 = vrot.slane %v5650_v61, 4  ;;  %v5219_v18 = vrot.slane %v5218_v15, 2  ;;  %v5635_v33 = vrot.slane %v5634_v34, 2 }
 0x50f   : > { %v5261_v60 = vadd.f32 %v5260_v24, %v5259_v21  ;;  %v5177_v9 = vadd.f32 %v5176_v40, %v9239_v42  ;;  %v5677_v50 = vadd.f32 %v5676_v63, %v5675_v31  ;;  %v5186_v43 = vadd.f32 %v5185_v16, %v5184_v6  ;;  %v9318_v44 = vpop.permute.xlu1 %4790  ;;  %v5049_v6 = vld [vmem:[%s9980_s5 + $0xd0] sm:$0xff] }
 0x510   : > { %v5593_v29 = vadd.f32 %v5592_v14, %v9254_v47  ;;  %v5601_v30 = vrot.slane %v5600_v45, 1  ;;  %v5212_v55 = vrot.slane %v9294_v39, 1  ;;  %v5628_v57 = vrot.slane %v9296_v17, 1  ;;  %v5050_v47 = vld [vmem:[%s9980_s5 + $0xd8] sm:$0xff]  ;;  %v9332_v14 = vpop.permute.xlu0 %4786 }
 0x511   : > { %v5229_v20 = vadd.f32 %v5228_v32, %v5227_v58  ;;  %v5236_v49 = vadd.f32 %v5235_v35, %v5234_v37  ;;  %v9322_v13 = vadd.f32 %v5644_v5, %v5643_v51  ;;  %v9324_v12 = vadd.f32 %v5651_v52, %v5650_v61  ;;  %v9356_v51 = vld [vmem:[%s9979_s4 + $0x8] sm:$0xff] }
 0x512   : > { %v5602_v42 = vadd.f32 %v5601_v30, %v5600_v45  ;;  %v5888_v40 = vsel %vm5887_vm0, %v9210_v54, %v9179_v3  ;;  %v5220_v23 = vadd.f32 %v5219_v18, %v5218_v15  ;;  %v5262_v38 = vrot.slane %v5261_v60, 4  ;;  %v5460_v18 = vld [vmem:[%s9981_s6 + $0xa8] sm:$0xff] }
 0x513   : > { %v5890_v28 = vsel %vm5889_vm1, %v5177_v9, %v5888_v40  ;;  %v5955_v48 = vsel %vm5954_vm14, %v9212_v2, %v9181_v7  ;;  %v5636_v19 = vadd.f32 %v5635_v33, %v5634_v34  ;;  %v5678_v3 = vrot.slane %v5677_v50, 4  ;;  %v4835_v27 = vpop.permute.xlu1 %4834  ;;  %v5052_v40 = vld [vmem:[%s9980_s5 + $0xe8] sm:$0xff] }
 0x514   : > { %v5892_v54 = vsel %vm5891_vm15, %v5186_v43, %v5890_v28  ;;  %v5957_v56 = vsel %vm5956_vm10, %v5593_v29, %v5955_v48  ;;  %v5230_v1 = vrot.slane %v5229_v20, 1  ;;  %v5237_v7 = vrot.slane %v5236_v49, 2  ;;  %v4831_v16 = vpop.permute.xlu0 %4830  ;;  %v5043_v43 = vld [vmem:[%s9980_s5 + $0xa0] sm:$0xff] }
 0x515   : > { %v5959_v2 = vsel %vm5958_vm5, %v5602_v42, %v5957_v56  ;;  %v5114_v26 = vmul.f32 %v5050_v47, %v4824_v41  ;;  %v5646_v46 = vrot.slane %v9322_v13, 1  ;;  %v5653_v58 = vrot.slane %v9324_v12, 2 }
 0x516   : > { %v5989_v37 = vsel %vm4069_vm6, %v5892_v54, %v5959_v2  ;;  %v5530_v25 = vmul.f32 %v5466_v36, %v4824_v41  ;;  %v5263_v61 = vadd.f32 %v5262_v38, %v5261_v60  ;;  %v5113_v15 = vmul.f32 %v5049_v6, %v4820_v0  ;;  %v5044_v41 = vld [vmem:[%s9980_s5 + $0xa8] sm:$0xff] }
 0x517   : > { %7128 = vmatprep.subr.mxu0 %v5989_v37  ;;  %v5269_v10 = vsel %vm1460_vm2, %v5114_v26, 0.0  ;;  %v5529_v34 = vmul.f32 %v5465_v11, %v4820_v0  ;;  %v5679_v53 = vadd.f32 %v5678_v3, %v5677_v50  ;;  %v5213_v24 = vadd.f32 %v5212_v55, %v9294_v39  ;;  %v5051_v3 = vld [vmem:[%s9980_s5 + $0xe0] sm:$0xff]  ;;  %v5046_v11 = vld [vmem:[%s9980_s5 + $0xb8] sm:$0xff] }
 0x518   : > { %v5685_v45 = vsel %vm1460_vm2, %v5530_v25, 0.0  ;;  %7129 = vmatpush3.msra.mxu0 %v5989_v37  ;;  %v5221_v21 = vrot.slane %v5220_v23, 1  ;;  %v9364_v32 = vadd.f32 %v5230_v1, %v5229_v20  ;;  %v9366_v35 = vadd.f32 %v5237_v7, %v5236_v49  ;;  %v4802_v20 = vpop.permute.xlu1 %4801 }
 0x519   : > { %v5268_v63 = vsel %vm1460_vm2, %v5113_v15, 0.0  ;;  %v5684_v0 = vsel %vm1460_vm2, %v5529_v34, 0.0  ;;  %7131 = vmatmul.mubr.msk.f32.vlgmr.msra.gmra.mxu0 %vm1460_vm2, %v9356_v51  ;;  %v5629_v52 = vadd.f32 %v5628_v57, %v9296_v17  ;;  %v5264_v33 = vrot.slane %v5263_v61, 2  ;;  %v5459_v17 = vld [vmem:[%s9981_s6 + $0xa0] sm:$0xff] }
 0x51a   : > { %v5270_v31 = vadd.f32 %v5269_v10, %v5268_v63  ;;  %v5686_v5 = vadd.f32 %v5685_v45, %v5684_v0  ;;  %v5222_v39 = vadd.f32 %v5221_v21, %v5220_v23  ;;  %7140 = vmatprep.mubr.msk.f32.mxu0 %vm1460_vm2, %v9073_v62  ;;  %v5637_v60 = vrot.slane %v5636_v19, 1 }
 0x51b   : > { %v5893_v9 = vsel %vm5887_vm0, %v9305_v22, %v9222_v8  ;;  %v5108_v50 = vmul.f32 %v5044_v41, %v9318_v44  ;;  %v5680_v29 = vrot.slane %v5679_v53, 2  ;;  %v5960_v57 = vsel %vm5954_vm14, %v9310_v4, %v9244_v59  ;;  %v5468_v59 = vld [vmem:[%s9981_s6 + $0xe8] sm:$0xff]  ;;  %v4798_v4 = vpop.permute.xlu0 %4797 }
 0x51c   : > { %v5271_v30 = vrot.slane %v5270_v31, 4  ;;  %v5894_v55 = vsel %vm5889_vm1, %v5213_v24, %v5893_v9  ;;  %v5687_v8 = vrot.slane %v5686_v5, 4  ;;  %v5638_v22 = vadd.f32 %v5637_v60, %v5636_v19  ;;  %v4846_v10 = vpop.permute.xlu1 %4845  ;;  %v5054_v9 = vld [vmem:[%s9980_s5 + $0xf8] sm:$0xff] }
 0x51d   : > { %v5895_v49 = vsel %vm5891_vm15, %v5222_v39, %v5894_v55  ;;  %v5524_v42 = vmul.f32 %v5460_v18, %v9318_v44  ;;  %v5961_v47 = vsel %vm5956_vm10, %v5629_v52, %v5960_v57  ;;  %v5242_v23 = vsel %vm1460_vm2, %v5108_v50, 0.0  ;;  %v5461_v39 = vld [vmem:[%s9981_s6 + $0xb0] sm:$0xff] }
 0x51e   : > { %v5107_v38 = vmul.f32 %v5043_v43, %v9332_v14  ;;  %v5523_v28 = vmul.f32 %v5459_v17, %v9332_v14  ;;  %v9405_v48 = vadd.f32 %v5646_v46, %v9322_v13  ;;  %v5272_v44 = vadd.f32 %v5271_v30, %v5270_v31  ;;  %v5467_v13 = vld [vmem:[%s9981_s6 + $0xe0] sm:$0xff] }
 0x51f   : > { %v5962_v36 = vsel %vm5958_vm5, %v5638_v22, %v5961_v47  ;;  %v5658_v19 = vsel %vm1460_vm2, %v5524_v42, 0.0  ;;  %v5654_v54 = vadd.f32 %v5653_v58, %v9324_v12  ;;  %v5116_v6 = vmul.f32 %v5052_v40, %v4835_v27  ;;  %v5462_v12 = vld [vmem:[%s9981_s6 + $0xb8] sm:$0xff]  ;;  %v4842_v63 = vpop.permute.xlu0 %4841 }
 0x520   : > { %v5990_v14 = vsel %vm4069_vm6, %v5895_v49, %v5962_v36  ;;  %v5241_v56 = vsel %vm1460_vm2, %v5107_v38, 0.0  ;;  %v5265_v1 = vadd.f32 %v5264_v33, %v5263_v61  ;;  %v5657_v2 = vsel %vm1460_vm2, %v5523_v28, 0.0  ;;  %v5470_v28 = vld [vmem:[%s9981_s6 + $0xf8] sm:$0xff] }
 0x521   : > { %7133 = vmatprep.subr.mxu1 %v5990_v14  ;;  %v5243_v7 = vadd.f32 %v5242_v23, %v5241_v56  ;;  %v5532_v26 = vmul.f32 %v5468_v59, %v4835_v27  ;;  %v5681_v46 = vadd.f32 %v5680_v29, %v5679_v53  ;;  %v5688_v58 = vadd.f32 %v5687_v8, %v5686_v5  ;;  %v5045_v53 = vld [vmem:[%s9980_s5 + $0xb0] sm:$0xff] }
 0x522   : > { %v5659_v37 = vadd.f32 %v5658_v19, %v5657_v2  ;;  %7134 = vmatpush3.msra.mxu1 %v5990_v14  ;;  %v5115_v25 = vmul.f32 %v5051_v3, %v4831_v16  ;;  %v5273_v15 = vrot.slane %v5272_v44, 2  ;;  %v5531_v45 = vmul.f32 %v5467_v13, %v4831_v16  ;;  %v5469_v59 = vld [vmem:[%s9981_s6 + $0xf0] sm:$0xff]  ;;  %v5472_v14 = vld [vmem:[%s9981_s6 + $0x108] sm:$0xff] }
 0x523   : > { %v5244_v34 = vrot.slane %v5243_v7, 4  ;;  %v5110_v24 = vmul.f32 %v5046_v11, %v4802_v20  ;;  %7136 = vmatmul.mubr.msk.f32.vlgmr.msra.gmra.mxu1 %vm1460_vm2, %v9356_v51  ;;  %v5278_v27 = vsel %vm1460_vm2, %v5116_v6, 0.0  ;;  %v5526_v41 = vmul.f32 %v5462_v12, %v4802_v20  ;;  %v4857_v20 = vpop.permute.xlu1 %4856 }
 0x524   : > { %v5660_v61 = vrot.slane %v5659_v37, 4  ;;  %v5277_v21 = vsel %vm1460_vm2, %v5115_v25, 0.0  ;;  %7145 = vmatprep.mubr.msk.f32.mxu1 %vm1460_vm2, %v9073_v62  ;;  %v5239_v16 = vrot.slane %v9366_v35, 1  ;;  %v5655_v0 = vrot.slane %v5654_v54, 1  ;;  %v5055_v25 = vld [vmem:[%s9980_s5 + $0x100] sm:$0xff] }
 0x525   : > { %v5694_v31 = vsel %vm1460_vm2, %v5532_v26, 0.0  ;;  %v5693_v5 = vsel %vm1460_vm2, %v5531_v45, 0.0  ;;  %v5266_v52 = vrot.slane %v5265_v1, 1  ;;  %v5682_v18 = vrot.slane %v5681_v46, 1 }
 0x526   : > { %v5689_v33 = vrot.slane %v5688_v58, 2  ;;  %v5245_v60 = vadd.f32 %v5244_v34, %v5243_v7  ;;  %v5274_v62 = vadd.f32 %v5273_v15, %v5272_v44  ;;  %v5279_v50 = vadd.f32 %v5278_v27, %v5277_v21 }
 0x527   : > { %v5251_v43 = vsel %vm1460_vm2, %v5110_v24, 0.0  ;;  %v5109_v17 = vmul.f32 %v5045_v53, %v4798_v4  ;;  %v5661_v29 = vadd.f32 %v5660_v61, %v5659_v37  ;;  %v5695_v30 = vadd.f32 %v5694_v31, %v5693_v5  ;;  %v4868_v15 = vpop.permute.xlu1 %4867 }
 0x528   : > { %v5667_v55 = vsel %vm1460_vm2, %v5526_v41, 0.0  ;;  %v5525_v57 = vmul.f32 %v5461_v39, %v4798_v4  ;;  %v9446_v8 = vadd.f32 %v5239_v16, %v9366_v35  ;;  %v9448_v22 = vadd.f32 %v5655_v0, %v5654_v54  ;;  %v5053_v35 = vld [vmem:[%s9980_s5 + $0xf0] sm:$0xff]  ;;  %v4853_v4 = vpop.permute.xlu0 %4852  ;;  %v5056_v54 = vld [vmem:[%s9980_s5 + $0x108] sm:$0xff] }
 0x529   : > { %v5250_v49 = vsel %vm1460_vm2, %v5109_v17, 0.0  ;;  %v5118_v42 = vmul.f32 %v5054_v9, %v4846_v10  ;;  %v9451_v40 = vadd.f32 %v5266_v52, %v5265_v1  ;;  %v5246_v47 = vrot.slane %v5245_v60, 2  ;;  %v5474_v9 = vld [vmem:[%s9981_s6 + $0x118] sm:$0xff] }
 0x52a   : > { %v5252_v23 = vadd.f32 %v5251_v43, %v5250_v49  ;;  %v5666_v38 = vsel %vm1460_vm2, %v5525_v57, 0.0  ;;  %v9463_v44 = vadd.f32 %v5682_v18, %v5681_v46  ;;  %v9465_v36 = vadd.f32 %v5689_v33, %v5688_v58 }
 0x52b   : > { %v5280_v19 = vrot.slane %v5279_v50, 4  ;;  %v5668_v3 = vadd.f32 %v5667_v55, %v5666_v38  ;;  %v5275_v56 = vrot.slane %v5274_v62, 1  ;;  %v5662_v6 = vrot.slane %v5661_v29, 2 }
 0x52c   : > { %v5696_v13 = vrot.slane %v5695_v30, 4  ;;  %v5253_v11 = vrot.slane %v5252_v23, 4  ;;  %v5287_v1 = vsel %vm1460_vm2, %v5118_v42, 0.0  ;;  %v5534_v7 = vmul.f32 %v5470_v28, %v4846_v10  ;;  %v5471_v10 = vld [vmem:[%s9981_s6 + $0x100] sm:$0xff]  ;;  %v4864_v16 = vpop.permute.xlu0 %4863  ;;  %v5064_v42 = vld [vmem:[%s9980_s5 + $0x148] sm:$0xff] }
 0x52d   : > { %v5117_v2 = vmul.f32 %v5053_v35, %v4842_v63  ;;  %v5533_v26 = vmul.f32 %v5469_v59, %v4842_v63  ;;  %v9474_v12 = vadd.f32 %v5246_v47, %v5245_v60  ;;  %v5669_v46 = vrot.slane %v5668_v3, 4  ;;  %v5058_v63 = vld [vmem:[%s9980_s5 + $0x118] sm:$0xff] }
 0x52e   : > { %v5120_v58 = vmul.f32 %v5056_v54, %v4857_v20  ;;  %v5536_v37 = vmul.f32 %v5472_v14, %v4857_v20  ;;  %v5691_v34 = vrot.slane %v9465_v36, 1  ;;  %v5281_v45 = vadd.f32 %v5280_v19, %v5279_v50 }
 0x52f   : > { %v5254_v24 = vadd.f32 %v5253_v11, %v5252_v23  ;;  %v5286_v61 = vsel %vm1460_vm2, %v5117_v2, 0.0  ;;  %v9484_v27 = vadd.f32 %v5275_v56, %v5274_v62  ;;  %v9486_v21 = vadd.f32 %v5662_v6, %v5661_v29  ;;  %v5057_v62 = vld [vmem:[%s9980_s5 + $0x110] sm:$0xff] }
 0x530   : > { %v9488_v41 = vadd.f32 %v5696_v13, %v5695_v30  ;;  %v5288_v53 = vadd.f32 %v5287_v1, %v5286_v61  ;;  %v5703_v0 = vsel %vm1460_vm2, %v5534_v7, 0.0  ;;  %v5702_v31 = vsel %vm1460_vm2, %v5533_v26, 0.0  ;;  %v5473_v30 = vld [vmem:[%s9981_s6 + $0x110] sm:$0xff]  ;;  %v4901_v47 = vpop.permute.xlu1 %4900  ;;  %v4897_v54 = vpop.permute.xlu0 %4896  ;;  %v5480_v13 = vld [vmem:[%s9981_s6 + $0x148] sm:$0xff]  ;;  %v5063_v1 = vld [vmem:[%s9980_s5 + $0x140] sm:$0xff] }
 0x531   : > { %v5296_v5 = vsel %vm1460_vm2, %v5120_v58, 0.0  ;;  %v5119_v39 = vmul.f32 %v5055_v25, %v4853_v4  ;;  %v5248_v52 = vrot.slane %v9474_v12, 1  ;;  %v5670_v18 = vadd.f32 %v5669_v46, %v5668_v3  ;;  %v5479_v58 = vld [vmem:[%s9981_s6 + $0x140] sm:$0xff] }
 0x532   : > { %v5712_v33 = vsel %vm1460_vm2, %v5536_v37, 0.0  ;;  %v5535_v60 = vmul.f32 %v5471_v10, %v4853_v4  ;;  %v5282_v50 = vrot.slane %v5281_v45, 2  ;;  %v5255_v43 = vrot.slane %v5254_v24, 2 }
 0x533   : > { %v5295_v17 = vsel %vm1460_vm2, %v5119_v39, 0.0  ;;  %v5122_v29 = vmul.f32 %v5058_v63, %v4868_v15  ;;  %v5289_v55 = vrot.slane %v5288_v53, 4  ;;  %v5704_v57 = vadd.f32 %v5703_v0, %v5702_v31 }
 0x534   : > { %v5297_v20 = vadd.f32 %v5296_v5, %v5295_v17  ;;  %v5711_v49 = vsel %vm1460_vm2, %v5535_v60, 0.0  ;;  %v5538_v28 = vmul.f32 %v5474_v9, %v4868_v15  ;;  %v5121_v35 = vmul.f32 %v5057_v62, %v4864_v16  ;;  %v4912_v0 = vpop.permute.xlu1 %4911 }
 0x535   : > { %v5713_v23 = vadd.f32 %v5712_v33, %v5711_v49  ;;  %v5305_v38 = vsel %vm1460_vm2, %v5122_v29, 0.0  ;;  %v5664_v59 = vrot.slane %v9486_v21, 1  ;;  %v5671_v4 = vrot.slane %v5670_v18, 2 }
 0x536   : > { %v5298_v19 = vrot.slane %v5297_v20, 4  ;;  %v5537_v3 = vmul.f32 %v5473_v30, %v4864_v16  ;;  %v5256_v14 = vadd.f32 %v5255_v43, %v5254_v24  ;;  %v5304_v6 = vsel %vm1460_vm2, %v5121_v35, 0.0  ;;  %v4908_v43 = vpop.permute.xlu0 %4907 }
 0x537   : > { %v5714_v56 = vrot.slane %v5713_v23, 4  ;;  %v5128_v11 = vmul.f32 %v5064_v42, %v4901_v47  ;;  %v5698_v7 = vrot.slane %v9488_v41, 2  ;;  %v5705_v2 = vrot.slane %v5704_v57, 4 }
 0x538   : > { %v5299_v26 = vadd.f32 %v5298_v19, %v5297_v20  ;;  %v5306_v46 = vadd.f32 %v5305_v38, %v5304_v6  ;;  %v5290_v37 = vadd.f32 %v5289_v55, %v5288_v53  ;;  %v5721_v15 = vsel %vm1460_vm2, %v5538_v28, 0.0  ;;  %v9547_v28 = vpop.permute.xlu1 %4878 }
 0x539   : > { %v5715_v25 = vadd.f32 %v5714_v56, %v5713_v23  ;;  %v5720_v24 = vsel %vm1460_vm2, %v5537_v3, 0.0  ;;  %v9527_v61 = vadd.f32 %v5282_v50, %v5281_v45  ;;  %v5672_v10 = vadd.f32 %v5671_v4, %v5670_v18 }
 0x53a   : > { %v5544_v63 = vmul.f32 %v5480_v13, %v4901_v47  ;;  %v5127_v16 = vmul.f32 %v5063_v1, %v4897_v54  ;;  %v5307_v31 = vrot.slane %v5306_v46, 4  ;;  %v5332_v5 = vsel %vm1460_vm2, %v5128_v11, 0.0 }
 0x53b   : > { %v5543_v39 = vmul.f32 %v5479_v58, %v4897_v54  ;;  %v5257_v33 = vrot.slane %v5256_v14, 1  ;;  %v5706_v60 = vadd.f32 %v5705_v2, %v5704_v57  ;;  %v5300_v9 = vrot.slane %v5299_v26, 2 }
 0x53c   : > { %v5722_v62 = vadd.f32 %v5721_v15, %v5720_v24  ;;  %v5331_v53 = vsel %vm1460_vm2, %v5127_v16, 0.0  ;;  %v9534_v45 = vadd.f32 %v5691_v34, %v9465_v36  ;;  %v5699_v18 = vadd.f32 %v5698_v7, %v9488_v41  ;;  %v5066_v41 = vld [vmem:[%s9980_s5 + $0x158] sm:$0xff] }
 0x53d   : > { %v5291_v50 = vrot.slane %v5290_v37, 2  ;;  %v5716_v17 = vrot.slane %v5715_v25, 2  ;;  %v5748_v29 = vsel %vm1460_vm2, %v5544_v63, 0.0  ;;  %v5333_v30 = vadd.f32 %v5332_v5, %v5331_v53 }
 0x53e   : > { %v5747_v55 = vsel %vm1460_vm2, %v5543_v39, 0.0  ;;  %v5249_v57 = vadd.f32 %v5248_v52, %v9474_v12  ;;  %v5284_v20 = vrot.slane %v9527_v61, 1  ;;  %v5308_v49 = vadd.f32 %v5307_v31, %v5306_v46 }
 0x53f   : > { %v5258_v42 = vadd.f32 %v5257_v33, %v5256_v14  ;;  %v5673_v47 = vrot.slane %v5672_v10, 1  ;;  %v5707_v23 = vrot.slane %v5706_v60, 2  ;;  %v9541_v38 = vadd.f32 %v5300_v9, %v5299_v26  ;;  %v5481_v26 = vld [vmem:[%s9981_s6 + $0x150] sm:$0xff] }
 0x540   : > { %v5723_v36 = vrot.slane %v5722_v62, 4  ;;  %v5665_v34 = vadd.f32 %v5664_v59, %v9486_v21  ;;  %v9549_v35 = vadd.f32 %v5716_v17, %v5715_v25  ;;  %v5749_v12 = vadd.f32 %v5748_v29, %v5747_v55  ;;  %v5482_v21 = vld [vmem:[%s9981_s6 + $0x158] sm:$0xff]  ;;  %v9558_v59 = vpop.permute.xlu0 %4874  ;;  %v5060_v29 = vld [vmem:[%s9980_s5 + $0x128] sm:$0xff] }
 0x541   : > { %v5674_v52 = vadd.f32 %v5673_v47, %v5672_v10  ;;  %v5896_v4 = vsel %vm5887_vm0, %v9446_v8, %v9364_v32  ;;  %v5700_v19 = vrot.slane %v5699_v18, 1  ;;  %v5292_v3 = vadd.f32 %v5291_v50, %v5290_v37  ;;  %v5065_v32 = vld [vmem:[%s9980_s5 + $0x150] sm:$0xff]  ;;  %v4923_v10 = vpop.permute.xlu1 %4922  ;;  %v5476_v55 = vld [vmem:[%s9981_s6 + $0x128] sm:$0xff]  ;;  %v5475_v47 = vld [vmem:[%s9981_s6 + $0x120] sm:$0xff] }
 0x542   : > { %v5334_v54 = vrot.slane %v5333_v30, 4  ;;  %v5897_v14 = vsel %vm5889_vm1, %v5249_v57, %v5896_v4  ;;  %v5309_v56 = vrot.slane %v5308_v49, 2  ;;  %v5963_v13 = vsel %vm5954_vm14, %v9448_v22, %v9405_v48  ;;  %v5059_v57 = vld [vmem:[%s9980_s5 + $0x120] sm:$0xff] }
 0x543   : > { %v5898_v6 = vsel %vm5891_vm15, %v5258_v42, %v5897_v14  ;;  %v5130_v11 = vmul.f32 %v5066_v41, %v4912_v0  ;;  %v5708_v8 = vadd.f32 %v5707_v23, %v5706_v60  ;;  %v5302_v1 = vrot.slane %v9541_v38, 1 }
 0x544   : > { %v5724_v7 = vadd.f32 %v5723_v36, %v5722_v62  ;;  %v5964_v2 = vsel %vm5956_vm10, %v5665_v34, %v5963_v13  ;;  %v5718_v46 = vrot.slane %v9549_v35, 1  ;;  %v5750_v58 = vrot.slane %v5749_v12, 4  ;;  %v4919_v9 = vpop.permute.xlu0 %4918 }
 0x545   : > { %v5965_v48 = vsel %vm5958_vm5, %v5674_v52, %v5964_v2  ;;  %v5546_v22 = vmul.f32 %v5482_v21, %v4912_v0  ;;  %v9574_v37 = vadd.f32 %v5334_v54, %v5333_v30  ;;  %v5341_v15 = vsel %vm1460_vm2, %v5130_v11, 0.0  ;;  %v4890_v52 = vpop.permute.xlu1 %4889  ;;  %v5483_v2 = vld [vmem:[%s9981_s6 + $0x160] sm:$0xff] }
 0x546   : > { %v5991_v25 = vsel %vm4069_vm6, %v5898_v6, %v5965_v48  ;;  %v5129_v24 = vmul.f32 %v5065_v32, %v4908_v43  ;;  %v9578_v63 = vadd.f32 %v5309_v56, %v5308_v49  ;;  %v5545_v31 = vmul.f32 %v5481_v26, %v4908_v43  ;;  %v5067_v6 = vld [vmem:[%s9980_s5 + $0x160] sm:$0xff] }
 0x547   : > { %7138 = vmatprep.subr.mxu0 %v5991_v25  ;;  %v5757_v16 = vsel %vm1460_vm2, %v5546_v22, 0.0  ;;  %v5285_v5 = vadd.f32 %v5284_v20, %v9527_v61  ;;  %v5725_v39 = vrot.slane %v5724_v7, 2  ;;  %v5293_v0 = vrot.slane %v5292_v3, 1  ;;  %v9604_v20 = vld [vmem:[%s9979_s4] sm:$0xff] }
 0x548   : > { %v5340_v33 = vsel %vm1460_vm2, %v5129_v24, 0.0  ;;  %7139 = vmatpush3.msra.mxu0 %v5991_v25  ;;  %v5701_v60 = vadd.f32 %v5700_v19, %v5699_v18  ;;  %v9583_v62 = vadd.f32 %v5750_v58, %v5749_v12  ;;  %v5756_v50 = vsel %vm1460_vm2, %v5545_v31, 0.0  ;;  %v5068_v12 = vld [vmem:[%s9980_s5 + $0x168] sm:$0xff]  ;;  %v4886_v13 = vpop.permute.xlu0 %4885 }
 0x549   : > { %v5342_v53 = vadd.f32 %v5341_v15, %v5340_v33  ;;  %v5709_v17 = vrot.slane %v5708_v8, 1  ;;  %7141 = vmatmul.mubr.msk.f32.vlgmr.msra.gmra.mxu0 %vm1460_vm2, %v9356_v51  ;;  %v5336_v61 = vrot.slane %v9574_v37, 2  ;;  %v5758_v43 = vadd.f32 %v5757_v16, %v5756_v50 }
 0x54a   : > { %v5294_v30 = vadd.f32 %v5293_v0, %v5292_v3  ;;  %v5899_v18 = vsel %vm5887_vm0, %v9484_v27, %v9451_v40  ;;  %7150 = vmatprep.mubr.msk.f32.mxu0 %vm1460_vm2, %v9604_v20  ;;  %v5966_v27 = vsel %vm5954_vm14, %v9534_v45, %v9463_v44  ;;  %v5124_v41 = vmul.f32 %v5060_v29, %v9547_v28  ;;  %v5484_v3 = vld [vmem:[%s9981_s6 + $0x168] sm:$0xff] }
 0x54b   : > { %v5343_v49 = vrot.slane %v5342_v53, 4  ;;  %v5710_v42 = vadd.f32 %v5709_v17, %v5708_v8  ;;  %v5900_v40 = vsel %vm5889_vm1, %v5285_v5, %v5899_v18  ;;  %v5759_v23 = vrot.slane %v5758_v43, 4  ;;  %v5070_v18 = vld [vmem:[%s9980_s5 + $0x178] sm:$0xff] }
 0x54c   : > { %v5901_v36 = vsel %vm5891_vm15, %v5294_v30, %v5900_v40  ;;  %v5967_v34 = vsel %vm5956_vm10, %v5701_v60, %v5966_v27  ;;  %v5540_v44 = vmul.f32 %v5476_v55, %v9547_v28  ;;  %v5123_v45 = vmul.f32 %v5059_v57, %v9558_v59  ;;  %v4930_v17 = vpop.permute.xlu0 %4929 }
 0x54d   : > { %v5344_v4 = vadd.f32 %v5343_v49, %v5342_v53  ;;  %v5968_v19 = vsel %vm5958_vm5, %v5710_v42, %v5967_v34  ;;  %v5760_v54 = vadd.f32 %v5759_v23, %v5758_v43  ;;  %v5314_v21 = vsel %vm1460_vm2, %v5124_v41, 0.0 }
 0x54e   : > { %v5992_v14 = vsel %vm4069_vm6, %v5901_v36, %v5968_v19  ;;  %v5539_v56 = vmul.f32 %v5475_v47, %v9558_v59  ;;  %v5726_v11 = vadd.f32 %v5725_v39, %v5724_v7  ;;  %v5730_v28 = vsel %vm1460_vm2, %v5540_v44, 0.0  ;;  %v5062_v7 = vld [vmem:[%s9980_s5 + $0x138] sm:$0xff]  ;;  %v4934_v39 = vpop.permute.xlu1 %4933 }
 0x54f   : > { %7143 = vmatprep.subr.mxu1 %v5992_v14  ;;  %v5313_v32 = vsel %vm1460_vm2, %v5123_v45, 0.0  ;;  %v5132_v8 = vmul.f32 %v5068_v12, %v4923_v10  ;;  %v5752_v26 = vrot.slane %v9583_v62, 2  ;;  %v5548_v48 = vmul.f32 %v5484_v3, %v4923_v10  ;;  %v5486_v45 = vld [vmem:[%s9981_s6 + $0x178] sm:$0xff] }
 0x550   : > { %v5315_v58 = vadd.f32 %v5314_v21, %v5313_v32  ;;  %v5729_v59 = vsel %vm1460_vm2, %v5539_v56, 0.0  ;;  %7144 = vmatpush3.msra.mxu1 %v5992_v14  ;;  %v5337_v22 = vadd.f32 %v5336_v61, %v9574_v37  ;;  %v5345_v25 = vrot.slane %v5344_v4, 2  ;;  %v5485_v56 = vld [vmem:[%s9981_s6 + $0x170] sm:$0xff] }
 0x551   : > { %v5761_v15 = vrot.slane %v5760_v54, 2  ;;  %v5131_v24 = vmul.f32 %v5067_v6, %v4919_v9  ;;  %7146 = vmatmul.mubr.msk.f32.vlgmr.msra.gmra.mxu1 %vm1460_vm2, %v9356_v51  ;;  %v9649_v16 = vadd.f32 %v5302_v1, %v9541_v38  ;;  %v5731_v5 = vadd.f32 %v5730_v28, %v5729_v59  ;;  %v5478_v38 = vld [vmem:[%s9981_s6 + $0x138] sm:$0xff]  ;;  %v5072_v6 = vld [vmem:[%s9980_s5 + $0x188] sm:$0xff] }
 0x552   : > { %v5316_v31 = vrot.slane %v5315_v58, 4  ;;  %v5547_v10 = vmul.f32 %v5483_v2, %v4919_v9  ;;  %7155 = vmatprep.mubr.msk.f32.mxu1 %vm1460_vm2, %v9604_v20  ;;  %v9656_v37 = vadd.f32 %v5718_v46, %v9549_v35  ;;  %v5350_v33 = vsel %vm1460_vm2, %v5132_v8, 0.0  ;;  %v5061_v35 = vld [vmem:[%s9980_s5 + $0x130] sm:$0xff]  ;;  %v4945_v12 = vpop.permute.xlu1 %4944 }
 0x553   : > { %v5349_v0 = vsel %vm1460_vm2, %v5131_v24, 0.0  ;;  %v5126_v1 = vmul.f32 %v5062_v7, %v4890_v52  ;;  %v5311_v60 = vrot.slane %v9578_v63, 1  ;;  %v5727_v9 = vrot.slane %v5726_v11, 1  ;;  %v5477_v46 = vld [vmem:[%s9981_s6 + $0x130] sm:$0xff] }
 0x554   : > { %v5766_v53 = vsel %vm1460_vm2, %v5548_v48, 0.0  ;;  %v5765_v50 = vsel %vm1460_vm2, %v5547_v10, 0.0  ;;  %v5338_v29 = vrot.slane %v5337_v22, 1  ;;  %v5753_v61 = vadd.f32 %v5752_v26, %v9583_v62 }
 0x555   : > { %v5346_v43 = vadd.f32 %v5345_v25, %v5344_v4  ;;  %v5762_v30 = vadd.f32 %v5761_v15, %v5760_v54  ;;  %v5317_v55 = vadd.f32 %v5316_v31, %v5315_v58  ;;  %v5732_v57 = vrot.slane %v5731_v5, 4  ;;  %v5488_v15 = vld [vmem:[%s9981_s6 + $0x188] sm:$0xff] }
 0x556   : > { %v5351_v49 = vadd.f32 %v5350_v33, %v5349_v0  ;;  %v5542_v42 = vmul.f32 %v5478_v38, %v4890_v52  ;;  %v5767_v40 = vadd.f32 %v5766_v53, %v5765_v50  ;;  %v5323_v27 = vsel %vm1460_vm2, %v5126_v1, 0.0  ;;  %v5487_v33 = vld [vmem:[%s9981_s6 + $0x180] sm:$0xff]  ;;  %v5074_v0 = vld [vmem:[%s9980_s5 + $0x198] sm:$0xff]  ;;  %v4956_v38 = vpop.permute.xlu1 %4955 }
 0x557   : > { %v5125_v47 = vmul.f32 %v5061_v35, %v4886_v13  ;;  %v5541_v23 = vmul.f32 %v5477_v46, %v4886_v13  ;;  %v9678_v36 = vadd.f32 %v5311_v60, %v9578_v63  ;;  %v9680_v34 = vadd.f32 %v5727_v9, %v5726_v11  ;;  %v5069_v63 = vld [vmem:[%s9980_s5 + $0x170] sm:$0xff]  ;;  %v4941_v13 = vpop.permute.xlu0 %4940 }
 0x558   : > { %v5739_v62 = vsel %vm1460_vm2, %v5542_v42, 0.0  ;;  %v5134_v41 = vmul.f32 %v5070_v18, %v4934_v39  ;;  %v5754_v4 = vrot.slane %v5753_v61, 1  ;;  %v5347_v19 = vrot.slane %v5346_v43, 1 }
 0x559   : > { %v5322_v44 = vsel %vm1460_vm2, %v5125_v47, 0.0  ;;  %v5738_v52 = vsel %vm1460_vm2, %v5541_v23, 0.0  ;;  %v5733_v3 = vadd.f32 %v5732_v57, %v5731_v5  ;;  %v5352_v54 = vrot.slane %v5351_v49, 4  ;;  %v5489_v47 = vld [vmem:[%s9981_s6 + $0x190] sm:$0xff] }
 0x55a   : > { %v5324_v14 = vadd.f32 %v5323_v27, %v5322_v44  ;;  %v5740_v21 = vadd.f32 %v5739_v62, %v5738_v52  ;;  %v9697_v11 = vadd.f32 %v5338_v29, %v5337_v22  ;;  %v5763_v28 = vrot.slane %v5762_v30, 1  ;;  %v5073_v27 = vld [vmem:[%s9980_s5 + $0x190] sm:$0xff] }
 0x55b   : > { %v5318_v32 = vrot.slane %v5317_v55, 2  ;;  %v5768_v8 = vrot.slane %v5767_v40, 4  ;;  %v5359_v26 = vsel %vm1460_vm2, %v5134_v41, 0.0  ;;  %v5550_v58 = vmul.f32 %v5486_v45, %v4934_v39  ;;  %v5071_v39 = vld [vmem:[%s9980_s5 + $0x180] sm:$0xff]  ;;  %v4952_v29 = vpop.permute.xlu0 %4951 }
 0x55c   : > { %v5325_v2 = vrot.slane %v5324_v14, 4  ;;  %v5133_v59 = vmul.f32 %v5069_v63, %v4930_v17  ;;  %v9700_v48 = vadd.f32 %v5754_v4, %v5753_v61  ;;  %v9702_v7 = vadd.f32 %v5347_v19, %v5346_v43 }
 0x55d   : > { %v5549_v25 = vmul.f32 %v5485_v56, %v4930_v17  ;;  %v5136_v24 = vmul.f32 %v5072_v6, %v4945_v12  ;;  %v5734_v22 = vrot.slane %v5733_v3, 2  ;;  %v9707_v31 = vadd.f32 %v5352_v54, %v5351_v49 }
 0x55e   : > { %v5741_v5 = vrot.slane %v5740_v21, 4  ;;  %v5358_v10 = vsel %vm1460_vm2, %v5133_v59, 0.0  ;;  %v9719_v1 = vadd.f32 %v5763_v28, %v5762_v30  ;;  %v9721_v60 = vadd.f32 %v5318_v32, %v5317_v55  ;;  %v5490_v30 = vld [vmem:[%s9981_s6 + $0x198] sm:$0xff]  ;;  %v5079_v32 = vld [vmem:[%s9980_s5 + $0x1c0] sm:$0xff] }
 0x55f   : > { %v5769_v9 = vadd.f32 %v5768_v8, %v5767_v40  ;;  %v5360_v53 = vadd.f32 %v5359_v26, %v5358_v10  ;;  %v5326_v50 = vadd.f32 %v5325_v2, %v5324_v14  ;;  %v5775_v35 = vsel %vm1460_vm2, %v5550_v58, 0.0  ;;  %v5080_v14 = vld [vmem:[%s9980_s5 + $0x1c8] sm:$0xff]  ;;  %v4985_v8 = vpop.permute.xlu0 %4984 }
 0x560   : > { %v5774_v46 = vsel %vm1460_vm2, %v5549_v25, 0.0  ;;  %v5552_v17 = vmul.f32 %v5488_v15, %v4945_v12  ;;  %v5368_v61 = vsel %vm1460_vm2, %v5136_v24, 0.0  ;;  %v5135_v43 = vmul.f32 %v5071_v39, %v4941_v13  ;;  %v5496_v25 = vld [vmem:[%s9981_s6 + $0x1c8] sm:$0xff]  ;;  %v5495_v15 = vld [vmem:[%s9981_s6 + $0x1c0] sm:$0xff] }
 0x561   : > { %v5551_v18 = vmul.f32 %v5487_v33, %v4941_v13  ;;  %v5138_v57 = vmul.f32 %v5074_v0, %v4956_v38  ;;  %v9729_v55 = vadd.f32 %v5734_v22, %v5733_v3  ;;  %v5354_v49 = vrot.slane %v9707_v31, 2 }
 0x562   : > { %v5742_v42 = vadd.f32 %v5741_v5, %v5740_v21  ;;  %v5784_v40 = vsel %vm1460_vm2, %v5552_v17, 0.0  ;;  %v5361_v23 = vrot.slane %v5360_v53, 4  ;;  %v5776_v62 = vadd.f32 %v5775_v35, %v5774_v46  ;;  %v4989_v21 = vpop.permute.xlu1 %4988 }
 0x563   : > { %v5367_v41 = vsel %vm1460_vm2, %v5135_v43, 0.0  ;;  %v5783_v12 = vsel %vm1460_vm2, %v5551_v18, 0.0  ;;  %v5770_v4 = vrot.slane %v5769_v9, 2  ;;  %v5554_v52 = vmul.f32 %v5490_v30, %v4956_v38 }
 0x564   : > { %v5369_v19 = vadd.f32 %v5368_v61, %v5367_v41  ;;  %v5785_v44 = vadd.f32 %v5784_v40, %v5783_v12  ;;  %v5327_v45 = vrot.slane %v5326_v50, 2  ;;  %v5377_v63 = vsel %vm1460_vm2, %v5138_v57, 0.0 }
 0x565   : > { %v5137_v3 = vmul.f32 %v5073_v27, %v4952_v29  ;;  %v5553_v54 = vmul.f32 %v5489_v47, %v4952_v29  ;;  %v5743_v56 = vrot.slane %v5742_v42, 2  ;;  %v5793_v28 = vsel %vm1460_vm2, %v5554_v52, 0.0 }
 0x566   : > { %v5370_v6 = vrot.slane %v5369_v19, 4  ;;  %v5786_v13 = vrot.slane %v5785_v44, 4  ;;  %v5362_v2 = vadd.f32 %v5361_v23, %v5360_v53  ;;  %v5777_v26 = vrot.slane %v5776_v62, 4  ;;  %v5000_v47 = vpop.permute.xlu1 %4999 }
 0x567   : > { %v5376_v58 = vsel %vm1460_vm2, %v5137_v3, 0.0  ;;  %v5792_v59 = vsel %vm1460_vm2, %v5553_v54, 0.0  ;;  %v5144_v10 = vmul.f32 %v5080_v14, %v4989_v21  ;;  %v5320_v39 = vrot.slane %v9721_v60, 1 }
 0x568   : > { %v5371_v24 = vadd.f32 %v5370_v6, %v5369_v19  ;;  %v5787_v22 = vadd.f32 %v5786_v13, %v5785_v44  ;;  %v5378_v5 = vadd.f32 %v5377_v63, %v5376_v58  ;;  %v5328_v33 = vadd.f32 %v5327_v45, %v5326_v50  ;;  %v4996_v6 = vpop.permute.xlu0 %4995 }
 0x569   : > { %v5794_v0 = vadd.f32 %v5793_v28, %v5792_v59  ;;  %v5143_v38 = vmul.f32 %v5079_v32, %v4985_v8  ;;  %v5560_v46 = vmul.f32 %v5496_v25, %v4989_v21  ;;  %v5559_v17 = vmul.f32 %v5495_v15, %v4985_v8  ;;  %v5498_v8 = vld [vmem:[%s9981_s6 + $0x1d8] sm:$0xff]  ;;  %v5497_v25 = vld [vmem:[%s9981_s6 + $0x1d0] sm:$0xff] }
 0x56a   : > { %v5372_v53 = vrot.slane %v5371_v24, 2  ;;  %v5788_v35 = vrot.slane %v5787_v22, 2  ;;  %v5736_v29 = vrot.slane %v9729_v55, 1  ;;  %v5355_v61 = vadd.f32 %v5354_v49, %v9707_v31 }
 0x56b   : > { %v5744_v43 = vadd.f32 %v5743_v56, %v5742_v42  ;;  %v5379_v18 = vrot.slane %v5378_v5, 4  ;;  %v9760_v30 = vadd.f32 %v5770_v4, %v5769_v9  ;;  %v5363_v57 = vrot.slane %v5362_v2, 2  ;;  %v5082_v56 = vld [vmem:[%s9980_s5 + $0x1d8] sm:$0xff] }
 0x56c   : > { %v5778_v40 = vadd.f32 %v5777_v26, %v5776_v62  ;;  %v5404_v27 = vsel %vm1460_vm2, %v5144_v10, 0.0  ;;  %v5795_v50 = vrot.slane %v5794_v0, 4  ;;  %v5403_v23 = vsel %vm1460_vm2, %v5143_v38, 0.0  ;;  %v4967_v26 = vpop.permute.xlu1 %4966 }
 0x56d   : > { %v5321_v41 = vadd.f32 %v5320_v39, %v9721_v60  ;;  %v5329_v12 = vrot.slane %v5328_v33, 1  ;;  %v5373_v19 = vadd.f32 %v5372_v53, %v5371_v24  ;;  %v5789_v44 = vadd.f32 %v5788_v35, %v5787_v22 }
 0x56e   : > { %v5820_v52 = vsel %vm1460_vm2, %v5560_v46, 0.0  ;;  %v5819_v31 = vsel %vm1460_vm2, %v5559_v17, 0.0  ;;  %v5380_v49 = vadd.f32 %v5379_v18, %v5378_v5  ;;  %v5737_v42 = vadd.f32 %v5736_v29, %v9729_v55  ;;  %v4963_v18 = vpop.permute.xlu0 %4962 }
 0x56f   : > { %v5330_v9 = vadd.f32 %v5329_v12, %v5328_v33  ;;  %v5745_v62 = vrot.slane %v5744_v43, 1  ;;  %v5356_v4 = vrot.slane %v5355_v61, 1  ;;  %v5772_v45 = vrot.slane %v9760_v30, 1 }
 0x570   : > { %v5779_v63 = vrot.slane %v5778_v40, 2  ;;  %v5405_v3 = vadd.f32 %v5404_v27, %v5403_v23  ;;  %v5796_v54 = vadd.f32 %v5795_v50, %v5794_v0  ;;  %v5821_v14 = vadd.f32 %v5820_v52, %v5819_v31  ;;  %v5011_v50 = vpop.permute.xlu1 %5010 }
 0x571   : > { %v5746_v60 = vadd.f32 %v5745_v62, %v5744_v43  ;;  %v5902_v21 = vsel %vm5887_vm0, %v9678_v36, %v9649_v16  ;;  %v5364_v13 = vadd.f32 %v5363_v57, %v5362_v2  ;;  %v5374_v55 = vrot.slane %v5373_v19, 1  ;;  %v5081_v2 = vld [vmem:[%s9980_s5 + $0x1d0] sm:$0xff]  ;;  %v5076_v43 = vld [vmem:[%s9980_s5 + $0x1a8] sm:$0xff] }
 0x572   : > { %v5903_v28 = vsel %vm5889_vm1, %v5321_v41, %v5902_v21  ;;  %v5969_v32 = vsel %vm5954_vm14, %v9680_v34, %v9656_v37  ;;  %v5790_v58 = vrot.slane %v5789_v44, 1  ;;  %v5381_v16 = vrot.slane %v5380_v49, 2 }
 0x573   : > { %v5904_v36 = vsel %vm5891_vm15, %v5330_v9, %v5903_v28  ;;  %v5970_v59 = vsel %vm5956_vm10, %v5737_v42, %v5969_v32  ;;  %v5780_v37 = vadd.f32 %v5779_v63, %v5778_v40  ;;  %v5406_v34 = vrot.slane %v5405_v3, 4  ;;  %v5083_v28 = vld [vmem:[%s9980_s5 + $0x1e0] sm:$0xff] }
 0x574   : > { %v5971_v15 = vsel %vm5958_vm5, %v5746_v60, %v5970_v59  ;;  %v5146_v24 = vmul.f32 %v5082_v56, %v5000_v47  ;;  %v5797_v22 = vrot.slane %v5796_v54, 2  ;;  %v5822_v5 = vrot.slane %v5821_v14, 4  ;;  %v4978_v32 = vpop.permute.xlu1 %4977  ;;  %v5078_v59 = vld [vmem:[%s9980_s5 + $0x1b8] sm:$0xff] }
 0x575   : > { %v5993_v10 = vsel %vm4069_vm6, %v5904_v36, %v5971_v15  ;;  %v5562_v39 = vmul.f32 %v5498_v8, %v5000_v47  ;;  %v9792_v33 = vadd.f32 %v5374_v55, %v5373_v19  ;;  %v5145_v38 = vmul.f32 %v5081_v2, %v4996_v6  ;;  %v5492_v19 = vld [vmem:[%s9981_s6 + $0x1a8] sm:$0xff]  ;;  %v5499_v36 = vld [vmem:[%s9981_s6 + $0x1e0] sm:$0xff]  ;;  %v5494_v2 = vld [vmem:[%s9981_s6 + $0x1b8] sm:$0xff] }
 0x576   : > { %7148 = vmatprep.subr.mxu0 %v5993_v10  ;;  %v5413_v0 = vsel %vm1460_vm2, %v5146_v24, 0.0  ;;  %v5561_v53 = vmul.f32 %v5497_v25, %v4996_v6  ;;  %v9795_v35 = vadd.f32 %v5790_v58, %v5789_v44  ;;  %v9797_v46 = vadd.f32 %v5381_v16, %v5380_v49  ;;  %v5075_v49 = vld [vmem:[%s9980_s5 + $0x1a0] sm:$0xff] }
 0x577   : > { %7149 = vmatpush3.msra.mxu0 %v5993_v10  ;;  %v5357_v17 = vadd.f32 %v5356_v4, %v5355_v61  ;;  %v5365_v29 = vrot.slane %v5364_v13, 1  ;;  %v9802_v57 = vadd.f32 %v5406_v34, %v5405_v3  ;;  %v5829_v40 = vsel %vm1460_vm2, %v5562_v39, 0.0 }
 0x578   : > { %v5412_v27 = vsel %vm1460_vm2, %v5145_v38, 0.0  ;;  %v5828_v47 = vsel %vm1460_vm2, %v5561_v53, 0.0  ;;  %7151 = vmatmul.mubr.msk.f32.vlgmr.msra.gmra.mxu0 %vm1460_vm2, %v9356_v51  ;;  %v9809_v23 = vadd.f32 %v5797_v22, %v5796_v54  ;;  %v5773_v12 = vadd.f32 %v5772_v45, %v9760_v30  ;;  %v5491_v30 = vld [vmem:[%s9981_s6 + $0x1a0] sm:$0xff] }
 0x579   : > { %v5414_v61 = vadd.f32 %v5413_v0, %v5412_v27  ;;  %v5366_v41 = vadd.f32 %v5365_v29, %v5364_v13  ;;  %7160 = vmatprep.mubr.msk.f32.mxu0 %vm1460_vm2, %v9604_v20  ;;  %v9817_v44 = vadd.f32 %v5822_v5, %v5821_v14  ;;  %v5781_v52 = vrot.slane %v5780_v37, 1  ;;  %v5077_v27 = vld [vmem:[%s9980_s5 + $0x1b0] sm:$0xff] }
 0x57a   : > { %v5905_v51 = vsel %vm5887_vm0, %v9702_v7, %v9697_v11  ;;  %v5140_v31 = vmul.f32 %v5076_v43, %v4967_v26  ;;  %v5383_v9 = vrot.slane %v9797_v46, 1  ;;  %v5830_v42 = vadd.f32 %v5829_v40, %v5828_v47  ;;  %v5084_v11 = vld [vmem:[%s9980_s5 + $0x1e8] sm:$0xff] }
 0x57b   : > { %v5906_v62 = vsel %vm5889_vm1, %v5357_v17, %v5905_v51  ;;  %v5972_v4 = vsel %vm5954_vm14, %v9719_v1, %v9700_v48  ;;  %v5500_v7 = vld [vmem:[%s9981_s6 + $0x1e8] sm:$0xff]  ;;  %v5415_v45 = vrot.slane %v5414_v61, 4  ;;  %v5782_v63 = vadd.f32 %v5781_v52, %v5780_v37  ;;  %v5007_v48 = vpop.permute.xlu0 %5006  ;;  %v5022_v52 = vpop.permute.xlu1 %5021 }
 0x57c   : > { %v5907_v3 = vsel %vm5891_vm15, %v5366_v41, %v5906_v62  ;;  %v5556_v54 = vmul.f32 %v5492_v19, %v4967_v26  ;;  %v5973_v14 = vsel %vm5956_vm10, %v5773_v12, %v5972_v4  ;;  %v5386_v60 = vsel %vm1460_vm2, %v5140_v31, 0.0  ;;  %v9866_v17 = vld [vmem:[%s9979_s4 + $0x8] sm:$0xff]  ;;  %v5086_v19 = vld [vmem:[%s9980_s5 + $0x1f8] sm:$0xff] }
 0x57d   : > { %v5139_v21 = vmul.f32 %v5075_v49, %v4963_v18  ;;  %v5555_v56 = vmul.f32 %v5491_v30, %v4963_v18  ;;  %v5974_v1 = vsel %vm5958_vm5, %v5782_v63, %v5973_v14  ;;  %v5148_v13 = vmul.f32 %v5084_v11, %v5011_v50 }
 0x57e   : > { %v5802_v6 = vsel %vm1460_vm2, %v5556_v54, 0.0  ;;  %v5564_v55 = vmul.f32 %v5500_v7, %v5011_v50  ;;  %v5799_v8 = vrot.slane %v9809_v23, 1  ;;  %v5408_v26 = vrot.slane %v9802_v57, 2 }
 0x57f   : > { %v5994_v58 = vsel %vm4069_vm6, %v5907_v3, %v5974_v1  ;;  %v5385_v16 = vsel %vm1460_vm2, %v5139_v21, 0.0  ;;  %v5416_v25 = vadd.f32 %v5415_v45, %v5414_v61  ;;  %v5831_v37 = vrot.slane %v5830_v42, 4  ;;  %v4974_v47 = vpop.permute.xlu0 %4973 }
 0x580   : > { %7153 = vmatprep.subr.mxu1 %v5994_v58  ;;  %v5387_v34 = vadd.f32 %v5386_v60, %v5385_v16  ;;  %v5801_v15 = vsel %vm1460_vm2, %v5555_v56, 0.0  ;;  %v5422_v22 = vsel %vm1460_vm2, %v5148_v13, 0.0  ;;  %v5838_v5 = vsel %vm1460_vm2, %v5564_v55, 0.0  ;;  %v5501_v13 = vld [vmem:[%s9981_s6 + $0x1f0] sm:$0xff] }
 0x581   : > { %v5803_v24 = vadd.f32 %v5802_v6, %v5801_v15  ;;  %7154 = vmatpush3.msra.mxu1 %v5994_v58  ;;  %v5147_v10 = vmul.f32 %v5083_v28, %v5007_v48  ;;  %v5563_v0 = vmul.f32 %v5499_v36, %v5007_v48  ;;  %v5142_v38 = vmul.f32 %v5078_v59, %v4978_v32  ;;  %v5085_v6 = vld [vmem:[%s9980_s5 + $0x1f0] sm:$0xff] }
 0x582   : > { %v5388_v39 = vrot.slane %v5387_v34, 4  ;;  %v5558_v53 = vmul.f32 %v5494_v2, %v4978_v32  ;;  %7156 = vmatmul.mubr.msk.f32.vlgmr.msra.gmra.mxu1 %vm1460_vm2, %v9866_v17  ;;  %v9871_v29 = vadd.f32 %v5383_v9, %v9797_v46  ;;  %v5824_v43 = vrot.slane %v9817_v44, 2  ;;  %v5493_v46 = vld [vmem:[%s9981_s6 + $0x1b0] sm:$0xff] }
 0x583   : > { %v5804_v18 = vrot.slane %v5803_v24, 4  ;;  %v5421_v40 = vsel %vm1460_vm2, %v5147_v10, 0.0  ;;  %7165 = vmatprep.mubr.msk.f32.mxu1 %vm1460_vm2, %v9604_v20  ;;  %v5832_v50 = vadd.f32 %v5831_v37, %v5830_v42  ;;  %v5837_v12 = vsel %vm1460_vm2, %v5563_v0, 0.0  ;;  %v5502_v20 = vld [vmem:[%s9981_s6 + $0x1f8] sm:$0xff]  ;;  %v5018_v55 = vpop.permute.xlu0 %5017 }
 0x584   : > { %v5389_v61 = vadd.f32 %v5388_v39, %v5387_v34  ;;  %v5423_v41 = vadd.f32 %v5422_v22, %v5421_v40  ;;  %v5417_v51 = vrot.slane %v5416_v25, 2  ;;  %v5839_v49 = vadd.f32 %v5838_v5, %v5837_v12 }
 0x585   : > { %v5805_v31 = vadd.f32 %v5804_v18, %v5803_v24  ;;  %v5395_v30 = vsel %vm1460_vm2, %v5142_v38, 0.0  ;;  %v5811_v62 = vsel %vm1460_vm2, %v5558_v53, 0.0  ;;  %v5141_v4 = vmul.f32 %v5077_v27, %v4974_v47 }
 0x586   : > { %v5390_v9 = vrot.slane %v5389_v61, 2  ;;  %v5424_v42 = vrot.slane %v5423_v41, 4  ;;  %v5840_v7 = vrot.slane %v5839_v49, 4  ;;  %v5557_v45 = vmul.f32 %v5493_v46, %v4974_v47 }
 0x587   : > { %v5806_v11 = vrot.slane %v5805_v31, 2  ;;  %v5150_v63 = vmul.f32 %v5086_v19, %v5022_v52  ;;  %v9893_v3 = vadd.f32 %v5408_v26, %v9802_v57  ;;  %v5394_v14 = vsel %vm1460_vm2, %v5141_v4, 0.0 }
 0x588   : > { %v5425_v54 = vadd.f32 %v5424_v42, %v5423_v41  ;;  %v5566_v60 = vmul.f32 %v5502_v20, %v5022_v52  ;;  %v5833_v21 = vrot.slane %v5832_v50, 2  ;;  %v5841_v56 = vadd.f32 %v5840_v7, %v5839_v49 }
 0x589   : > { %v5396_v48 = vadd.f32 %v5395_v30, %v5394_v14  ;;  %v5810_v1 = vsel %vm1460_vm2, %v5557_v45, 0.0  ;;  %v5418_v57 = vadd.f32 %v5417_v51, %v5416_v25  ;;  %v5391_v28 = vadd.f32 %v5390_v9, %v5389_v61 }
 0x58a   : > { %v5807_v32 = vadd.f32 %v5806_v11, %v5805_v31  ;;  %v5812_v26 = vadd.f32 %v5811_v62, %v5810_v1  ;;  %v5426_v58 = vrot.slane %v5425_v54, 2  ;;  %v5842_v16 = vrot.slane %v5841_v56, 2 }
 0x58b   : > { %v5397_v36 = vrot.slane %v5396_v48, 4  ;;  %v5431_v59 = vsel %vm1460_vm2, %v5150_v63, 0.0  ;;  %v5847_v37 = vsel %vm1460_vm2, %v5566_v60, 0.0  ;;  %v5149_v34 = vmul.f32 %v5085_v6, %v5018_v55 }
 0x58c   : > { %v5813_v2 = vrot.slane %v5812_v26, 4  ;;  %v5565_v15 = vmul.f32 %v5501_v13, %v5018_v55  ;;  %v5800_v24 = vadd.f32 %v5799_v8, %v9809_v23  ;;  %v5825_v22 = vadd.f32 %v5824_v43, %v9817_v44 }
 0x58d   : > { %v5834_v25 = vadd.f32 %v5833_v21, %v5832_v50  ;;  %v5398_v5 = vadd.f32 %v5397_v36, %v5396_v48  ;;  %v5392_v10 = vrot.slane %v5391_v28, 1  ;;  %v5430_v0 = vsel %vm1460_vm2, %v5149_v34, 0.0 }
 0x58e   : > { %v5814_v39 = vadd.f32 %v5813_v2, %v5812_v26  ;;  %v5846_v38 = vsel %vm1460_vm2, %v5565_v15, 0.0  ;;  %v5808_v53 = vrot.slane %v5807_v32, 1  ;;  %v5432_v40 = vadd.f32 %v5431_v59, %v5430_v0 }
 0x58f   : > { %v5399_v18 = vrot.slane %v5398_v5, 2  ;;  %v5848_v27 = vadd.f32 %v5847_v37, %v5846_v38  ;;  %v5419_v47 = vrot.slane %v5418_v57, 1  ;;  %v5427_v61 = vadd.f32 %v5426_v58, %v5425_v54 }
 0x590   : > { %v5843_v41 = vadd.f32 %v5842_v16, %v5841_v56  ;;  %v5815_v12 = vrot.slane %v5814_v39, 2  ;;  %v5410_v23 = vrot.slane %v9893_v3, 1  ;;  %v5433_v44 = vrot.slane %v5432_v40, 4 }
 0x591   : > { %v5400_v8 = vadd.f32 %v5399_v18, %v5398_v5  ;;  %v5849_v43 = vrot.slane %v5848_v27, 4  ;;  %v5826_v50 = vrot.slane %v5825_v22, 1  ;;  %v5835_v46 = vrot.slane %v5834_v25, 1 }
 0x592   : > { %v5816_v19 = vadd.f32 %v5815_v12, %v5814_v39  ;;  %v5393_v52 = vadd.f32 %v5392_v10, %v5391_v28  ;;  %v5434_v51 = vadd.f32 %v5433_v44, %v5432_v40  ;;  %v5809_v30 = vadd.f32 %v5808_v53, %v5807_v32 }
 0x593   : > { %v5850_v31 = vadd.f32 %v5849_v43, %v5848_v27  ;;  %v5401_v49 = vrot.slane %v5400_v8, 1  ;;  %v5420_v20 = vadd.f32 %v5419_v47, %v5418_v57  ;;  %v5428_v9 = vrot.slane %v5427_v61, 1 }
 0x594   : > { %v5844_v42 = vrot.slane %v5843_v41, 1  ;;  %v5817_v62 = vrot.slane %v5816_v19, 1  ;;  %v5435_v4 = vrot.slane %v5434_v51, 2  ;;  %v5908_v45 = vsel %vm5887_vm0, %v9871_v29, %v9792_v33 }
 0x595   : > { %v5851_v11 = vrot.slane %v5850_v31, 2  ;;  %v5402_v7 = vadd.f32 %v5401_v49, %v5400_v8  ;;  %v5836_v63 = vadd.f32 %v5835_v46, %v5834_v25  ;;  %v5909_v14 = vsel %vm5889_vm1, %v5393_v52, %v5908_v45 }
 0x596   : > { %v5818_v54 = vadd.f32 %v5817_v62, %v5816_v19  ;;  %v5975_v60 = vsel %vm5954_vm14, %v5800_v24, %v9795_v35  ;;  %v5436_v21 = vadd.f32 %v5435_v4, %v5434_v51  ;;  %v5411_v6 = vadd.f32 %v5410_v23, %v9893_v3 }
 0x597   : > { %v5852_v56 = vadd.f32 %v5851_v11, %v5850_v31  ;;  %v5910_v48 = vsel %vm5891_vm15, %v5402_v7, %v5909_v14  ;;  %v5976_v1 = vsel %vm5956_vm10, %v5809_v30, %v5975_v60  ;;  %v5429_v55 = vadd.f32 %v5428_v9, %v5427_v61 }
 0x598   : > { %v5977_v13 = vsel %vm5958_vm5, %v5818_v54, %v5976_v1  ;;  %v5845_v57 = vadd.f32 %v5844_v42, %v5843_v41  ;;  %v5827_v33 = vadd.f32 %v5826_v50, %v5825_v22  ;;  %v5437_v29 = vrot.slane %v5436_v21, 1 }
 0x599   : > { %v5853_v28 = vrot.slane %v5852_v56, 1  ;;  %v5995_v32 = vsel %vm4069_vm6, %v5910_v48, %v5977_v13  ;;  %v5911_v58 = vsel %vm5887_vm0, %v5420_v20, %v5411_v6 }
 0x59a   : > { %7158 = vmatprep.subr.mxu0 %v5995_v32  ;;  %v5438_v35 = vadd.f32 %v5437_v29, %v5436_v21  ;;  %v5978_v16 = vsel %vm5954_vm14, %v5836_v63, %v5827_v33  ;;  %v5912_v3 = vsel %vm5889_vm1, %v5429_v55, %v5911_v58 }
 0x59b   : > { %7159 = vmatpush3.msra.mxu0 %v5995_v32  ;;  %v5854_v26 = vadd.f32 %v5853_v28, %v5852_v56  ;;  %v5979_v36 = vsel %vm5956_vm10, %v5845_v57, %v5978_v16 }
 0x59c   : > { %7161 = vmatmul.mubr.msk.f32.vlgmr.msra.gmra.mxu0 %vm1460_vm2, %v9866_v17  ;;  %v5913_v59 = vsel %vm5891_vm15, %v5438_v35, %v5912_v3 }
 0x59d   : > { %v5980_v2 = vsel %vm5958_vm5, %v5854_v26, %v5979_v36 }
 0x59e   : > { %v5996_v37 = vsel %vm4069_vm6, %v5913_v59, %v5980_v2 }
 0x59f   : > { %7163 = vmatprep.subr.mxu1 %v5996_v37 }
 0x5a0   : > { %7164 = vmatpush3.msra.mxu1 %v5996_v37 }
 0x5a1   : > { %7166 = vmatmul.mubr.msk.f32.vlgmr.msra.gmra.mxu1 %vm1460_vm2, %v9866_v17 }
 0x5d9   : > { %v7132_v34 = vpop.f32.mrf.mxu0 }
 0x5da   : > { %6606 = vst.msk [vmem:[%s9938_s10 + $0x8] sm:$0xff] %vm1460_vm2, %v7132_v34 }
 0x5db   : > { %v6071_v15 = vpop.f32.mrf.mxu0 }
 0x5dc   : > { %6605 = vst.msk [vmem:[%s9938_s10] sm:$0xff] %vm1460_vm2, %v6071_v15 }
 0x5e3   : > { %v7137_v17 = vpop.f32.mrf.mxu1 }
 0x5e4   : > { %6608 = vst.msk [vmem:[%s9938_s10 + $0x18] sm:$0xff] %vm1460_vm2, %v7137_v17 }
 0x5e5   : > { %v6146_v24 = vpop.f32.mrf.mxu1 }
 0x5e6   : > { %6607 = vst.msk [vmem:[%s9938_s10 + $0x10] sm:$0xff] %vm1460_vm2, %v6146_v24 }
 0x609   : > { %v7142_v22 = vpop.f32.mrf.mxu0 }
 0x60a   : > { %6610 = vst.msk [vmem:[%s9938_s10 + $0x28] sm:$0xff] %vm1460_vm2, %v7142_v22 }
 0x60b   : > { %v6221_v25 = vpop.f32.mrf.mxu0 }
 0x60c   : > { %6609 = vst.msk [vmem:[%s9938_s10 + $0x20] sm:$0xff] %vm1460_vm2, %v6221_v25 }
 0x611   : > { %v7147_v5 = vpop.f32.mrf.mxu1 }
 0x612   : > { %6612 = vst.msk [vmem:[%s9938_s10 + $0x38] sm:$0xff] %vm1460_vm2, %v7147_v5 }
 0x613   : > { %v6296_v10 = vpop.f32.mrf.mxu1 }
 0x614   : > { %6611 = vst.msk [vmem:[%s9938_s10 + $0x30] sm:$0xff] %vm1460_vm2, %v6296_v10 }
 0x638   : > { %v7152_v39 = vpop.f32.mrf.mxu0 }
 0x639   : > { %6614 = vst.msk [vmem:[%s9938_s10 + $0x48] sm:$0xff] %vm1460_vm2, %v7152_v39 }
 0x63a   : > { %v6371_v0 = vpop.f32.mrf.mxu0 }
 0x63b   : > { %6613 = vst.msk [vmem:[%s9938_s10 + $0x40] sm:$0xff] %vm1460_vm2, %v6371_v0 }
 0x642   : > { %v7157_v38 = vpop.f32.mrf.mxu1 }
 0x643   : > { %6616 = vst.msk [vmem:[%s9938_s10 + $0x58] sm:$0xff] %vm1460_vm2, %v7157_v38 }
 0x644   : > { %v6446_v53 = vpop.f32.mrf.mxu1 }
 0x645   : > { %6615 = vst.msk [vmem:[%s9938_s10 + $0x50] sm:$0xff] %vm1460_vm2, %v6446_v53 }
 0x65c   : > { %v7162_v18 = vpop.f32.mrf.mxu0 }
 0x65d   : > { %6618 = vst.msk [vmem:[%s9938_s10 + $0x68] sm:$0xff] %vm1460_vm2, %v7162_v18 }
 0x65e   : > { %v6521_v40 = vpop.f32.mrf.mxu0 }
 0x65f   : > { %6617 = vst.msk [vmem:[%s9938_s10 + $0x60] sm:$0xff] %vm1460_vm2, %v6521_v40 }
 0x661   : > { %v7167_v27 = vpop.f32.mrf.mxu1 }
 0x662   : > { %6620 = vst.msk [vmem:[%s9938_s10 + $0x78] sm:$0xff] %vm1460_vm2, %v7167_v27 }
 0x663   : > { %v6596_v47 = vpop.f32.mrf.mxu1 }
 0x664   : > { %6619 = vst.msk [vmem:[%s9938_s10 + $0x70] sm:$0xff] %vm1460_vm2, %v6596_v47 }
 0x665 PF: > { %s17_s24 = sadd.s32 1, %s7307_s24  }
 0x666   : > { %p14_p4 = scmp.ge.s32.totalorder %s17_s24, 4  }
 0x668   :  { %16 = sbr.rel (!%p14_p4) target bundleno = 1 (0x1), region = 81 }

</bundles_post_ra>
